<compile_context>
chip_gen: v7x
topology: tpu7x:2x2x1
jax: 0.10.0
libtpu: 0.0.40
codegen_flags: <defaults>
</compile_context>

<pallas_src>
import math
import functools

import jax
import jax.numpy as jnp
from jax import lax
from jax.experimental import pallas as pl
from jax.experimental.pallas import tpu as pltpu


def transformer_block_kernel(
    x_ref, mask_ref,
    wqkv_ref, bqkv_ref, wo_ref, bo_ref,
    gamma_ref, beta_ref,
    w1_ref, b1_ref, w2_ref, b2_ref,
    out_ref, attw_ref,
    ctx_scratch,
    *, num_heads, head_dim,
):
    f32 = jnp.float32
    bf16 = jnp.bfloat16
    H, D = num_heads, head_dim
    E = H * D

    x = x_ref[0]                       # (S, E) f32 (residual / LN path)
    x_b = x.astype(bf16)               # bf16 copy for MXU operands
    mask = mask_ref[0]                 # (S, S) int32; 1 -> masked

    # ---- Fused Q/K/V projection: one matmul, bf16 operands, f32 acc ----
    qkv = jnp.dot(x_b, wqkv_ref[...], preferred_element_type=f32) + bqkv_ref[...]
    q = qkv[:, 0 * E:1 * E]
    k = qkv[:, 1 * E:2 * E]
    v = qkv[:, 2 * E:3 * E]

    # Mask handled once as an additive bias (hoisted out of the head loop).
    bias = jnp.where(mask > 0, f32(-1e20), f32(0.0))          # (S, S)
    scale = f32(1.0 / math.sqrt(head_dim))

    # Contract last dims directly (no explicit .T relayout).
    dn_qk = (((1,), (1,)), ((), ()))    # (S,D) x (S,D) -> (S,S)

    # ---- Per-head attention: softmax written straight to the output block,
    #      context written straight into the VMEM (S,E) slab ----
    for h in range(H):
        qh = q[:, h * D:(h + 1) * D].astype(bf16)
        kh = k[:, h * D:(h + 1) * D].astype(bf16)
        vh = v[:, h * D:(h + 1) * D].astype(bf16)

        s = lax.dot_general(qh, kh, dn_qk, preferred_element_type=f32)
        s = (s + bias) * scale

        m = jnp.max(s, axis=-1, keepdims=True)
        e = jnp.exp(s - m)
        attw = e / jnp.sum(e, axis=-1, keepdims=True)          # (S, S) f32
        attw_ref[0, h] = attw.astype(attw_ref.dtype)

        ctx_scratch[:, h * D:(h + 1) * D] = jnp.dot(
            attw.astype(bf16), vh, preferred_element_type=f32)

    attn_out = jnp.dot(ctx_scratch[...].astype(bf16), wo_ref[...],
                       preferred_element_type=f32) + bo_ref[...]

    def layer_norm(z):                                         # f32 math
        mu = jnp.mean(z, axis=-1, keepdims=True)
        var = jnp.mean((z - mu) ** 2, axis=-1, keepdims=True)
        return (z - mu) * lax.rsqrt(var + 1e-5) * gamma_ref[...] + beta_ref[...]

    out1 = layer_norm(x + attn_out)                            # LN(x + attn)

    # ---- MLP head: Linear -> exact GELU (erf) -> Linear ----
    h1 = jnp.dot(out1.astype(bf16), w1_ref[...], preferred_element_type=f32) + b1_ref[...]
    h1 = 0.5 * h1 * (1.0 + lax.erf(h1 * (1.0 / math.sqrt(2.0))))
    h2 = jnp.dot(h1.astype(bf16), w2_ref[...], preferred_element_type=f32) + b2_ref[...]

    out2 = layer_norm(h2 + out1)                               # same LN params
    out_ref[0] = out2.astype(out_ref.dtype)


def transformer_block(x, mask, params, *, num_heads):
    B, S, E = x.shape
    assert E % num_heads == 0, "embed_dim must be divisible by num_heads"
    head_dim = E // num_heads
    H = num_heads
    hidden = params["w1"].shape[1]

    bf16 = jnp.bfloat16
    # Weights go to the MXU -> ship them as bf16 (half DMA bytes / VMEM).
    # Q/K/V weights and biases are fused once here (free on the host side).
    wqkv = jnp.concatenate(
        [params["wq"], params["wk"], params["wv"]], axis=1).astype(bf16)   # (E, 3E)
    bqkv = jnp.concatenate(
        [params["bq"], params["bk"], params["bv"]], axis=1)                # (1, 3E) f32
    wo = params["wo"].astype(bf16)
    w1 = params["w1"].astype(bf16)
    w2 = params["w2"].astype(bf16)

    full2d = lambda shape: pl.BlockSpec(shape, lambda b: (0, 0))

    kernel = functools.partial(
        transformer_block_kernel, num_heads=num_heads, head_dim=head_dim
    )

    # Advisory cost estimate for XLA scheduling around the custom call.
    flops = int(B * (8 * S * E * E + 4 * S * S * E + 4 * S * E * hidden))
    transcendentals = int(B * (H * S * S + S * hidden))
    bytes_accessed = int(
        B * S * E * 4            # x in
        + B * S * S * 4          # mask in
        + B * S * E * 4          # out
        + B * H * S * S * 4      # attention weights out
        + 2 * (4 * E * E + 2 * E * hidden)   # bf16 weights
        + 4 * (6 * E + hidden)               # f32 biases + LN params
    )

    out, attw = pl.pallas_call(
        kernel,
        out_shape=(
            jax.ShapeDtypeStruct((B, S, E), jnp.float32),
            jax.ShapeDtypeStruct((B, H, S, S), jnp.float32),
        ),
        grid_spec=pltpu.PrefetchScalarGridSpec(
            num_scalar_prefetch=0,
            grid=(B,),
            in_specs=[
                pl.BlockSpec((1, S, E), lambda b: (b, 0, 0)),      # x
                pl.BlockSpec((1, S, S), lambda b: (b, 0, 0)),      # mask
                full2d((E, 3 * E)), full2d((1, 3 * E)),            # Wqkv, bqkv
                full2d((E, E)), full2d((1, E)),                    # Wo, bo
                full2d((1, E)), full2d((1, E)),                    # gamma, beta
                full2d((E, hidden)), full2d((1, hidden)),          # W1, b1
                full2d((hidden, E)), full2d((1, E)),               # W2, b2
            ],
            out_specs=[
                pl.BlockSpec((1, S, E), lambda b: (b, 0, 0)),
                pl.BlockSpec((1, H, S, S), lambda b: (b, 0, 0, 0)),
            ],
            scratch_shapes=[pltpu.VMEM((S, E), jnp.float32)],      # head-context slab
        ),
        compiler_params=pltpu.CompilerParams(
            dimension_semantics=("parallel",),
            vmem_limit_bytes=64 * 1024 * 1024,
        ),
        cost_estimate=pl.CostEstimate(
            flops=flops,
            transcendentals=transcendentals,
            bytes_accessed=bytes_accessed,
        ),
    )(
        x, mask,
        wqkv, bqkv, wo, params["bo"],
        params["gamma"], params["beta"],
        w1, params["b1"], w2, params["b2"],
    )
    return out, attw


# ----------------------------------------------------------------------------
# Pure-JAX references for the self-test.
# ----------------------------------------------------------------------------
def reference_transformer_block_f32(x, mask, params, *, num_heads):
    """Full-f32 reference replicating the PyTorch forward exactly."""
    B, S, E = x.shape
    D = E // num_heads
    q = x @ params["wq"] + params["bq"][0]
    k = x @ params["wk"] + params["bk"][0]
    v = x @ params["wv"] + params["bv"][0]
    q = q.reshape(B, S, num_heads, D).transpose(0, 2, 1, 3)
    k = k.reshape(B, S, num_heads, D).transpose(0, 2, 1, 3)
    v = v.reshape(B, S, num_heads, D).transpose(0, 2, 1, 3)
    energy = jnp.einsum("bhqd,bhkd->bhqk", q, k)
    energy = jnp.where(mask[:, None, :, :] > 0, -1e20, energy)
    attw = jax.nn.softmax(energy / math.sqrt(D), axis=-1)
    attn = jnp.einsum("bhqk,bhkd->bhqd", attw, v)
    attn = attn.transpose(0, 2, 1, 3).reshape(B, S, E)
    attn = attn @ params["wo"] + params["bo"][0]

    def ln(z):
        mu = jnp.mean(z, -1, keepdims=True)
        var = jnp.mean((z - mu) ** 2, -1, keepdims=True)
        return (z - mu) * lax.rsqrt(var + 1e-5) * params["gamma"][0] + params["beta"][0]

    out1 = ln(x + attn)
    h1 = out1 @ params["w1"] + params["b1"][0]
    h1 = 0.5 * h1 * (1.0 + lax.erf(h1 / math.sqrt(2.0)))
    h2 = h1 @ params["w2"] + params["b2"][0]
    return ln(h2 + out1), attw


def reference_transformer_block_bf16(x, mask, params, *, num_heads):
    """Same math as the kernel: bf16 matmul operands, f32 accumulation."""
    bf16, f32 = jnp.bfloat16, jnp.float32
    B, S, E = x.shape
    D = E // num_heads

    def linear(a, w, b):
        return jnp.dot(a.astype(bf16), w.astype(bf16),
                       preferred_element_type=f32) + b[0]

    q = linear(x, params["wq"], params["bq"])
    k = linear(x, params["wk"], params["bk"])
    v = linear(x, params["wv"], params["bv"])
    q = q.reshape(B, S, num_heads, D).transpose(0, 2, 1, 3)
    k = k.reshape(B, S, num_heads, D).transpose(0, 2, 1, 3)
    v = v.reshape(B, S, num_heads, D).transpose(0, 2, 1, 3)
    energy = jnp.einsum("bhqd,bhkd->bhqk", q.astype(bf16), k.astype(bf16),
                        preferred_element_type=f32)
    energy = jnp.where(mask[:, None, :, :] > 0, jnp.float32(-1e20), energy)
    scaled = energy / math.sqrt(D)
    m = jnp.max(scaled, -1, keepdims=True)
    e = jnp.exp(scaled - m)
    attw = e / jnp.sum(e, -1, keepdims=True)
    ctx = jnp.einsum("bhqk,bhkd->bhqd", attw.astype(bf16), v.astype(bf16),
                     preferred_element_type=f32)
    ctx = ctx.transpose(0, 2, 1, 3).reshape(B, S, E)
    attn = linear(ctx, params["wo"], params["bo"])

    def ln(z):
        mu = jnp.mean(z, -1, keepdims=True)
        var = jnp.mean((z - mu) ** 2, -1, keepdims=True)
        return (z - mu) * lax.rsqrt(var + 1e-5) * params["gamma"][0] + params["beta"][0]

    out1 = ln(x + attn)
    h1 = linear(out1, params["w1"], params["b1"])
    h1 = 0.5 * h1 * (1.0 + lax.erf(h1 * (1.0 / math.sqrt(2.0))))
    h2 = linear(h1, params["w2"], params["b2"])
    return ln(h2 + out1), attw


if __name__ == "__main__":
    # Small but lane/sublane-aligned shapes (E, S, hidden multiples of 128/8).
    B, S, E, H, HID = 2, 128, 128, 4, 256

    key = jax.random.PRNGKey(0)
    keys = jax.random.split(key, 16)

    def lin(kw, kb, fan_in, fan_out):
        # deterministic synthetic init (not a checkpoint load)
        w = jax.random.normal(kw, (fan_in, fan_out), jnp.float32) * 0.05
        b = jax.random.normal(kb, (1, fan_out), jnp.float32) * 0.05
        return w, b

    wq, bq = lin(keys[0], keys[1], E, E)
    wk, bk = lin(keys[2], keys[3], E, E)
    wv, bv = lin(keys[4], keys[5], E, E)
    wo, bo = lin(keys[6], keys[7], E, E)
    w1, b1 = lin(keys[8], keys[9], E, HID)
    w2, b2 = lin(keys[10], keys[11], HID, E)
    gamma = jnp.ones((1, E), jnp.float32)
    beta = jnp.zeros((1, E), jnp.float32)

    params = dict(wq=wq, bq=bq, wk=wk, bk=bk, wv=wv, bv=bv, wo=wo, bo=bo,
                  gamma=gamma, beta=beta, w1=w1, b1=b1, w2=w2, b2=b2)

    x = jax.random.normal(keys[12], (B, S, E), jnp.float32)
    # causal mask: 1 means "mask this position" (masked_fill semantics)
    causal = (jnp.arange(S)[None, :] > jnp.arange(S)[:, None]).astype(jnp.int32)
    mask = jnp.broadcast_to(causal, (B, S, S))

    out, attw = transformer_block(x, mask, params, num_heads=H)
    jax.block_until_ready(out)
    jax.block_until_ready(attw)

    # Tight check against a reference using the identical bf16-MXU / f32-acc
    # precision recipe (validates the kernel math itself).
    ref16_out, ref16_attw = reference_transformer_block_bf16(x, mask, params, num_heads=H)
    assert jnp.allclose(out, ref16_out, atol=5e-3, rtol=5e-3)
    assert jnp.allclose(attw, ref16_attw, atol=5e-3, rtol=5e-3)

    # Loose check against the full-f32 PyTorch-semantics reference (validates
    # that bf16 MXU inputs are an acceptable approximation).
    ref32_out, ref32_attw = reference_transformer_block_f32(x, mask, params, num_heads=H)
    assert jnp.allclose(out, ref32_out, atol=5e-2, rtol=5e-2)
    assert jnp.allclose(attw, ref32_attw, atol=2e-2, rtol=2e-2)

    print("KERNEL_OK")
</pallas_src>

<mosaic_0001>
module attributes {stable_mosaic.version = 11 : i64} {
  func.func @transformer_block_kernel(%arg0: i32, %arg1: memref<1x128x128xf32, #tpu.memory_space<vmem>>, %arg2: memref<1x128x128xi32, #tpu.memory_space<vmem>>, %arg3: memref<128x384xbf16, #tpu.memory_space<vmem>>, %arg4: memref<1x384xf32, #tpu.memory_space<vmem>>, %arg5: memref<128x128xbf16, #tpu.memory_space<vmem>>, %arg6: memref<1x128xf32, #tpu.memory_space<vmem>>, %arg7: memref<1x128xf32, #tpu.memory_space<vmem>>, %arg8: memref<1x128xf32, #tpu.memory_space<vmem>>, %arg9: memref<128x256xbf16, #tpu.memory_space<vmem>>, %arg10: memref<1x256xf32, #tpu.memory_space<vmem>>, %arg11: memref<256x128xbf16, #tpu.memory_space<vmem>>, %arg12: memref<1x128xf32, #tpu.memory_space<vmem>>, %arg13: memref<1x128x128xf32, #tpu.memory_space<vmem>>, %arg14: memref<1x4x128x128xf32, #tpu.memory_space<vmem>>, %arg15: memref<128x128xf32, #tpu.memory_space<vmem>>) attributes {dimension_semantics = [#tpu.dimension_semantics<parallel>], iteration_bounds = array<i64: 2>, scalar_prefetch = 0 : i64, scratch_operands = 1 : i64, tpu.core_type = #tpu.core_type<tc>, window_params = [{transform_indices = @transform_0, window_bounds = array<i64: 1, 128, 128>}, {transform_indices = @transform_1, window_bounds = array<i64: 1, 128, 128>}, {pipeline_mode = #tpu.pipeline_mode<synchronous>, transform_indices = @transform_2, window_bounds = array<i64: 128, 384>}, {pipeline_mode = #tpu.pipeline_mode<synchronous>, transform_indices = @transform_3, window_bounds = array<i64: 1, 384>}, {pipeline_mode = #tpu.pipeline_mode<synchronous>, transform_indices = @transform_4, window_bounds = array<i64: 128, 128>}, {pipeline_mode = #tpu.pipeline_mode<synchronous>, transform_indices = @transform_5, window_bounds = array<i64: 1, 128>}, {pipeline_mode = #tpu.pipeline_mode<synchronous>, transform_indices = @transform_6, window_bounds = array<i64: 1, 128>}, {pipeline_mode = #tpu.pipeline_mode<synchronous>, transform_indices = @transform_7, window_bounds = array<i64: 1, 128>}, {pipeline_mode = #tpu.pipeline_mode<synchronous>, transform_indices = @transform_8, window_bounds = array<i64: 128, 256>}, {pipeline_mode = #tpu.pipeline_mode<synchronous>, transform_indices = @transform_9, window_bounds = array<i64: 1, 256>}, {pipeline_mode = #tpu.pipeline_mode<synchronous>, transform_indices = @transform_10, window_bounds = array<i64: 256, 128>}, {pipeline_mode = #tpu.pipeline_mode<synchronous>, transform_indices = @transform_11, window_bounds = array<i64: 1, 128>}, {transform_indices = @transform_12, window_bounds = array<i64: 1, 128, 128>}, {transform_indices = @transform_13, window_bounds = array<i64: 1, 4, 128, 128>}]} {
    %c0 = arith.constant 0 : index
    %c0_0 = arith.constant 0 : index
    %c0_1 = arith.constant 0 : index
    %0 = vector.load %arg1[%c0, %c0_0, %c0_1] : memref<1x128x128xf32, #tpu.memory_space<vmem>>, vector<1x128x128xf32>
    %1 = vector.shape_cast %0 : vector<1x128x128xf32> to vector<128x128xf32>
    %2 = arith.truncf %1 : vector<128x128xf32> to vector<128x128xbf16>
    %c0_2 = arith.constant 0 : index
    %c0_3 = arith.constant 0 : index
    %c0_4 = arith.constant 0 : index
    %3 = vector.load %arg2[%c0_2, %c0_3, %c0_4] : memref<1x128x128xi32, #tpu.memory_space<vmem>>, vector<1x128x128xi32>
    %4 = vector.shape_cast %3 : vector<1x128x128xi32> to vector<128x128xi32>
    %c0_5 = arith.constant 0 : index
    %c0_6 = arith.constant 0 : index
    %5 = vector.load %arg3[%c0_5, %c0_6] : memref<128x384xbf16, #tpu.memory_space<vmem>>, vector<128x384xbf16>
    %cst = arith.constant dense<0.000000e+00> : vector<128x384xf32>
    %6 = tpu.matmul %2, %5, %cst {dimension_numbers = #tpu.dot_dimension_numbers<[1], [0], [0], [1], [0, 0, 1, 1], [], []>} : vector<128x128xbf16>, vector<128x384xbf16>, vector<128x384xf32> -> vector<128x384xf32>
    %c0_7 = arith.constant 0 : index
    %c0_8 = arith.constant 0 : index
    %7 = vector.load %arg4[%c0_7, %c0_8] : memref<1x384xf32, #tpu.memory_space<vmem>>, vector<1x384xf32>
    %8 = vector.broadcast %7 : vector<1x384xf32> to vector<128x384xf32>
    %9 = arith.addf %6, %8 : vector<128x384xf32>
    %10 = vector.extract_strided_slice %9 {offsets = [0, 0], sizes = [128, 128], strides = [1, 1]} : vector<128x384xf32> to vector<128x128xf32>
    %11 = vector.extract_strided_slice %9 {offsets = [0, 128], sizes = [128, 128], strides = [1, 1]} : vector<128x384xf32> to vector<128x128xf32>
    %12 = vector.extract_strided_slice %9 {offsets = [0, 256], sizes = [128, 128], strides = [1, 1]} : vector<128x384xf32> to vector<128x128xf32>
    %c0_i32 = arith.constant 0 : i32
    %13 = vector.broadcast %c0_i32 : i32 to vector<128x128xi32>
    %14 = arith.cmpi sgt, %4, %13 : vector<128x128xi32>
    %cst_9 = arith.constant -1.000000e+20 : f32
    %cst_10 = arith.constant 0.000000e+00 : f32
    %15 = vector.broadcast %cst_9 : f32 to vector<128x128xf32>
    %16 = vector.broadcast %cst_10 : f32 to vector<128x128xf32>
    %17 = arith.select %14, %15, %16 : vector<128x128xi1>, vector<128x128xf32>
    %18 = vector.extract_strided_slice %10 {offsets = [0, 0], sizes = [128, 32], strides = [1, 1]} : vector<128x128xf32> to vector<128x32xf32>
    %19 = arith.truncf %18 : vector<128x32xf32> to vector<128x32xbf16>
    %20 = vector.extract_strided_slice %11 {offsets = [0, 0], sizes = [128, 32], strides = [1, 1]} : vector<128x128xf32> to vector<128x32xf32>
    %21 = arith.truncf %20 : vector<128x32xf32> to vector<128x32xbf16>
    %22 = vector.extract_strided_slice %12 {offsets = [0, 0], sizes = [128, 32], strides = [1, 1]} : vector<128x128xf32> to vector<128x32xf32>
    %23 = arith.truncf %22 : vector<128x32xf32> to vector<128x32xbf16>
    %cst_11 = arith.constant dense<0.000000e+00> : vector<128x128xf32>
    %24 = tpu.matmul %19, %21, %cst_11 {dimension_numbers = #tpu.dot_dimension_numbers<[1], [1], [0], [0], [0, 0, 1, 0], [], []>} : vector<128x32xbf16>, vector<128x32xbf16>, vector<128x128xf32> -> vector<128x128xf32>
    %25 = arith.addf %24, %17 : vector<128x128xf32>
    %cst_12 = arith.constant 0.176776692 : f32
    %26 = vector.broadcast %cst_12 : f32 to vector<128x128xf32>
    %27 = arith.mulf %25, %26 : vector<128x128xf32>
    %cst_13 = arith.constant dense<0xFF800000> : vector<128xf32>
    %28 = vector.multi_reduction <maximumf>, %27, %cst_13 [1] : vector<128x128xf32> to vector<128xf32>
    %29 = vector.shape_cast %28 : vector<128xf32> to vector<128x1xf32>
    %30 = vector.broadcast %29 : vector<128x1xf32> to vector<128x128xf32>
    %31 = arith.subf %27, %30 : vector<128x128xf32>
    %32 = math.exp %31 : vector<128x128xf32>
    %cst_14 = arith.constant dense<0.000000e+00> : vector<128xf32>
    %33 = vector.multi_reduction <add>, %32, %cst_14 [1] : vector<128x128xf32> to vector<128xf32>
    %34 = vector.shape_cast %33 : vector<128xf32> to vector<128x1xf32>
    %35 = vector.broadcast %34 : vector<128x1xf32> to vector<128x128xf32>
    %36 = arith.divf %32, %35 : vector<128x128xf32>
    %c0_15 = arith.constant 0 : index
    %c0_16 = arith.constant 0 : index
    %c0_17 = arith.constant 0 : index
    %c0_18 = arith.constant 0 : index
    %37 = vector.load %arg14[%c0_15, %c0_16, %c0_17, %c0_18] : memref<1x4x128x128xf32, #tpu.memory_space<vmem>>, vector<1x1x128x128xf32>
    %38 = vector.shape_cast %37 : vector<1x1x128x128xf32> to vector<128x128xf32>
    %39 = vector.shape_cast %36 : vector<128x128xf32> to vector<1x1x128x128xf32>
    tpu.vector_store %arg14[%c0_15, %c0_16, %c0_17, %c0_18], %39 {strides = array<i32>} : memref<1x4x128x128xf32, #tpu.memory_space<vmem>>, vector<1x1x128x128xf32>,
    %40 = arith.truncf %36 : vector<128x128xf32> to vector<128x128xbf16>
    %cst_19 = arith.constant dense<0.000000e+00> : vector<128x32xf32>
    %41 = tpu.matmul %40, %23, %cst_19 {dimension_numbers = #tpu.dot_dimension_numbers<[1], [0], [0], [1], [0, 0, 1, 1], [], []>} : vector<128x128xbf16>, vector<128x32xbf16>, vector<128x32xf32> -> vector<128x32xf32>
    %c0_20 = arith.constant 0 : index
    %c0_21 = arith.constant 0 : index
    %42 = vector.load %arg15[%c0_20, %c0_21] : memref<128x128xf32, #tpu.memory_space<vmem>>, vector<128x32xf32>
    tpu.vector_store %arg15[%c0_20, %c0_21], %41 {strides = array<i32>} : memref<128x128xf32, #tpu.memory_space<vmem>>, vector<128x32xf32>,
    %43 = vector.extract_strided_slice %10 {offsets = [0, 32], sizes = [128, 32], strides = [1, 1]} : vector<128x128xf32> to vector<128x32xf32>
    %44 = arith.truncf %43 : vector<128x32xf32> to vector<128x32xbf16>
    %45 = vector.extract_strided_slice %11 {offsets = [0, 32], sizes = [128, 32], strides = [1, 1]} : vector<128x128xf32> to vector<128x32xf32>
    %46 = arith.truncf %45 : vector<128x32xf32> to vector<128x32xbf16>
    %47 = vector.extract_strided_slice %12 {offsets = [0, 32], sizes = [128, 32], strides = [1, 1]} : vector<128x128xf32> to vector<128x32xf32>
    %48 = arith.truncf %47 : vector<128x32xf32> to vector<128x32xbf16>
    %cst_22 = arith.constant dense<0.000000e+00> : vector<128x128xf32>
    %49 = tpu.matmul %44, %46, %cst_22 {dimension_numbers = #tpu.dot_dimension_numbers<[1], [1], [0], [0], [0, 0, 1, 0], [], []>} : vector<128x32xbf16>, vector<128x32xbf16>, vector<128x128xf32> -> vector<128x128xf32>
    %50 = arith.addf %49, %17 : vector<128x128xf32>
    %cst_23 = arith.constant 0.176776692 : f32
    %51 = vector.broadcast %cst_23 : f32 to vector<128x128xf32>
    %52 = arith.mulf %50, %51 : vector<128x128xf32>
    %cst_24 = arith.constant dense<0xFF800000> : vector<128xf32>
    %53 = vector.multi_reduction <maximumf>, %52, %cst_24 [1] : vector<128x128xf32> to vector<128xf32>
    %54 = vector.shape_cast %53 : vector<128xf32> to vector<128x1xf32>
    %55 = vector.broadcast %54 : vector<128x1xf32> to vector<128x128xf32>
    %56 = arith.subf %52, %55 : vector<128x128xf32>
    %57 = math.exp %56 : vector<128x128xf32>
    %cst_25 = arith.constant dense<0.000000e+00> : vector<128xf32>
    %58 = vector.multi_reduction <add>, %57, %cst_25 [1] : vector<128x128xf32> to vector<128xf32>
    %59 = vector.shape_cast %58 : vector<128xf32> to vector<128x1xf32>
    %60 = vector.broadcast %59 : vector<128x1xf32> to vector<128x128xf32>
    %61 = arith.divf %57, %60 : vector<128x128xf32>
    %c0_26 = arith.constant 0 : index
    %c1 = arith.constant 1 : index
    %c0_27 = arith.constant 0 : index
    %c0_28 = arith.constant 0 : index
    %62 = vector.load %arg14[%c0_26, %c1, %c0_27, %c0_28] : memref<1x4x128x128xf32, #tpu.memory_space<vmem>>, vector<1x1x128x128xf32>
    %63 = vector.shape_cast %62 : vector<1x1x128x128xf32> to vector<128x128xf32>
    %64 = vector.shape_cast %61 : vector<128x128xf32> to vector<1x1x128x128xf32>
    tpu.vector_store %arg14[%c0_26, %c1, %c0_27, %c0_28], %64 {strides = array<i32>} : memref<1x4x128x128xf32, #tpu.memory_space<vmem>>, vector<1x1x128x128xf32>,
    %65 = arith.truncf %61 : vector<128x128xf32> to vector<128x128xbf16>
    %cst_29 = arith.constant dense<0.000000e+00> : vector<128x32xf32>
    %66 = tpu.matmul %65, %48, %cst_29 {dimension_numbers = #tpu.dot_dimension_numbers<[1], [0], [0], [1], [0, 0, 1, 1], [], []>} : vector<128x128xbf16>, vector<128x32xbf16>, vector<128x32xf32> -> vector<128x32xf32>
    %c0_30 = arith.constant 0 : index
    %c32 = arith.constant 32 : index
    %67 = vector.load %arg15[%c0_30, %c32] : memref<128x128xf32, #tpu.memory_space<vmem>>, vector<128x32xf32>
    tpu.vector_store %arg15[%c0_30, %c32], %66 {strides = array<i32>} : memref<128x128xf32, #tpu.memory_space<vmem>>, vector<128x32xf32>,
    %68 = vector.extract_strided_slice %10 {offsets = [0, 64], sizes = [128, 32], strides = [1, 1]} : vector<128x128xf32> to vector<128x32xf32>
    %69 = arith.truncf %68 : vector<128x32xf32> to vector<128x32xbf16>
    %70 = vector.extract_strided_slice %11 {offsets = [0, 64], sizes = [128, 32], strides = [1, 1]} : vector<128x128xf32> to vector<128x32xf32>
    %71 = arith.truncf %70 : vector<128x32xf32> to vector<128x32xbf16>
    %72 = vector.extract_strided_slice %12 {offsets = [0, 64], sizes = [128, 32], strides = [1, 1]} : vector<128x128xf32> to vector<128x32xf32>
    %73 = arith.truncf %72 : vector<128x32xf32> to vector<128x32xbf16>
    %cst_31 = arith.constant dense<0.000000e+00> : vector<128x128xf32>
    %74 = tpu.matmul %69, %71, %cst_31 {dimension_numbers = #tpu.dot_dimension_numbers<[1], [1], [0], [0], [0, 0, 1, 0], [], []>} : vector<128x32xbf16>, vector<128x32xbf16>, vector<128x128xf32> -> vector<128x128xf32>
    %75 = arith.addf %74, %17 : vector<128x128xf32>
    %cst_32 = arith.constant 0.176776692 : f32
    %76 = vector.broadcast %cst_32 : f32 to vector<128x128xf32>
    %77 = arith.mulf %75, %76 : vector<128x128xf32>
    %cst_33 = arith.constant dense<0xFF800000> : vector<128xf32>
    %78 = vector.multi_reduction <maximumf>, %77, %cst_33 [1] : vector<128x128xf32> to vector<128xf32>
    %79 = vector.shape_cast %78 : vector<128xf32> to vector<128x1xf32>
    %80 = vector.broadcast %79 : vector<128x1xf32> to vector<128x128xf32>
    %81 = arith.subf %77, %80 : vector<128x128xf32>
    %82 = math.exp %81 : vector<128x128xf32>
    %cst_34 = arith.constant dense<0.000000e+00> : vector<128xf32>
    %83 = vector.multi_reduction <add>, %82, %cst_34 [1] : vector<128x128xf32> to vector<128xf32>
    %84 = vector.shape_cast %83 : vector<128xf32> to vector<128x1xf32>
    %85 = vector.broadcast %84 : vector<128x1xf32> to vector<128x128xf32>
    %86 = arith.divf %82, %85 : vector<128x128xf32>
    %c0_35 = arith.constant 0 : index
    %c2 = arith.constant 2 : index
    %c0_36 = arith.constant 0 : index
    %c0_37 = arith.constant 0 : index
    %87 = vector.load %arg14[%c0_35, %c2, %c0_36, %c0_37] : memref<1x4x128x128xf32, #tpu.memory_space<vmem>>, vector<1x1x128x128xf32>
    %88 = vector.shape_cast %87 : vector<1x1x128x128xf32> to vector<128x128xf32>
    %89 = vector.shape_cast %86 : vector<128x128xf32> to vector<1x1x128x128xf32>
    tpu.vector_store %arg14[%c0_35, %c2, %c0_36, %c0_37], %89 {strides = array<i32>} : memref<1x4x128x128xf32, #tpu.memory_space<vmem>>, vector<1x1x128x128xf32>,
    %90 = arith.truncf %86 : vector<128x128xf32> to vector<128x128xbf16>
    %cst_38 = arith.constant dense<0.000000e+00> : vector<128x32xf32>
    %91 = tpu.matmul %90, %73, %cst_38 {dimension_numbers = #tpu.dot_dimension_numbers<[1], [0], [0], [1], [0, 0, 1, 1], [], []>} : vector<128x128xbf16>, vector<128x32xbf16>, vector<128x32xf32> -> vector<128x32xf32>
    %c0_39 = arith.constant 0 : index
    %c64 = arith.constant 64 : index
    %92 = vector.load %arg15[%c0_39, %c64] : memref<128x128xf32, #tpu.memory_space<vmem>>, vector<128x32xf32>
    tpu.vector_store %arg15[%c0_39, %c64], %91 {strides = array<i32>} : memref<128x128xf32, #tpu.memory_space<vmem>>, vector<128x32xf32>,
    %93 = vector.extract_strided_slice %10 {offsets = [0, 96], sizes = [128, 32], strides = [1, 1]} : vector<128x128xf32> to vector<128x32xf32>
    %94 = arith.truncf %93 : vector<128x32xf32> to vector<128x32xbf16>
    %95 = vector.extract_strided_slice %11 {offsets = [0, 96], sizes = [128, 32], strides = [1, 1]} : vector<128x128xf32> to vector<128x32xf32>
    %96 = arith.truncf %95 : vector<128x32xf32> to vector<128x32xbf16>
    %97 = vector.extract_strided_slice %12 {offsets = [0, 96], sizes = [128, 32], strides = [1, 1]} : vector<128x128xf32> to vector<128x32xf32>
    %98 = arith.truncf %97 : vector<128x32xf32> to vector<128x32xbf16>
    %cst_40 = arith.constant dense<0.000000e+00> : vector<128x128xf32>
    %99 = tpu.matmul %94, %96, %cst_40 {dimension_numbers = #tpu.dot_dimension_numbers<[1], [1], [0], [0], [0, 0, 1, 0], [], []>} : vector<128x32xbf16>, vector<128x32xbf16>, vector<128x128xf32> -> vector<128x128xf32>
    %100 = arith.addf %99, %17 : vector<128x128xf32>
    %cst_41 = arith.constant 0.176776692 : f32
    %101 = vector.broadcast %cst_41 : f32 to vector<128x128xf32>
    %102 = arith.mulf %100, %101 : vector<128x128xf32>
    %cst_42 = arith.constant dense<0xFF800000> : vector<128xf32>
    %103 = vector.multi_reduction <maximumf>, %102, %cst_42 [1] : vector<128x128xf32> to vector<128xf32>
    %104 = vector.shape_cast %103 : vector<128xf32> to vector<128x1xf32>
    %105 = vector.broadcast %104 : vector<128x1xf32> to vector<128x128xf32>
    %106 = arith.subf %102, %105 : vector<128x128xf32>
    %107 = math.exp %106 : vector<128x128xf32>
    %cst_43 = arith.constant dense<0.000000e+00> : vector<128xf32>
    %108 = vector.multi_reduction <add>, %107, %cst_43 [1] : vector<128x128xf32> to vector<128xf32>
    %109 = vector.shape_cast %108 : vector<128xf32> to vector<128x1xf32>
    %110 = vector.broadcast %109 : vector<128x1xf32> to vector<128x128xf32>
    %111 = arith.divf %107, %110 : vector<128x128xf32>
    %c0_44 = arith.constant 0 : index
    %c3 = arith.constant 3 : index
    %c0_45 = arith.constant 0 : index
    %c0_46 = arith.constant 0 : index
    %112 = vector.load %arg14[%c0_44, %c3, %c0_45, %c0_46] : memref<1x4x128x128xf32, #tpu.memory_space<vmem>>, vector<1x1x128x128xf32>
    %113 = vector.shape_cast %112 : vector<1x1x128x128xf32> to vector<128x128xf32>
    %114 = vector.shape_cast %111 : vector<128x128xf32> to vector<1x1x128x128xf32>
    tpu.vector_store %arg14[%c0_44, %c3, %c0_45, %c0_46], %114 {strides = array<i32>} : memref<1x4x128x128xf32, #tpu.memory_space<vmem>>, vector<1x1x128x128xf32>,
    %115 = arith.truncf %111 : vector<128x128xf32> to vector<128x128xbf16>
    %cst_47 = arith.constant dense<0.000000e+00> : vector<128x32xf32>
    %116 = tpu.matmul %115, %98, %cst_47 {dimension_numbers = #tpu.dot_dimension_numbers<[1], [0], [0], [1], [0, 0, 1, 1], [], []>} : vector<128x128xbf16>, vector<128x32xbf16>, vector<128x32xf32> -> vector<128x32xf32>
    %c0_48 = arith.constant 0 : index
    %c96 = arith.constant 96 : index
    %117 = vector.load %arg15[%c0_48, %c96] : memref<128x128xf32, #tpu.memory_space<vmem>>, vector<128x32xf32>
    tpu.vector_store %arg15[%c0_48, %c96], %116 {strides = array<i32>} : memref<128x128xf32, #tpu.memory_space<vmem>>, vector<128x32xf32>,
    %c0_49 = arith.constant 0 : index
    %c0_50 = arith.constant 0 : index
    %118 = vector.load %arg15[%c0_49, %c0_50] : memref<128x128xf32, #tpu.memory_space<vmem>>, vector<128x128xf32>
    %119 = arith.truncf %118 : vector<128x128xf32> to vector<128x128xbf16>
    %c0_51 = arith.constant 0 : index
    %c0_52 = arith.constant 0 : index
    %120 = vector.load %arg5[%c0_51, %c0_52] : memref<128x128xbf16, #tpu.memory_space<vmem>>, vector<128x128xbf16>
    %cst_53 = arith.constant dense<0.000000e+00> : vector<128x128xf32>
    %121 = tpu.matmul %119, %120, %cst_53 {dimension_numbers = #tpu.dot_dimension_numbers<[1], [0], [0], [1], [0, 0, 1, 1], [], []>} : vector<128x128xbf16>, vector<128x128xbf16>, vector<128x128xf32> -> vector<128x128xf32>
    %c0_54 = arith.constant 0 : index
    %c0_55 = arith.constant 0 : index
    %122 = vector.load %arg6[%c0_54, %c0_55] : memref<1x128xf32, #tpu.memory_space<vmem>>, vector<1x128xf32>
    %123 = vector.broadcast %122 : vector<1x128xf32> to vector<128x128xf32>
    %124 = arith.addf %121, %123 : vector<128x128xf32>
    %125 = arith.addf %1, %124 : vector<128x128xf32>
    %cst_56 = arith.constant dense<0.000000e+00> : vector<128xf32>
    %126 = vector.multi_reduction <add>, %125, %cst_56 [1] : vector<128x128xf32> to vector<128xf32>
    %127 = vector.shape_cast %126 : vector<128xf32> to vector<128x1xf32>
    %cst_57 = arith.constant 1.280000e+02 : f32
    %128 = vector.broadcast %cst_57 : f32 to vector<128x1xf32>
    %129 = arith.divf %127, %128 : vector<128x1xf32>
    %130 = vector.broadcast %129 : vector<128x1xf32> to vector<128x128xf32>
    %131 = arith.subf %125, %130 : vector<128x128xf32>
    %132 = arith.mulf %131, %131 : vector<128x128xf32>
    %cst_58 = arith.constant dense<0.000000e+00> : vector<128xf32>
    %133 = vector.multi_reduction <add>, %132, %cst_58 [1] : vector<128x128xf32> to vector<128xf32>
    %134 = vector.shape_cast %133 : vector<128xf32> to vector<128x1xf32>
    %cst_59 = arith.constant 1.280000e+02 : f32
    %135 = vector.broadcast %cst_59 : f32 to vector<128x1xf32>
    %136 = arith.divf %134, %135 : vector<128x1xf32>
    %137 = vector.broadcast %129 : vector<128x1xf32> to vector<128x128xf32>
    %138 = arith.subf %125, %137 : vector<128x128xf32>
    %cst_60 = arith.constant 9.99999974E-6 : f32
    %139 = vector.broadcast %cst_60 : f32 to vector<128x1xf32>
    %140 = arith.addf %136, %139 : vector<128x1xf32>
    %141 = math.rsqrt %140 : vector<128x1xf32>
    %142 = vector.broadcast %141 : vector<128x1xf32> to vector<128x128xf32>
    %143 = arith.mulf %138, %142 : vector<128x128xf32>
    %c0_61 = arith.constant 0 : index
    %c0_62 = arith.constant 0 : index
    %144 = vector.load %arg7[%c0_61, %c0_62] : memref<1x128xf32, #tpu.memory_space<vmem>>, vector<1x128xf32>
    %145 = vector.broadcast %144 : vector<1x128xf32> to vector<128x128xf32>
    %146 = arith.mulf %143, %145 : vector<128x128xf32>
    %c0_63 = arith.constant 0 : index
    %c0_64 = arith.constant 0 : index
    %147 = vector.load %arg8[%c0_63, %c0_64] : memref<1x128xf32, #tpu.memory_space<vmem>>, vector<1x128xf32>
    %148 = vector.broadcast %147 : vector<1x128xf32> to vector<128x128xf32>
    %149 = arith.addf %146, %148 : vector<128x128xf32>
    %150 = arith.truncf %149 : vector<128x128xf32> to vector<128x128xbf16>
    %c0_65 = arith.constant 0 : index
    %c0_66 = arith.constant 0 : index
    %151 = vector.load %arg9[%c0_65, %c0_66] : memref<128x256xbf16, #tpu.memory_space<vmem>>, vector<128x256xbf16>
    %cst_67 = arith.constant dense<0.000000e+00> : vector<128x256xf32>
    %152 = tpu.matmul %150, %151, %cst_67 {dimension_numbers = #tpu.dot_dimension_numbers<[1], [0], [0], [1], [0, 0, 1, 1], [], []>} : vector<128x128xbf16>, vector<128x256xbf16>, vector<128x256xf32> -> vector<128x256xf32>
    %c0_68 = arith.constant 0 : index
    %c0_69 = arith.constant 0 : index
    %153 = vector.load %arg10[%c0_68, %c0_69] : memref<1x256xf32, #tpu.memory_space<vmem>>, vector<1x256xf32>
    %154 = vector.broadcast %153 : vector<1x256xf32> to vector<128x256xf32>
    %155 = arith.addf %152, %154 : vector<128x256xf32>
    %cst_70 = arith.constant 5.000000e-01 : f32
    %156 = vector.broadcast %cst_70 : f32 to vector<128x256xf32>
    %157 = arith.mulf %156, %155 : vector<128x256xf32>
    %cst_71 = arith.constant 0.707106769 : f32
    %158 = vector.broadcast %cst_71 : f32 to vector<128x256xf32>
    %159 = arith.mulf %155, %158 : vector<128x256xf32>
    %160 = math.erf %159 : vector<128x256xf32>
    %cst_72 = arith.constant 1.000000e+00 : f32
    %161 = vector.broadcast %cst_72 : f32 to vector<128x256xf32>
    %162 = arith.addf %161, %160 : vector<128x256xf32>
    %163 = arith.mulf %157, %162 : vector<128x256xf32>
    %164 = arith.truncf %163 : vector<128x256xf32> to vector<128x256xbf16>
    %c0_73 = arith.constant 0 : index
    %c0_74 = arith.constant 0 : index
    %165 = vector.load %arg11[%c0_73, %c0_74] : memref<256x128xbf16, #tpu.memory_space<vmem>>, vector<256x128xbf16>
    %cst_75 = arith.constant dense<0.000000e+00> : vector<128x128xf32>
    %166 = tpu.matmul %164, %165, %cst_75 {dimension_numbers = #tpu.dot_dimension_numbers<[1], [0], [0], [1], [0, 0, 1, 1], [], []>} : vector<128x256xbf16>, vector<256x128xbf16>, vector<128x128xf32> -> vector<128x128xf32>
    %c0_76 = arith.constant 0 : index
    %c0_77 = arith.constant 0 : index
    %167 = vector.load %arg12[%c0_76, %c0_77] : memref<1x128xf32, #tpu.memory_space<vmem>>, vector<1x128xf32>
    %168 = vector.broadcast %167 : vector<1x128xf32> to vector<128x128xf32>
    %169 = arith.addf %166, %168 : vector<128x128xf32>
    %170 = arith.addf %169, %149 : vector<128x128xf32>
    %cst_78 = arith.constant dense<0.000000e+00> : vector<128xf32>
    %171 = vector.multi_reduction <add>, %170, %cst_78 [1] : vector<128x128xf32> to vector<128xf32>
    %172 = vector.shape_cast %171 : vector<128xf32> to vector<128x1xf32>
    %cst_79 = arith.constant 1.280000e+02 : f32
    %173 = vector.broadcast %cst_79 : f32 to vector<128x1xf32>
    %174 = arith.divf %172, %173 : vector<128x1xf32>
    %175 = vector.broadcast %174 : vector<128x1xf32> to vector<128x128xf32>
    %176 = arith.subf %170, %175 : vector<128x128xf32>
    %177 = arith.mulf %176, %176 : vector<128x128xf32>
    %cst_80 = arith.constant dense<0.000000e+00> : vector<128xf32>
    %178 = vector.multi_reduction <add>, %177, %cst_80 [1] : vector<128x128xf32> to vector<128xf32>
    %179 = vector.shape_cast %178 : vector<128xf32> to vector<128x1xf32>
    %cst_81 = arith.constant 1.280000e+02 : f32
    %180 = vector.broadcast %cst_81 : f32 to vector<128x1xf32>
    %181 = arith.divf %179, %180 : vector<128x1xf32>
    %182 = vector.broadcast %174 : vector<128x1xf32> to vector<128x128xf32>
    %183 = arith.subf %170, %182 : vector<128x128xf32>
    %cst_82 = arith.constant 9.99999974E-6 : f32
    %184 = vector.broadcast %cst_82 : f32 to vector<128x1xf32>
    %185 = arith.addf %181, %184 : vector<128x1xf32>
    %186 = math.rsqrt %185 : vector<128x1xf32>
    %187 = vector.broadcast %186 : vector<128x1xf32> to vector<128x128xf32>
    %188 = arith.mulf %183, %187 : vector<128x128xf32>
    %c0_83 = arith.constant 0 : index
    %c0_84 = arith.constant 0 : index
    %189 = vector.load %arg7[%c0_83, %c0_84] : memref<1x128xf32, #tpu.memory_space<vmem>>, vector<1x128xf32>
    %190 = vector.broadcast %189 : vector<1x128xf32> to vector<128x128xf32>
    %191 = arith.mulf %188, %190 : vector<128x128xf32>
    %c0_85 = arith.constant 0 : index
    %c0_86 = arith.constant 0 : index
    %192 = vector.load %arg8[%c0_85, %c0_86] : memref<1x128xf32, #tpu.memory_space<vmem>>, vector<1x128xf32>
    %193 = vector.broadcast %192 : vector<1x128xf32> to vector<128x128xf32>
    %194 = arith.addf %191, %193 : vector<128x128xf32>
    %c0_87 = arith.constant 0 : index
    %c0_88 = arith.constant 0 : index
    %c0_89 = arith.constant 0 : index
    %195 = vector.load %arg13[%c0_87, %c0_88, %c0_89] : memref<1x128x128xf32, #tpu.memory_space<vmem>>, vector<1x128x128xf32>
    %196 = vector.shape_cast %195 : vector<1x128x128xf32> to vector<128x128xf32>
    %197 = vector.shape_cast %194 : vector<128x128xf32> to vector<1x128x128xf32>
    tpu.vector_store %arg13[%c0_87, %c0_88, %c0_89], %197 {strides = array<i32>} : memref<1x128x128xf32, #tpu.memory_space<vmem>>, vector<1x128x128xf32>,
    return
  }
  func.func @transform_0(%arg0: i32) -> (i32, i32, i32) {
    %c0_i32 = arith.constant 0 : i32
    %c0_i32_0 = arith.constant 0 : i32
    %c0_i32_1 = arith.constant 0 : i32
    return %arg0, %c0_i32, %c0_i32_0 : i32, i32, i32
  }
  func.func @transform_1(%arg0: i32) -> (i32, i32, i32) {
    %c0_i32 = arith.constant 0 : i32
    %c0_i32_0 = arith.constant 0 : i32
    %c0_i32_1 = arith.constant 0 : i32
    return %arg0, %c0_i32, %c0_i32_0 : i32, i32, i32
  }
  func.func @transform_2(%arg0: i32) -> (i32, i32) {
    %c0_i32 = arith.constant 0 : i32
    %c0_i32_0 = arith.constant 0 : i32
    %c0_i32_1 = arith.constant 0 : i32
    return %c0_i32, %c0_i32_0 : i32, i32
  }
  func.func @transform_3(%arg0: i32) -> (i32, i32) {
    %c0_i32 = arith.constant 0 : i32
    %c0_i32_0 = arith.constant 0 : i32
    %c0_i32_1 = arith.constant 0 : i32
    return %c0_i32, %c0_i32_0 : i32, i32
  }
  func.func @transform_4(%arg0: i32) -> (i32, i32) {
    %c0_i32 = arith.constant 0 : i32
    %c0_i32_0 = arith.constant 0 : i32
    %c0_i32_1 = arith.constant 0 : i32
    return %c0_i32, %c0_i32_0 : i32, i32
  }
  func.func @transform_5(%arg0: i32) -> (i32, i32) {
    %c0_i32 = arith.constant 0 : i32
    %c0_i32_0 = arith.constant 0 : i32
    %c0_i32_1 = arith.constant 0 : i32
    return %c0_i32, %c0_i32_0 : i32, i32
  }
  func.func @transform_6(%arg0: i32) -> (i32, i32) {
    %c0_i32 = arith.constant 0 : i32
    %c0_i32_0 = arith.constant 0 : i32
    %c0_i32_1 = arith.constant 0 : i32
    return %c0_i32, %c0_i32_0 : i32, i32
  }
  func.func @transform_7(%arg0: i32) -> (i32, i32) {
    %c0_i32 = arith.constant 0 : i32
    %c0_i32_0 = arith.constant 0 : i32
    %c0_i32_1 = arith.constant 0 : i32
    return %c0_i32, %c0_i32_0 : i32, i32
  }
  func.func @transform_8(%arg0: i32) -> (i32, i32) {
    %c0_i32 = arith.constant 0 : i32
    %c0_i32_0 = arith.constant 0 : i32
    %c0_i32_1 = arith.constant 0 : i32
    return %c0_i32, %c0_i32_0 : i32, i32
  }
  func.func @transform_9(%arg0: i32) -> (i32, i32) {
    %c0_i32 = arith.constant 0 : i32
    %c0_i32_0 = arith.constant 0 : i32
    %c0_i32_1 = arith.constant 0 : i32
    return %c0_i32, %c0_i32_0 : i32, i32
  }
  func.func @transform_10(%arg0: i32) -> (i32, i32) {
    %c0_i32 = arith.constant 0 : i32
    %c0_i32_0 = arith.constant 0 : i32
    %c0_i32_1 = arith.constant 0 : i32
    return %c0_i32, %c0_i32_0 : i32, i32
  }
  func.func @transform_11(%arg0: i32) -> (i32, i32) {
    %c0_i32 = arith.constant 0 : i32
    %c0_i32_0 = arith.constant 0 : i32
    %c0_i32_1 = arith.constant 0 : i32
    return %c0_i32, %c0_i32_0 : i32, i32
  }
  func.func @transform_12(%arg0: i32) -> (i32, i32, i32) {
    %c0_i32 = arith.constant 0 : i32
    %c0_i32_0 = arith.constant 0 : i32
    %c0_i32_1 = arith.constant 0 : i32
    return %arg0, %c0_i32, %c0_i32_0 : i32, i32, i32
  }
  func.func @transform_13(%arg0: i32) -> (i32, i32, i32, i32) {
    %c0_i32 = arith.constant 0 : i32
    %c0_i32_0 = arith.constant 0 : i32
    %c0_i32_1 = arith.constant 0 : i32
    %c0_i32_2 = arith.constant 0 : i32
    return %arg0, %c0_i32, %c0_i32_0, %c0_i32_1 : i32, i32, i32, i32
  }
}

</mosaic_0001>

<bundles_post_ra>
// kernel: tpu_custom_call.1
= control target key start
LH: loop header
LB: loop body
LE: loop exit
PB: predicated region body
PF: predicated region fallthrough
CT: control target
= control target key end

     0   :  { %s9299_s0 = inlined_call_operand.hbm [shape: f32[2,128,128], index: 0, kind: input, shape index: {}]   ;;  %s9300_s1 = inlined_call_operand.hbm [shape: s32[2,128,128], index: 1, kind: input, shape index: {}]   ;;  %s9301_s2 = inlined_call_operand.hbm [shape: bf16[128,384], index: 2, kind: input, shape index: {}]   ;;  %s9302_s3 = inlined_call_operand.hbm [shape: f32[1,384], index: 3, kind: input, shape index: {}]   ;;  %s9303_s4 = inlined_call_operand.hbm [shape: bf16[128,128], index: 4, kind: input, shape index: {}]   ;;  %s9304_s5 = inlined_call_operand.hbm [shape: f32[1,128], index: 5, kind: input, shape index: {}]   ;;  %s9305_s6 = inlined_call_operand.hbm [shape: f32[1,128], index: 6, kind: input, shape index: {}]   ;;  %s9306_s7 = inlined_call_operand.hbm [shape: f32[1,128], index: 7, kind: input, shape index: {}]   ;;  %s9307_s8 = inlined_call_operand.hbm [shape: bf16[128,256], index: 8, kind: input, shape index: {}]   ;;  %s9308_s9 = inlined_call_operand.hbm [shape: f32[1,256], index: 9, kind: input, shape index: {}]   ;;  %s9309_s10 = inlined_call_operand.hbm [shape: bf16[256,128], index: 10, kind: input, shape index: {}]   ;;  %s9310_s11 = inlined_call_operand.hbm [shape: f32[1,128], index: 11, kind: input, shape index: {}]   ;;  %s9311_s12 = inlined_call_operand.hbm [shape: f32[2,128,128], index: 12, kind: output, shape index: {0}]   ;;  %s9312_s13 = inlined_call_operand.hbm [shape: f32[2,4,128,128], index: 13, kind: output, shape index: {1}]  }
   0x1   :  { %9363 = sst [smem:[#allocation70_spill]] %s9299_s0 }
   0x2   :  { %9364 = sst [smem:[#allocation71_spill]] %s9300_s1 }
   0x3   :  { %9365 = sst [smem:[#allocation72_spill]] %s9301_s2 }
   0x4   :  { %9366 = sst [smem:[#allocation73_spill]] %s9302_s3 }
   0x5   :  { %9367 = sst [smem:[#allocation74_spill]] %s9303_s4 }
   0x6   :  { %9368 = sst [smem:[#allocation75_spill]] %s9304_s5 }
   0x7   :  { %9369 = sst [smem:[#allocation76_spill]] %s9305_s6 }
   0x8   :  { %9370 = sst [smem:[#allocation77_spill]] %s9306_s7 }
   0x9   :  { %9371 = sst [smem:[#allocation78_spill]] %s9307_s8 }
   0xa   :  { %9372 = sst [smem:[#allocation79_spill]] %s9311_s12 }
   0xb   :  { %9373 = sst [smem:[#allocation80_spill]] %s9312_s13 }
   0xc   :  { %19 = vsyncpa [#allocation4], 0 }
   0xd   :  { %21 = vsyncpa [#allocation4 + $0x1], 0 }
   0xe   :  { %22 = vsyncpa [#allocation7], 0 }
   0xf   :  { %24 = vsyncpa [#allocation7 + $0x1], 0 }
  0x10   :  { %25 = vsyncpa [#allocation10], 0 }
  0x11   :  { %26 = vsyncpa [#allocation13], 0 }
  0x12   :  { %27 = vsyncpa [#allocation16], 0 }
  0x13   :  { %28 = vsyncpa [#allocation19], 0 }
  0x14   :  { %29 = vsyncpa [#allocation22], 0 }
  0x15   :  { %30 = vsyncpa [#allocation5], 0 }
  0x16   :  { %32 = vsyncpa [#allocation5 + $0x1], 0 }
  0x17   :  { %33 = vsyncpa [#allocation25], 0 }
  0x18   :  { %35 = vsyncpa [#allocation25 + $0x1], 0  ;;  %s6855_s25 = smov 0   ;;  %s6857_s26 = smov 0  }
  0x19   :  { %s6859_s27 = smov 0   ;;  %s6861_s28 = smov 0  }
  0x1a LB: > { %s6758_s29 = smov [#allocation8]   ;;  %s6876_s14 = sadd.s32 4294967295, %s6756_s28   ;;  %s6756_s28 = sphi %s6861_s28, %s9504_s28   ;;  %s6752_s27 = sphi %s6859_s27, %s9503_s27   ;;  %s6748_s26 = sphi %s6857_s26, %s9502_s26   ;;  %s6744_s25 = sphi %s6855_s25, %s9501_s25  }
  0x1b   : > { %s372_s30 = sshll.u32 %s6758_s29, 4  ;;  %p4853_p0 = scmp.ge.s32.totalorder %s6756_s28, 1  ;;  %s6881_s30 = int_to_ptr.vmem [resolvable:$true] %s372_s30 }
  0x1c   : > { %p9318_p1 = scmp.eq.s32.totalorder %s6876_s14, 0  ;;  %p360_p2 = scmp.lt.s32.totalorder %s6756_s28, 3 }
  0x1d   : > { %s6759_s16 = smov [#allocation9]   ;;  %s6760_s19 = smov [#allocation12]  }
  0x1e   : > { %p6883_p3 = pnand %p4853_p0, %p360_p2  ;;  %s386_s17 = sshll.u32 %s6759_s16, 4  ;;  %s6896_s17 = int_to_ptr.vmem [resolvable:$true] %s386_s17 }
  0x1f   : > { %s410_s20 = sshll.u32 %s6760_s19, 4  ;;  %s9377_s2 = sld [smem:[#allocation72_spill]]  ;;  %s6898_s20 = int_to_ptr.vmem [resolvable:$true] %s410_s20 }
  0x20   : > { %s9374_s15 = scalar_select %p6883_p3, 1, 0 }
  0x21   : > { %p5686_p5 = pneg %p6883_p3 }
  0x22   : > { %9375 = sst [smem:[#allocation36_spill]] %s9374_s15 }
  0x23   : > { %p6892_p6 = pnand %p5686_p5, %p9318_p1 }
  0x25   : > { %s6290_s23 = scalar_lea.hbm %s9377_s2, 3072  ;;  %p6908_p8 = pneg %p6892_p6 }
  0x26   : > { %p6291_p7 = scmp.ne.s32.totalorder %s9377_s2, %s6290_s23  ;;  %p6297_p11 = scmp.lt.u32.totalorder %s6290_s23, %s9377_s2 }
  0x28   : > { %p6293_p9 = pnand %p6908_p8, %p6291_p7 }
  0x2a   : > { %p6294_p10 = pneg %p6293_p9 }
  0x2c   : > { %p6299_p12 = pnand %p6297_p11, %p6294_p10 }
  0x2e   : > { %6302 = shalt.err (!%p6299_p12)
}
  0x2f   : > { %s6303_s21 = scalar_lea.vmem %s6881_s30, 3072  ;;  %p6311_p5 = scmp.lt.s32.totalorder %s6881_s30, %s6881_s30 }
  0x30   : > { %p6304_p13 = scmp.ne.s32.totalorder %s6881_s30, %s6303_s21  ;;  %p6312_p4 = scmp.lt.s32.totalorder %s6303_s21, %s6303_s21 }
  0x32   : > { %p6306_p0 = pnand %p6304_p13, %p6908_p8  ;;  %p6313_p7 = por %p6312_p4, %p6311_p5 }
  0x34   : > { %p6307_p2 = pneg %p6306_p0 }
  0x36   : > { %p6314_p9 = pnand %p6313_p7, %p6307_p2 }
  0x38   : > { %6317 = shalt.err (!%p6314_p9)
}
  0x39   : > { %s6761_s22 = smov 192   ;;  %s6762_s12 = smov 12  }
  0x3a   : > { %5689 = dma.hbm_to_vmem [thread:$0]  (!%p6892_p6), %s9377_s2, 3072, %s6881_s30, [#allocation7], %s6761_s22, %s6761_s22, %s6762_s12  }
  0x3b   : > { %s9379_s3 = sld [smem:[#allocation73_spill]] }
  0x41   : > { %s6318_s13 = scalar_lea.hbm %s9379_s3, 48 }
  0x42   : > { %p6319_p4 = scmp.ne.s32.totalorder %s9379_s3, %s6318_s13  ;;  %p6325_p12 = scmp.lt.u32.totalorder %s6318_s13, %s9379_s3 }
  0x44   : > { %p6321_p10 = pnand %p6319_p4, %p6908_p8 }
  0x46   : > { %p6322_p11 = pneg %p6321_p10 }
  0x48   : > { %p6327_p13 = pnand %p6325_p12, %p6322_p11 }
  0x4a   : > { %6330 = shalt.err (!%p6327_p13)
}
  0x4b   : > { %s6331_s30 = scalar_lea.vmem %s6896_s17, 48  ;;  %s6338_s1 = scalar_lea.vmem %s6896_s17, 64 }
  0x4c   : > { %p6332_p0 = scmp.ne.s32.totalorder %s6896_s17, %s6331_s30  ;;  %p6339_p7 = scmp.lt.s32.totalorder %s6896_s17, %s6896_s17 }
  0x4d   : > { %p6340_p9 = scmp.lt.s32.totalorder %s6338_s1, %s6331_s30 }
  0x4e   : > { %p6334_p2 = pnand %p6332_p0, %p6908_p8 }
  0x4f   : > { %p6341_p4 = por %p6340_p9, %p6339_p7 }
  0x50   : > { %p6335_p5 = pneg %p6334_p2 }
  0x52   : > { %p6342_p10 = pnand %p6341_p4, %p6335_p5 }
  0x54   : > { %6345 = shalt.err (!%p6342_p10)
}
  0x55   : > { %5692 = dma.hbm_to_vmem [thread:$0]  (!%p6892_p6), %s9379_s3, 48, %s6896_s17, [#allocation10]  }
  0x56   : > { %s9380_s5 = sld [smem:[#allocation75_spill]] }
  0x5c   : > { %s6346_s12 = scalar_lea.hbm %s9380_s5, 16 }
  0x5d   : > { %p6347_p11 = scmp.ne.s32.totalorder %s9380_s5, %s6346_s12  ;;  %p6353_p0 = scmp.lt.u32.totalorder %s6346_s12, %s9380_s5 }
  0x5f   : > { %p6349_p12 = pnand %p6347_p11, %p6908_p8 }
  0x61   : > { %p6350_p13 = pneg %p6349_p12 }
  0x63   : > { %p6355_p2 = pnand %p6353_p0, %p6350_p13 }
  0x65   : > { %6358 = shalt.err (!%p6355_p2)
}
  0x66   : > { %s6359_s17 = scalar_lea.vmem %s6898_s20, 16  ;;  %s6366_s21 = scalar_lea.vmem %s6898_s20, 32 }
  0x67   : > { %p6360_p5 = scmp.ne.s32.totalorder %s6898_s20, %s6359_s17  ;;  %p6367_p4 = scmp.lt.s32.totalorder %s6898_s20, %s6898_s20 }
  0x68   : > { %p6368_p10 = scmp.lt.s32.totalorder %s6366_s21, %s6359_s17 }
  0x69   : > { %p6362_p7 = pnand %p6360_p5, %p6908_p8 }
  0x6a   : > { %p6369_p11 = por %p6368_p10, %p6367_p4 }
  0x6b   : > { %p6363_p9 = pneg %p6362_p7 }
  0x6d   : > { %p6370_p12 = pnand %p6369_p11, %p6363_p9 }
  0x6f   : > { %6373 = shalt.err (!%p6370_p12)
}
  0x70   : > { %5698 = dma.hbm_to_vmem [thread:$0]  (!%p6892_p6), %s9380_s5, 16, %s6898_s20, [#allocation13]  }
  0x71   : > { %s6763_s0 = smov [#allocation15]   ;;  %s6764_s15 = smov [#allocation18]  }
  0x72   : > { %s432_s13 = sshll.u32 %s6763_s0, 4  ;;  %s456_s22 = sshll.u32 %s6764_s15, 4  ;;  %s433_s13 = int_to_ptr.vmem [resolvable:$true] %s432_s13  ;;  %s457_s22 = int_to_ptr.vmem [resolvable:$true] %s456_s22 }
  0x73   : > { %s9381_s7 = sld [smem:[#allocation77_spill]] }
  0x79   : > { %s6374_s24 = scalar_lea.hbm %s9381_s7, 16 }
  0x7a   : > { %p6375_p13 = scmp.ne.s32.totalorder %s9381_s7, %s6374_s24  ;;  %p6381_p5 = scmp.lt.u32.totalorder %s6374_s24, %s9381_s7 }
  0x7c   : > { %p6377_p0 = pnand %p6375_p13, %p6908_p8 }
  0x7e   : > { %p6378_p2 = pneg %p6377_p0 }
  0x80   : > { %p6383_p7 = pnand %p6381_p5, %p6378_p2 }
  0x82   : > { %6386 = shalt.err (!%p6383_p7)
}
  0x83   : > { %s6387_s20 = scalar_lea.vmem %s433_s13, 16  ;;  %s6394_s30 = scalar_lea.vmem %s433_s13, 32 }
  0x84   : > { %p6388_p9 = scmp.ne.s32.totalorder %s433_s13, %s6387_s20  ;;  %p6395_p11 = scmp.lt.s32.totalorder %s433_s13, %s433_s13 }
  0x85   : > { %p6396_p12 = scmp.lt.s32.totalorder %s6394_s30, %s6387_s20 }
  0x86   : > { %p6390_p4 = pnand %p6388_p9, %p6908_p8 }
  0x87   : > { %p6397_p1 = por %p6396_p12, %p6395_p11 }
  0x88   : > { %p6391_p10 = pneg %p6390_p4 }
  0x8a   : > { %p6398_p3 = pnand %p6397_p1, %p6391_p10 }
  0x8c   : > { %6401 = shalt.err (!%p6398_p3)
}
  0x8d   : > { %5704 = dma.hbm_to_vmem [thread:$0]  (!%p6892_p6), %s9381_s7, 16, %s433_s13, [#allocation16]  }
  0x8e   : > { %s6402_s23 = scalar_lea.hbm %s9308_s9, 32 }
  0x8f   : > { %p6403_p13 = scmp.ne.s32.totalorder %s9308_s9, %s6402_s23  ;;  %p6409_p3 = scmp.lt.u32.totalorder %s6402_s23, %s9308_s9 }
  0x91   : > { %p6405_p0 = pnand %p6403_p13, %p6908_p8 }
  0x93   : > { %p6406_p1 = pneg %p6405_p0 }
  0x95   : > { %p6411_p2 = pnand %p6409_p3, %p6406_p1 }
  0x97   : > { %6414 = shalt.err (!%p6411_p2)
}
  0x98   : > { %s6415_s21 = scalar_lea.vmem %s457_s22, 32  ;;  %p6423_p4 = scmp.lt.s32.totalorder %s457_s22, %s457_s22 }
  0x99   : > { %p6416_p5 = scmp.ne.s32.totalorder %s457_s22, %s6415_s21  ;;  %p6424_p10 = scmp.lt.s32.totalorder %s6415_s21, %s6415_s21 }
  0x9b   : > { %p6418_p7 = pnand %p6416_p5, %p6908_p8  ;;  %p6425_p11 = por %p6424_p10, %p6423_p4 }
  0x9d   : > { %p6419_p9 = pneg %p6418_p7 }
  0x9f   : > { %p6426_p12 = pnand %p6425_p11, %p6419_p9 }
  0xa1   : > { %6429 = shalt.err (!%p6426_p12)
}
  0xa2   : > { %5710 = dma.hbm_to_vmem [thread:$0]  (!%p6892_p6), %s9308_s9, 32, %s457_s22, [#allocation19]  }
  0xa3   : > { %s6765_s30 = smov [#allocation11]   ;;  %s9382_s4 = sld [smem:[#allocation74_spill]] }
  0xa4   : > { %s396_s1 = sshll.u32 %s6765_s30, 4  ;;  %s397_s1 = int_to_ptr.vmem [resolvable:$true] %s396_s1 }
  0xa9   : > { %s6430_s12 = scalar_lea.hbm %s9382_s4, 1024 }
  0xaa   : > { %p6431_p13 = scmp.ne.s32.totalorder %s9382_s4, %s6430_s12  ;;  %p6437_p3 = scmp.lt.u32.totalorder %s6430_s12, %s9382_s4 }
  0xac   : > { %p6433_p0 = pnand %p6431_p13, %p6908_p8 }
  0xae   : > { %p6434_p1 = pneg %p6433_p0 }
  0xb0   : > { %p6439_p2 = pnand %p6437_p3, %p6434_p1 }
  0xb2   : > { %6442 = shalt.err (!%p6439_p2)
}
  0xb3   : > { %s6443_s22 = scalar_lea.vmem %s397_s1, 1024  ;;  %p6451_p4 = scmp.lt.s32.totalorder %s397_s1, %s397_s1 }
  0xb4   : > { %p6444_p5 = scmp.ne.s32.totalorder %s397_s1, %s6443_s22  ;;  %p6452_p10 = scmp.lt.s32.totalorder %s6443_s22, %s6443_s22 }
  0xb6   : > { %p6446_p7 = pnand %p6444_p5, %p6908_p8  ;;  %p6453_p11 = por %p6452_p10, %p6451_p4 }
  0xb8   : > { %p6447_p9 = pneg %p6446_p7 }
  0xba   : > { %p6454_p12 = pnand %p6453_p11, %p6447_p9 }
  0xbc   : > { %6457 = shalt.err (!%p6454_p12)
}
  0xbd   : > { %s9320_s17 = smov 64   ;;  %s9321_s21 = smov 4  }
  0xbe   : > { %5695 = dma.hbm_to_vmem [thread:$0]  (!%p6892_p6), %s9382_s4, 1024, %s397_s1, [#allocation10], %s9320_s17, %s9320_s17, %s9321_s21  }
  0xbf   : > { %s6768_s30 = smov [#allocation14]   ;;  %s6769_s15 = smov [#allocation17]  }
  0xc0   : > { %s421_s0 = sshll.u32 %s6768_s30, 4  ;;  %s442_s12 = sshll.u32 %s6769_s15, 4  ;;  %s422_s0 = int_to_ptr.vmem [resolvable:$true] %s421_s0  ;;  %s7034_s12 = int_to_ptr.vmem [resolvable:$true] %s442_s12 }
  0xc1   : > { %s9383_s6 = sld [smem:[#allocation76_spill]] }
  0xc7   : > { %s6458_s29 = scalar_lea.hbm %s9383_s6, 16 }
  0xc8   : > { %p6459_p13 = scmp.ne.s32.totalorder %s9383_s6, %s6458_s29  ;;  %p6465_p3 = scmp.lt.u32.totalorder %s6458_s29, %s9383_s6 }
  0xca   : > { %p6461_p0 = pnand %p6459_p13, %p6908_p8 }
  0xcc   : > { %p6462_p1 = pneg %p6461_p0 }
  0xce   : > { %p6467_p2 = pnand %p6465_p3, %p6462_p1 }
  0xd0   : > { %6470 = shalt.err (!%p6467_p2)
}
  0xd1   : > { %s6471_s20 = scalar_lea.vmem %s422_s0, 16  ;;  %s6478_s30 = scalar_lea.vmem %s422_s0, 32 }
  0xd2   : > { %p6472_p5 = scmp.ne.s32.totalorder %s422_s0, %s6471_s20  ;;  %p6479_p4 = scmp.lt.s32.totalorder %s422_s0, %s422_s0 }
  0xd3   : > { %p6480_p10 = scmp.lt.s32.totalorder %s6478_s30, %s6471_s20 }
  0xd4   : > { %p6474_p7 = pnand %p6472_p5, %p6908_p8 }
  0xd5   : > { %p6481_p11 = por %p6480_p10, %p6479_p4 }
  0xd6   : > { %p6475_p9 = pneg %p6474_p7 }
  0xd8   : > { %p6482_p12 = pnand %p6481_p11, %p6475_p9 }
  0xda   : > { %6485 = shalt.err (!%p6482_p12)
}
  0xdb   : > { %5701 = dma.hbm_to_vmem [thread:$0]  (!%p6892_p6), %s9383_s6, 16, %s422_s0, [#allocation13]  }
  0xdc   : > { %s9384_s8 = sld [smem:[#allocation78_spill]] }
  0xe2   : > { %s6486_s19 = scalar_lea.hbm %s9384_s8, 2048 }
  0xe3   : > { %p6487_p13 = scmp.ne.s32.totalorder %s9384_s8, %s6486_s19  ;;  %p6493_p3 = scmp.lt.u32.totalorder %s6486_s19, %s9384_s8 }
  0xe5   : > { %p6489_p0 = pnand %p6487_p13, %p6908_p8 }
  0xe7   : > { %p6490_p1 = pneg %p6489_p0 }
  0xe9   : > { %p6495_p2 = pnand %p6493_p3, %p6490_p1 }
  0xeb   : > { %6498 = shalt.err (!%p6495_p2)
}
  0xec   : > { %s6499_s0 = scalar_lea.vmem %s7034_s12, 2048  ;;  %p6507_p4 = scmp.lt.s32.totalorder %s7034_s12, %s7034_s12 }
  0xed   : > { %p6500_p5 = scmp.ne.s32.totalorder %s7034_s12, %s6499_s0  ;;  %p6508_p10 = scmp.lt.s32.totalorder %s6499_s0, %s6499_s0 }
  0xef   : > { %p6502_p7 = pnand %p6500_p5, %p6908_p8  ;;  %p6509_p11 = por %p6508_p10, %p6507_p4 }
  0xf1   : > { %p6503_p9 = pneg %p6502_p7 }
  0xf3   : > { %p6510_p12 = pnand %p6509_p11, %p6503_p9 }
  0xf5   : > { %6513 = shalt.err (!%p6510_p12)
}
  0xf6   : > { %s9322_s30 = smov 128   ;;  %s9324_s15 = smov 8  }
  0xf7   : > { %5707 = dma.hbm_to_vmem [thread:$0]  (!%p6892_p6), %s9384_s8, 2048, %s7034_s12, [#allocation16], %s9322_s30, %s9322_s30, %s9324_s15  }
  0xf8   : > { %s6772_s29 = smov [#allocation20]   ;;  %s6773_s22 = smov [#allocation21]  }
  0xf9   : > { %s466_s19 = sshll.u32 %s6772_s29, 4  ;;  %s480_s13 = sshll.u32 %s6773_s22, 4  ;;  %s467_s19 = int_to_ptr.vmem [resolvable:$true] %s466_s19  ;;  %s7080_s13 = int_to_ptr.vmem [resolvable:$true] %s480_s13 }
  0xfa   : > { %s6514_s0 = scalar_lea.hbm %s9309_s10, 2048 }
  0xfb   : > { %p6515_p13 = scmp.ne.s32.totalorder %s9309_s10, %s6514_s0  ;;  %p6521_p3 = scmp.lt.u32.totalorder %s6514_s0, %s9309_s10 }
  0xfd   : > { %p6517_p0 = pnand %p6515_p13, %p6908_p8 }
  0xff   : > { %p6518_p1 = pneg %p6517_p0 }
 0x101   : > { %p6523_p2 = pnand %p6521_p3, %p6518_p1 }
 0x103   : > { %6526 = shalt.err (!%p6523_p2)
}
 0x104   : > { %s6527_s24 = scalar_lea.vmem %s467_s19, 2048  ;;  %p6535_p4 = scmp.lt.s32.totalorder %s467_s19, %s467_s19 }
 0x105   : > { %p6528_p5 = scmp.ne.s32.totalorder %s467_s19, %s6527_s24  ;;  %p6536_p10 = scmp.lt.s32.totalorder %s6527_s24, %s6527_s24 }
 0x107   : > { %p6530_p7 = pnand %p6528_p5, %p6908_p8  ;;  %p6537_p11 = por %p6536_p10, %p6535_p4 }
 0x109   : > { %p6531_p9 = pneg %p6530_p7 }
 0x10b   : > { %p6538_p12 = pnand %p6537_p11, %p6531_p9 }
 0x10d   : > { %6541 = shalt.err (!%p6538_p12)
}
 0x10e   : > { %s9385_s17 = smov 4   ;;  %s9386_s21 = smov 64  }
 0x10f   : > { %5713 = dma.hbm_to_vmem [thread:$0]  (!%p6892_p6), %s9309_s10, 2048, %s467_s19, [#allocation19], %s9386_s21, %s9386_s21, %s9385_s17  }
 0x110   : > { %s6542_s0 = scalar_lea.hbm %s9310_s11, 16 }
 0x111   : > { %p6543_p13 = scmp.ne.s32.totalorder %s9310_s11, %s6542_s0  ;;  %p6549_p3 = scmp.lt.u32.totalorder %s6542_s0, %s9310_s11 }
 0x113   : > { %p6545_p0 = pnand %p6543_p13, %p6908_p8 }
 0x115   : > { %p6546_p1 = pneg %p6545_p0 }
 0x117   : > { %p6551_p2 = pnand %p6549_p3, %p6546_p1 }
 0x119   : > { %6554 = shalt.err (!%p6551_p2)
}
 0x11a   : > { %s6555_s19 = scalar_lea.vmem %s7080_s13, 16  ;;  %s6562_s17 = scalar_lea.vmem %s7080_s13, 32 }
 0x11b   : > { %p6556_p5 = scmp.ne.s32.totalorder %s7080_s13, %s6555_s19  ;;  %p6563_p4 = scmp.lt.s32.totalorder %s7080_s13, %s7080_s13 }
 0x11c   : > { %p6564_p10 = scmp.lt.s32.totalorder %s6562_s17, %s6555_s19 }
 0x11d   : > { %p6558_p7 = pnand %p6556_p5, %p6908_p8 }
 0x11e   : > { %p6565_p11 = por %p6564_p10, %p6563_p4 }
 0x11f   : > { %p6559_p9 = pneg %p6558_p7 }
 0x121   : > { %p6566_p12 = pnand %p6565_p11, %p6559_p9 }
 0x123   : > { %6569 = shalt.err (!%p6566_p12)
}
 0x124   : > { %5716 = dma.hbm_to_vmem [thread:$0]  (!%p6892_p6), %s9310_s11, 16, %s7080_s13, [#allocation22]  }
 0x125   : > { %s4852_s18 = sadd.s32 4294967294, %s6756_s28   ;;  %s7129_s16 = sadd.s32 1, %s6756_s28  }
 0x126   : > { %s45_s29 = ssub.s32 %s6756_s28, %s7129_s16  ;;  %s48_s22 = sadd.s32 1, %s6752_s27 }
 0x127   : > { %p46_p8 = scmp.eq.s32.totalorder %s45_s29, 0  ;;  %p55_p13 = scmp.ne.s32.totalorder %s6752_s27, %s6748_s26 }
 0x128   : > { %p56_p0 = scmp.eq.s32.totalorder %s6756_s28, 0  ;;  %p61_p1 = scmp.ne.s32.totalorder %s6748_s26, %s6744_s25 }
 0x129   : > { %s7140_s1 = scalar_select %p46_p8, %s6752_s27, %s48_s22  }
 0x12a   : > { %p7142_p3 = por %p56_p0, %p55_p13  ;;  %p9388_p2 = scmp.eq.s32.totalorder %s6876_s14, 0 }
 0x12b   : > { %p321_p5 = scmp.eq.s32.totalorder %s6876_s14, 1  ;;  %p327_p7 = scmp.eq.s32.totalorder %s4852_s18, 1 }
 0x12c   : > { %p7148_p6 = por %p9388_p2, %p61_p1  ;;  %p5741_p9 = scmp.lt.s32.totalorder %s6756_s28, 2 }
 0x12d   : > { %s491_s0 = sand.u32 1, %s6752_s27   ;;  %p7155_p4 = por %p321_p5, %p55_p13 }
 0x12e   : > { %p7159_p10 = por %p327_p7, %p61_p1  ;;  %s4865_s24 = sshll.u32 %s491_s0, 7 }
 0x12f   : > { %s9390_s23 = scalar_select %p7155_p4, 1, 0 }
 0x130   : > { %s9391_s12 = scalar_select %p7159_p10, 1, 0 }
 0x131   : > { %s5042_s19 = sshll.u32 %s6756_s28, 11  ;;  %s9392_s21 = sld [smem:[#allocation70_spill]] }
 0x132   : > { %s495_s18 = scalar_lea.vmem [#allocation3], %s4865_s24  ;;  %p7173_p11 = pnand %p5741_p9, %p7142_p3 }
 0x133   : > { %s502_s22 = sshll.u32 %s495_s18, 4  ;;  %s9394_s4 = sld [smem:[#allocation71_spill]]  ;;  %s7169_s22 = int_to_ptr.vmem [resolvable:$true] %s502_s22 }
 0x134   : > { %s516_s30 = scalar_lea.vmem [#allocation6], %s4865_s24  ;;  %s7184_s6 = scalar_lea.sflag [#allocation4], %s491_s0 }
 0x135   : > { %s7182_s5 = sshll.u32 %s516_s30, 4  ;;  %p6572_p8 = pneg %p7173_p11  ;;  %s7216_s5 = int_to_ptr.vmem [resolvable:$true] %s7182_s5 }
 0x137   : > { %s7167_s29 = scalar_lea.hbm %s9392_s21, %s5042_s19  ;;  %s6575_s2 = scalar_lea.hbm %s9392_s21, 4096 }
 0x138   : > { %s6570_s18 = scalar_lea.hbm %s7167_s29, 2048  ;;  %p6576_p1 = scmp.lt.u32.totalorder %s7167_s29, %s9392_s21 }
 0x139   : > { %s7180_s17 = scalar_lea.hbm %s9394_s4, %s5042_s19  ;;  %p6571_p12 = scmp.ne.s32.totalorder %s7167_s29, %s6570_s18 }
 0x13a   : > { %p6577_p3 = scmp.lt.u32.totalorder %s6575_s2, %s6570_s18  ;;  %p6579_p5 = scmp.lt.u32.totalorder %s6570_s18, %s7167_s29 }
 0x13b   : > { %p6573_p13 = pnand %p6572_p8, %p6571_p12 }
 0x13c   : > { %p6578_p2 = por %p6577_p3, %p6576_p1 }
 0x13d   : > { %p6574_p0 = pneg %p6573_p13 }
 0x13e   : > { %p6580_p7 = por %p6579_p5, %p6578_p2 }
 0x140   : > { %p6581_p9 = pnand %p6580_p7, %p6574_p0 }
 0x142   : > { %6584 = shalt.err (!%p6581_p9)
}
 0x143   : > { %s6585_s0 = scalar_lea.vmem %s7169_s22, 2048  ;;  %s6774_s7 = smov [#allocation3]  }
 0x144   : > { %p6586_p12 = scmp.ne.s32.totalorder %s7169_s22, %s6585_s0  ;;  %s6590_s24 = sshll.u32 %s6774_s7, 4  ;;  %s6591_s24 = int_to_ptr.vmem [resolvable:$false] %s6590_s24 }
 0x145   : > { %s6592_s30 = scalar_lea.vmem %s6591_s24, 4096  ;;  %p6593_p4 = scmp.lt.s32.totalorder %s7169_s22, %s6591_s24 }
 0x146   : > { %p6588_p13 = pnand %p6586_p12, %p6572_p8  ;;  %p6594_p1 = scmp.lt.s32.totalorder %s6592_s30, %s6585_s0 }
 0x148   : > { %p6589_p10 = pneg %p6588_p13  ;;  %p6595_p3 = por %p6594_p1, %p6593_p4 }
 0x14a   : > { %p6596_p2 = pnand %p6595_p3, %p6589_p10 }
 0x14c   : > { %6599 = shalt.err (!%p6596_p2)
}
 0x14d   : > { %s9395_s18 = smov 8   ;;  %s9396_s20 = smov 128  }
 0x14e   : > { %5720 = dma.hbm_to_vmem [thread:$0]  (!%p7173_p11), %s7167_s29, 2048, %s7169_s22, %s7184_s6, %s9396_s20, %s9396_s20, %s9395_s18  }
 0x14f   : > { %s512_s2 = sand.u32 1, %s6756_s28   ;;  %s6600_s19 = scalar_lea.hbm %s7180_s17, 2048 }
 0x150   : > { %s7219_s3 = scalar_lea.sflag [#allocation7], %s512_s2  ;;  %p6601_p4 = scmp.ne.s32.totalorder %s7180_s17, %s6600_s19 }
 0x151   : > { %s6605_s24 = scalar_lea.hbm %s9394_s4, 4096  ;;  %p6606_p5 = scmp.lt.u32.totalorder %s7180_s17, %s9394_s4 }
 0x152   : > { %p6603_p10 = pnand %p6601_p4, %p6572_p8  ;;  %p6607_p7 = scmp.lt.u32.totalorder %s6605_s24, %s6600_s19 }
 0x153   : > { %p6609_p12 = scmp.lt.u32.totalorder %s6600_s19, %s7180_s17 }
 0x154   : > { %p6604_p0 = pneg %p6603_p10  ;;  %p6608_p9 = por %p6607_p7, %p6606_p5 }
 0x156   : > { %p6610_p13 = por %p6609_p12, %p6608_p9 }
 0x158   : > { %p6611_p1 = pnand %p6610_p13, %p6604_p0 }
 0x15a   : > { %6614 = shalt.err (!%p6611_p1)
}
 0x15b   : > { %s6615_s6 = scalar_lea.vmem %s7216_s5, 2048  ;;  %s6775_s29 = smov [#allocation6]  }
 0x15c   : > { %p6616_p3 = scmp.ne.s32.totalorder %s7216_s5, %s6615_s6  ;;  %s6620_s22 = sshll.u32 %s6775_s29, 4  ;;  %s6621_s22 = int_to_ptr.vmem [resolvable:$false] %s6620_s22 }
 0x15d   : > { %s6622_s8 = scalar_lea.vmem %s6621_s22, 4096  ;;  %p6623_p10 = scmp.lt.s32.totalorder %s7216_s5, %s6621_s22 }
 0x15e   : > { %p6618_p2 = pnand %p6616_p3, %p6572_p8  ;;  %p6624_p5 = scmp.lt.s32.totalorder %s6622_s8, %s6615_s6 }
 0x160   : > { %p6619_p4 = pneg %p6618_p2  ;;  %p6625_p7 = por %p6624_p5, %p6623_p10 }
 0x162   : > { %p6626_p9 = pnand %p6625_p7, %p6619_p4 }
 0x164   : > { %6629 = shalt.err (!%p6626_p9)
}
 0x165   : > { %5723 = dma.hbm_to_vmem [thread:$0]  (!%p7173_p11), %s7180_s17, 2048, %s7216_s5, %s7219_s3, %s9396_s20, %s9396_s20, %s9395_s18  }
 0x166   : > { %s9397_s2 = sld [smem:[#allocation36_spill]] }
 0x16c   : > { %p9398_p8 = scmp.ne.s32.totalorder %s9397_s2, 0 }
 0x16e   : > { %535 = sbr.rel (%p9398_p8) target bundleno = 4884 (0x1314), region = 68 }
 0x175   : > { %s7251_s19 = sand.u32 1, %s6748_s26  }
 0x176   : > { %s7254_s0 = sshll.u32 %s7251_s19, 7  ;;  %s538_s15 = scalar_lea.sflag [#allocation4], %s7251_s19 }
 0x177   : > { %s7258_s7 = scalar_lea.vmem [#allocation3], %s7254_s0 }
 0x178   : > { %6703 = dma.done.wait (%p7148_p6), %s538_s15, 2048  }
 0x179   : > { %6705 = vsyncadd (%p7148_p6), %s538_s15, 4294965248  ;;  %s546_s5 = sand.u32 1, %s6876_s14   ;;  %s7266_s18 = scalar_lea.vmem [#allocation6], %s7254_s0 }
 0x17a   : > { %s547_s17 = scalar_lea.sflag [#allocation7], %s546_s5 }
 0x17b   : > { %6707 = dma.done.wait (%p7148_p6), %s547_s17, 2048  }
 0x17c   : > { %6709 = vsyncadd (%p7148_p6), %s547_s17, 4294965248  ;;  %p9399_p11 = scmp.eq.s32.totalorder %s6876_s14, 0 }
 0x17e   : > { %6711 = dma.done.wait (%p9399_p11), [#allocation7], 3072   ;;  %p9400_p0 = pmov %p9399_p11 }
 0x180   : > { %6713 = vsyncadd (%p9400_p0), [#allocation7], 4294964224  ;;  %p9401_p12 = pmov %p9400_p0 }
 0x181   : > { %p9402_p13 = pmov %p9400_p0 }
 0x182   : > { %6715 = dma.done.wait (%p9401_p12), [#allocation10], 1072  }
 0x183   : > { %6717 = vsyncadd (%p9402_p13), [#allocation10], 4294966224  ;;  %p9403_p1 = pmov %p9400_p0 }
 0x184   : > { %p9404_p3 = pmov %p9400_p0 }
 0x185   : > { %6719 = dma.done.wait (%p9403_p1), [#allocation13], 32  }
 0x186   : > { %6721 = vsyncadd (%p9404_p3), [#allocation13], 4294967264  ;;  %p9405_p6 = pmov %p9400_p0 }
 0x187   : > { %p9406_p2 = pmov %p9400_p0 }
 0x188   : > { %6723 = dma.done.wait (%p9405_p6), [#allocation16], 2064  }
 0x189   : > { %6725 = vsyncadd (%p9406_p2), [#allocation16], 4294965232  ;;  %p9407_p4 = pmov %p9400_p0 }
 0x18a   : > { %p9408_p10 = pmov %p9400_p0 }
 0x18b   : > { %6727 = dma.done.wait (%p9407_p4), [#allocation19], 2080  }
 0x18c   : > { %6729 = vsyncadd (%p9408_p10), [#allocation19], 4294965216  ;;  %p9409_p5 = pmov %p9400_p0 }
 0x18d   : > { %p9410_p7 = pmov %p9400_p0 }
 0x18e   : > { %6731 = dma.done.wait (%p9409_p5), [#allocation22], 16  }
 0x18f   : > { %6733 = vsyncadd (%p9410_p7), [#allocation22], 4294967280  ;;  %v9329_v0 = vmov 0   ;;  %v5808_v1 = vld [vmem:[#allocation8 + $0x4] ss:$12 sps:$4 sm:$0xff]   ;;  %v645_v10 = vld [vmem:[%s7258_s7 + $0x8] sm:$0xff]  ;;  %v718_v49 = vlaneseq }
 0x190   : > { %893 = vmatprep.mubr.bf16.mxu0 %v9329_v0  ;;  %v5810_v2 = vld [vmem:[#allocation8] ss:$12 sps:$4 sm:$0xff]   ;;  %861 = vmatprep.subr.bf16.mxu0 %v5808_v1  ;;  %v5811_v3 = vld [vmem:[#allocation8 + $0x1c] ss:$12 sps:$4 sm:$0xff]   ;;  %v5813_v4 = vld [vmem:[#allocation8 + $0x18] ss:$12 sps:$4 sm:$0xff]  }
 0x191   : > { %862 = vmatpush1.bf16.msra.mxu0 %v5810_v2  ;;  %v5814_v5 = vld [vmem:[#allocation8 + $0x34] ss:$12 sps:$4 sm:$0xff]   ;;  %v5816_v6 = vld [vmem:[#allocation8 + $0x30] ss:$12 sps:$4 sm:$0xff]   ;;  %v5817_v7 = vld [vmem:[#allocation8 + $0x4c] ss:$12 sps:$4 sm:$0xff]  }
 0x192   : > { %863 = vmatprep.subr.bf16.mxu0 %v5811_v3  ;;  %v644_v8 = vld [vmem:[%s7258_s7] sm:$0xff]  ;;  %v5819_v9 = vld [vmem:[#allocation8 + $0x48] ss:$12 sps:$4 sm:$0xff]   ;;  %v5828_v20 = vld [vmem:[#allocation8 + $0x90] ss:$12 sps:$4 sm:$0xff]   ;;  %v7320_v50 = vshrl.u32 %v718_v49, 7 }
 0x193   : > { %v5820_v11 = vld [vmem:[#allocation8 + $0x64] ss:$12 sps:$4 sm:$0xff]   ;;  %v660_v12 = vpack.c.bf16 %v645_v10, %v644_v8  ;;  %v5822_v13 = vld [vmem:[#allocation8 + $0x60] ss:$12 sps:$4 sm:$0xff]   ;;  %v5823_v14 = vld [vmem:[#allocation8 + $0x7c] ss:$12 sps:$4 sm:$0xff]  }
 0x194   : > { %v5832_v15 = vld [vmem:[#allocation8 + $0x8] ss:$12 sps:$4 sm:$0xff]   ;;  %v5833_v16 = vld [vmem:[#allocation8 + $0x20] ss:$12 sps:$4 sm:$0xff]   ;;  %v5825_v17 = vld [vmem:[#allocation8 + $0x78] ss:$12 sps:$4 sm:$0xff]  }
 0x195   : > { %864 = vmatpush1.bf16.msra.mxu0 %v5813_v4  ;;  %5286 = vmatprep.mubr.bf16.mxu1 %v660_v12  ;;  %v5826_v18 = vld [vmem:[#allocation8 + $0x94] ss:$12 sps:$4 sm:$0xff]   ;;  %v5834_v19 = vld [vmem:[#allocation8 + $0x38] ss:$12 sps:$4 sm:$0xff]   ;;  %v5835_v22 = vld [vmem:[#allocation8 + $0x50] ss:$12 sps:$4 sm:$0xff]  }
 0x196   : > { %865 = vmatprep.subr.bf16.mxu0 %v5814_v5  ;;  %5270 = vmatprep.subr.bf16.mxu1 %v5832_v15  ;;  %v5829_v21 = vld [vmem:[#allocation8 + $0xac] ss:$12 sps:$4 sm:$0xff]   ;;  %v5831_v23 = vld [vmem:[#allocation8 + $0xa8] ss:$12 sps:$4 sm:$0xff]   ;;  %v5839_v30 = vld [vmem:[#allocation8 + $0xb0] ss:$12 sps:$4 sm:$0xff]  }
 0x197   : > { %5271 = vmatpush3.bf16.msra.mxu1 %v5832_v15  ;;  %v5836_v24 = vld [vmem:[#allocation8 + $0x68] ss:$12 sps:$4 sm:$0xff]   ;;  %v5837_v25 = vld [vmem:[#allocation8 + $0x80] ss:$12 sps:$4 sm:$0xff]   ;;  %v647_v27 = vld [vmem:[%s7258_s7 + $0x18] sm:$0xff]  ;;  %9411 = vst [vmem:[#allocation37_spill] sm:$0xff] %v7320_v50 }
 0x198   : > { %5272 = vmatprep.subr.bf16.mxu1 %v5833_v16  ;;  %v646_v26 = vld [vmem:[%s7258_s7 + $0x10] sm:$0xff]  ;;  %v5838_v28 = vld [vmem:[#allocation8 + $0x98] ss:$12 sps:$4 sm:$0xff]   ;;  %v649_v32 = vld [vmem:[%s7258_s7 + $0x28] sm:$0xff]  ;;  %v9328_v51 = vsub.s32 0, %v7320_v50  ;;  %v9327_v53 = vsub.s32 1, %v7320_v50 }
 0x199   : > { %866 = vmatpush1.bf16.msra.mxu0 %v5816_v6  ;;  %v661_v29 = vpack.c.bf16 %v647_v27, %v646_v26  ;;  %v648_v31 = vld [vmem:[%s7258_s7 + $0x20] sm:$0xff]  ;;  %v650_v34 = vld [vmem:[%s7258_s7 + $0x30] sm:$0xff]  ;;  %v651_v35 = vld [vmem:[%s7258_s7 + $0x38] sm:$0xff]  ;;  %vm1127_vm0 = vcmask 261120   ;;  %s6777_s13 = smov 96   ;;  %v728_v8 = vsub.s32 2, %v7320_v50 }
 0x19a   : > { %867 = vmatprep.subr.bf16.mxu0 %v5817_v7  ;;  %v662_v33 = vpack.c.bf16 %v649_v32, %v648_v31  ;;  %v663_v36 = vpack.c.bf16 %v651_v35, %v650_v34  ;;  %v652_v37 = vld [vmem:[%s7258_s7 + $0x40] sm:$0xff]  ;;  %v653_v38 = vld [vmem:[%s7258_s7 + $0x48] sm:$0xff]  ;;  %v654_v40 = vld [vmem:[%s7258_s7 + $0x50] sm:$0xff]  ;;  %s6779_s20 = smov 64   ;;  %s4885_s3 = sshll.u32 %s7251_s19, 9 }
 0x19b   : > { %5273 = vmatpush3.bf16.msra.mxu1 %v5833_v16  ;;  %v664_v39 = vpack.c.bf16 %v653_v38, %v652_v37  ;;  %v655_v41 = vld [vmem:[%s7258_s7 + $0x58] sm:$0xff]  ;;  %v656_v42 = vld [vmem:[%s7258_s7 + $0x60] sm:$0xff]  ;;  %v657_v43 = vld [vmem:[%s7258_s7 + $0x68] sm:$0xff]  ;;  %s7749_s24 = scalar_lea.vmem [#allocation24], %s4885_s3  ;;  %s6780_s30 = smov 32  }
 0x19c   : > { %5274 = vmatprep.subr.bf16.mxu1 %v5834_v19  ;;  %v665_v44 = vpack.c.bf16 %v655_v41, %v654_v40  ;;  %v666_v45 = vpack.c.bf16 %v657_v43, %v656_v42  ;;  %v658_v46 = vld [vmem:[%s7258_s7 + $0x70] sm:$0xff]  ;;  %v659_v47 = vld [vmem:[%s7258_s7 + $0x78] sm:$0xff]  ;;  %v716_v52 = vld [vmem:[#allocation9] sm:$0x7]  ;;  %s5045_s6 = sshll.u32 %s6876_s14, 13  ;;  %s4629_s29 = sshll.u32 %s7749_s24, 4  ;;  %s9145_s29 = int_to_ptr.vmem [resolvable:$true] %s4629_s29 }
 0x19d   : > { %868 = vmatpush1.bf16.msra.mxu0 %v5819_v9  ;;  %v667_v48 = vpack.c.bf16 %v659_v47, %v658_v46  ;;  %v7326_v54 = vrot.slane %v716_v52, %v9328_v51  ;;  %v7330_v56 = vrot.slane %v716_v52, %v9327_v53  ;;  %v7357_v15 = vrot.slane %v716_v52, %v728_v8  ;;  %s9496_s2 = sld [smem:[#allocation80_spill]]  ;;  %s6630_s5 = scalar_lea.vmem %s9145_s29, 8192 }
 0x19e   : > { %869 = vmatprep.subr.bf16.mxu0 %v5820_v11  ;;  %p6631_p9 = scmp.ne.s32.totalorder %s9145_s29, %s6630_s5  ;;  %p9497_p8 = scmp.ne.s32.totalorder %s9390_s23, 0 }
 0x19f   : > { %5275 = vmatpush3.bf16.msra.mxu1 %v5834_v19  ;;  %s6781_s17 = smov [#allocation24]  }
 0x1a0   : > { %5276 = vmatprep.subr.bf16.mxu1 %v5835_v22  ;;  %p6632_p11 = pnand %p6631_p9, %p9497_p8 }
 0x1a1   : > { %870 = vmatpush1.bf16.msra.mxu0 %v5822_v13 }
 0x1a2   : > { %871 = vmatprep.subr.bf16.mxu0 %v5823_v14  ;;  %p6633_p0 = pneg %p6632_p11 }
 0x1a3   : > { %5277 = vmatpush3.bf16.msra.mxu1 %v5835_v22  ;;  %s9143_s15 = scalar_lea.hbm %s9496_s2, %s5045_s6 }
 0x1a4   : > { %5278 = vmatprep.subr.bf16.mxu1 %v5836_v24 }
 0x1a5   : > { %872 = vmatpush1.bf16.msra.mxu0 %v5825_v17 }
 0x1a6   : > { %873 = vmatprep.subr.bf16.mxu0 %v5826_v18 }
 0x1a7   : > { %5279 = vmatpush3.bf16.msra.mxu1 %v5836_v24 }
 0x1a8   : > { %5280 = vmatprep.subr.bf16.mxu1 %v5837_v25 }
 0x1a9   : > { %874 = vmatpush1.bf16.msra.mxu0 %v5828_v20 }
 0x1aa   : > { %875 = vmatprep.subr.bf16.mxu0 %v5829_v21 }
 0x1ab   : > { %5281 = vmatpush3.bf16.msra.mxu1 %v5837_v25 }
 0x1ac   : > { %5282 = vmatprep.subr.bf16.mxu1 %v5838_v28 }
 0x1ad   : > { %876 = vmatpush1.bf16.msra.mxu0 %v5831_v23 }
 0x1af   : > { %5283 = vmatpush3.bf16.msra.mxu1 %v5838_v28 }
 0x1b0   : > { %894 = vmatmul.mubr.bf16.vlgmr.msra.gmra.mrb[0].mxu0 %v660_v12  ;;  %5284 = vmatprep.subr.bf16.mxu1 %v5839_v30 }
 0x1b1   : > { %903 = vmatprep.mubr.bf16.mxu0 %v9329_v0 }
 0x1b3   : > { %5285 = vmatpush3.bf16.msra.mxu1 %v5839_v30 }
 0x1b6   : > { %5287 = vmatmul.mubr.bf16.vlgmr.msra.gmra.mrb[0].mxu1 %v661_v29 }
 0x1b7   : > { %5290 = vmatprep.mubr.bf16.mxu1 %v662_v33 }
 0x1b8   : > { %904 = vmatmul.mubr.bf16.gmra.mrb[4].mxu0 %v661_v29 }
 0x1b9   : > { %913 = vmatprep.mubr.bf16.mxu0 %v9329_v0 }
 0x1be   : > { %5291 = vmatmul.mubr.bf16.gmra.mrb[4].mxu1 %v663_v36 }
 0x1bf   : > { %5294 = vmatprep.mubr.bf16.mxu1 %v664_v39 }
 0x1c0   : > { %914 = vmatmul.mubr.bf16.gmra.mrb[8].mxu0 %v662_v33 }
 0x1c1   : > { %923 = vmatprep.mubr.bf16.mxu0 %v9329_v0 }
 0x1c6   : > { %5295 = vmatmul.mubr.bf16.gmra.mrb[8].mxu1 %v665_v44 }
 0x1c7   : > { %5298 = vmatprep.mubr.bf16.mxu1 %v666_v45 }
 0x1c8   : > { %924 = vmatmul.mubr.bf16.gmra.mrb[12].mxu0 %v663_v36 }
 0x1c9   : > { %933 = vmatprep.mubr.bf16.mxu0 %v9329_v0 }
 0x1ce   : > { %5299 = vmatmul.mubr.bf16.gmra.mrb[12].mxu1 %v667_v48 }
 0x1d0   : > { %934 = vmatmul.mubr.bf16.gmra.mrb[16].mxu0 %v664_v39 }
 0x1d1   : > { %943 = vmatprep.mubr.bf16.mxu0 %v9329_v0 }
 0x1d8   : > { %944 = vmatmul.mubr.bf16.gmra.mrb[20].mxu0 %v665_v44 }
 0x1d9   : > { %953 = vmatprep.mubr.bf16.mxu0 %v9329_v0 }
 0x1e0   : > { %954 = vmatmul.mubr.bf16.gmra.mrb[24].mxu0 %v666_v45 }
 0x1e1   : > { %963 = vmatprep.mubr.bf16.mxu0 %v9329_v0 }
 0x1e8   : > { %964 = vmatmul.mubr.bf16.gmra.mrb[28].mxu0 %v667_v48 }
 0x283   : > { %v895_v55 = vpop.f32.mrb[0].mxu0 }
 0x284   : > { %v897_v57 = vpop.f32.mrb[1].mxu0  ;;  %v896_v59 = vadd.f32 %v895_v55, %v7326_v54 }
 0x285   : > { %v899_v58 = vpop.f32.mrb[2].mxu0  ;;  %v898_v62 = vadd.f32 %v897_v57, %v7330_v56 }
 0x286   : > { %v900_v60 = vadd.f32 %v899_v58, %v7326_v54  ;;  %v901_v61 = vpop.f32.mrb[3].mxu0 }
 0x287   : > { %v902_v63 = vadd.f32 %v901_v61, %v7330_v56 }
 0x288   : > { %v7336_v1 = vpack.c.bf16 %v900_v60, %v896_v59 }
 0x289   : > { %v7338_v2 = vpack.c.bf16 %v902_v63, %v898_v62  ;;  %v5288_v18 = vpop.f32.mrb[0].mxu1 }
 0x28a   : > { %5318 = vmatprep.mubr.msk.bf16.mxu0 %vm1127_vm0, %v7336_v1  ;;  %v1017_v21 = vadd.f32 %v5288_v18, %v7357_v15  ;;  %v1008_v22 = vpop.f32.mrb[1].mxu1 }
 0x28b   : > { %v905_v3 = vpop.f32.mrb[4].mxu0  ;;  %1602 = vrot.lane.b32.xlu0 %v7338_v2, %s6777_s13  ;;  %5606 = vmatprep.subr.msk.bf16.mxu0 %vm1127_vm0, %v7338_v2  ;;  %v1153_v4 = vsel %vm1127_vm0, %v7338_v2, 0  ;;  %v1009_v24 = vadd.f32 %v1008_v22, %v7357_v15  ;;  %v5289_v25 = vpop.f32.mrb[2].mxu1 }
 0x28c   : > { %v906_v5 = vadd.f32 %v905_v3, %v7326_v54  ;;  %v907_v6 = vpop.f32.mrb[5].mxu0  ;;  %5303 = vmatpush3.bf16.xpose.msra.mxu0 %v1153_v4  ;;  %v1020_v28 = vadd.f32 %v5289_v25, %v7357_v15  ;;  %v1011_v29 = vpop.f32.mrb[3].mxu1 }
 0x28d   : > { %v909_v7 = vpop.f32.mrb[6].mxu0  ;;  %v908_v11 = vadd.f32 %v907_v6, %v7330_v56  ;;  %v1012_v32 = vadd.f32 %v1011_v29, %v7357_v15 }
 0x28e   : > { %v910_v9 = vadd.f32 %v909_v7, %v7326_v54  ;;  %v911_v10 = vpop.f32.mrb[7].mxu0  ;;  %v7375_v34 = vpack.c.bf16 %v1020_v28, %v1017_v21 }
 0x28f   : > { %v912_v12 = vadd.f32 %v911_v10, %v7330_v56  ;;  %v7379_v36 = vpack.c.bf16 %v1012_v32, %v1009_v24 }
 0x290   : > { %v7353_v13 = vpack.c.bf16 %v910_v9, %v906_v5 }
 0x291   : > { %v7355_v14 = vpack.c.bf16 %v912_v12, %v908_v11  ;;  %v5292_v39 = vpop.f32.mrb[4].mxu1  ;;  %5334 = vmatprep.subr.bf16.mxu1 %v7379_v36 }
 0x292   : > { %v1033_v42 = vadd.f32 %v5292_v39, %v7357_v15  ;;  %v1024_v43 = vpop.f32.mrb[5].mxu1  ;;  %5335 = vmatpush3.bf16.msra.mxu1 %v7379_v36 }
 0x293   : > { %v915_v16 = vpop.f32.mrb[8].mxu0  ;;  %1604 = vrot.lane.b32.xlu1 %v7355_v14, %s6777_s13  ;;  %5607 = vmatprep.subr.msk.bf16.mxu0 %vm1127_vm0, %v7355_v14  ;;  %v1156_v17 = vsel %vm1127_vm0, %v7355_v14, 0  ;;  %v1025_v45 = vadd.f32 %v1024_v43, %v7357_v15  ;;  %v5293_v46 = vpop.f32.mrb[6].mxu1 }
 0x294   : > { %v916_v19 = vadd.f32 %v915_v16, %v7326_v54  ;;  %v917_v20 = vpop.f32.mrb[9].mxu0  ;;  %5305 = vmatpush3.bf16.xpose.msra.mxu0 %v1156_v17  ;;  %5336 = vmatprep.subr.bf16.mxu1 %v7375_v34  ;;  %v1036_v49 = vadd.f32 %v5293_v46, %v7357_v15  ;;  %v1027_v52 = vpop.f32.mrb[7].mxu1 }
 0x295   : > { %v919_v23 = vpop.f32.mrb[10].mxu0  ;;  %v918_v30 = vadd.f32 %v917_v20, %v7330_v56  ;;  %v1028_v58 = vadd.f32 %v1027_v52, %v7357_v15 }
 0x296   : > { %v920_v26 = vadd.f32 %v919_v23, %v7326_v54  ;;  %v921_v27 = vpop.f32.mrb[11].mxu0  ;;  %v7398_v60 = vpack.c.bf16 %v1036_v49, %v1033_v42  ;;  %5337 = vmatpush3.bf16.msra.mxu1 %v7375_v34 }
 0x297   : > { %v922_v31 = vadd.f32 %v921_v27, %v7330_v56  ;;  %v7403_v62 = vpack.c.bf16 %v1028_v58, %v1025_v45 }
 0x298   : > { %v7373_v33 = vpack.c.bf16 %v920_v26, %v916_v19 }
 0x299   : > { %v7377_v35 = vpack.c.bf16 %v922_v31, %v918_v30  ;;  %v5296_v4 = vpop.f32.mrb[8].mxu1  ;;  %5338 = vmatprep.subr.bf16.mxu1 %v7403_v62 }
 0x29a   : > { %v1049_v7 = vadd.f32 %v5296_v4, %v7357_v15  ;;  %v1040_v8 = vpop.f32.mrb[9].mxu1  ;;  %5339 = vmatpush3.bf16.msra.mxu1 %v7403_v62 }
 0x29b   : > { %9412 = vst [vmem:[#allocation38_spill] sm:$0xff] %v7377_v35  ;;  %v925_v37 = vpop.f32.mrb[12].mxu0  ;;  %5608 = vmatprep.subr.msk.bf16.mxu0 %vm1127_vm0, %v7377_v35  ;;  %v1159_v38 = vsel %vm1127_vm0, %v7377_v35, 0  ;;  %v1041_v10 = vadd.f32 %v1040_v8, %v7357_v15  ;;  %v5297_v11 = vpop.f32.mrb[10].mxu1  ;;  %5340 = vmatprep.subr.bf16.mxu1 %v7398_v60 }
 0x29c   : > { %v926_v40 = vadd.f32 %v925_v37, %v7326_v54  ;;  %v927_v41 = vpop.f32.mrb[13].mxu0  ;;  %5307 = vmatpush3.bf16.xpose.msra.mxu0 %v1159_v38  ;;  %v1052_v17 = vadd.f32 %v5297_v11, %v7357_v15  ;;  %v1043_v18 = vpop.f32.mrb[11].mxu1 }
 0x29d   : > { %v929_v44 = vpop.f32.mrb[14].mxu0  ;;  %v928_v55 = vadd.f32 %v927_v41, %v7330_v56  ;;  %v1044_v21 = vadd.f32 %v1043_v18, %v7357_v15 }
 0x29e   : > { %v930_v47 = vadd.f32 %v929_v44, %v7326_v54  ;;  %v931_v48 = vpop.f32.mrb[15].mxu0  ;;  %v7422_v23 = vpack.c.bf16 %v1052_v17, %v1049_v7  ;;  %5341 = vmatpush3.bf16.msra.mxu1 %v7398_v60 }
 0x29f   : > { %v932_v57 = vadd.f32 %v931_v48, %v7330_v56  ;;  %v7427_v25 = vpack.c.bf16 %v1044_v21, %v1041_v10 }
 0x2a0   : > { %v7396_v59 = vpack.c.bf16 %v930_v47, %v926_v40  ;;  %9414 = vst [vmem:[#allocation40_spill] sm:$0xff] %v7422_v23 }
 0x2a1   : > { %v7401_v61 = vpack.c.bf16 %v932_v57, %v928_v55  ;;  %9416 = vst [vmem:[#allocation42_spill] sm:$0xff] %v7427_v25  ;;  %v5300_v28 = vpop.f32.mrb[12].mxu1  ;;  %5342 = vmatprep.subr.bf16.mxu1 %v7427_v25 }
 0x2a2   : > { %v1065_v31 = vadd.f32 %v5300_v28, %v7357_v15  ;;  %v1056_v32 = vpop.f32.mrb[13].mxu1  ;;  %5343 = vmatpush3.bf16.msra.mxu1 %v7427_v25  ;;  %v668_v28 = vld [vmem:[%s7266_s18] sm:$0xff] }
 0x2a3   : > { %9413 = vst [vmem:[#allocation39_spill] sm:$0xff] %v7401_v61  ;;  %v935_v63 = vpop.f32.mrb[16].mxu0  ;;  %5609 = vmatprep.subr.msk.bf16.mxu0 %vm1127_vm0, %v7401_v61  ;;  %v1162_v3 = vsel %vm1127_vm0, %v7401_v61, 0  ;;  %v1057_v38 = vadd.f32 %v1056_v32, %v7357_v15  ;;  %v5301_v39 = vpop.f32.mrb[14].mxu1  ;;  %5344 = vmatprep.subr.bf16.mxu1 %v7422_v23  ;;  %vm1071_vm2 = vcmp.gt.s32.totalorder %v668_v28, 0 }
 0x2a4   : > { %v936_v5 = vadd.f32 %v935_v63, %v7326_v54  ;;  %v937_v6 = vpop.f32.mrb[17].mxu0  ;;  %5309 = vmatpush3.bf16.xpose.msra.mxu0 %v1162_v3  ;;  %v1068_v42 = vadd.f32 %v5301_v39, %v7357_v15  ;;  %v1059_v43 = vpop.f32.mrb[15].mxu1 }
 0x2a5   : > { %v939_v9 = vpop.f32.mrb[18].mxu0  ;;  %v938_v19 = vadd.f32 %v937_v6, %v7330_v56  ;;  %v1060_v46 = vadd.f32 %v1059_v43, %v7357_v15 }
 0x2a6   : > { %v940_v12 = vadd.f32 %v939_v9, %v7326_v54  ;;  %v941_v16 = vpop.f32.mrb[19].mxu0  ;;  %v7446_v48 = vpack.c.bf16 %v1068_v42, %v1065_v31  ;;  %5345 = vmatpush3.bf16.msra.mxu1 %v7422_v23  ;;  %v6778_v31 = vmov 0.0  }
 0x2a7   : > { %v942_v20 = vadd.f32 %v941_v16, %v7330_v56  ;;  %v7451_v52 = vpack.c.bf16 %v1060_v46, %v1057_v38  ;;  %v675_v46 = vld [vmem:[%s7266_s18 + $0x38] sm:$0xff] }
 0x2a8   : > { %v7420_v22 = vpack.c.bf16 %v940_v12, %v936_v5  ;;  %9417 = vst [vmem:[#allocation43_spill] sm:$0xff] %v7446_v48  ;;  %vm1078_vm6 = vcmp.gt.s32.totalorder %v675_v46, 0 }
 0x2a9   : > { %v7425_v24 = vpack.c.bf16 %v942_v20, %v938_v19  ;;  %9419 = vst [vmem:[#allocation45_spill] sm:$0xff] %v7451_v52  ;;  %5346 = vmatprep.subr.bf16.mxu1 %v7451_v52 }
 0x2aa   : > { %5347 = vmatpush3.bf16.msra.mxu1 %v7451_v52 }
 0x2ab   : > { %9415 = vst [vmem:[#allocation41_spill] sm:$0xff] %v7425_v24  ;;  %v945_v26 = vpop.f32.mrb[20].mxu0  ;;  %5610 = vmatprep.subr.msk.bf16.mxu0 %vm1127_vm0, %v7425_v24  ;;  %v1165_v27 = vsel %vm1127_vm0, %v7425_v24, 0  ;;  %5348 = vmatprep.subr.bf16.mxu1 %v7446_v48 }
 0x2ac   : > { %v946_v29 = vadd.f32 %v945_v26, %v7326_v54  ;;  %v947_v30 = vpop.f32.mrb[21].mxu0  ;;  %5311 = vmatpush3.bf16.xpose.msra.mxu0 %v1165_v27 }
 0x2ad   : > { %v949_v37 = vpop.f32.mrb[22].mxu0  ;;  %v948_v44 = vadd.f32 %v947_v30, %v7330_v56  ;;  %v669_v30 = vld [vmem:[%s7266_s18 + $0x8] sm:$0xff] }
 0x2ae   : > { %v950_v40 = vadd.f32 %v949_v37, %v7326_v54  ;;  %v951_v41 = vpop.f32.mrb[23].mxu0  ;;  %5349 = vmatpush3.bf16.msra.mxu1 %v7446_v48  ;;  %vm1072_vm4 = vcmp.gt.s32.totalorder %v669_v30, 0  ;;  %v7511_v37 = vsel %vm1071_vm2, -1e+20, %v6778_v31  ;;  %v676_v30 = vld [vmem:[%s7266_s18 + $0x40] sm:$0xff]  ;;  %vm2705_vm2 = vcmask 785920  }
 0x2af   : > { %v952_v45 = vadd.f32 %v951_v41, %v7330_v56  ;;  %v7519_v43 = vsel %vm1072_vm4, -1e+20, %v6778_v31  ;;  %vm1079_vm11 = vcmp.gt.s32.totalorder %v676_v30, 0 }
 0x2b0   : > { %v7444_v47 = vpack.c.bf16 %v950_v40, %v946_v29  ;;  %v671_v29 = vld [vmem:[%s7266_s18 + $0x18] sm:$0xff]  ;;  %v674_v40 = vld [vmem:[%s7266_s18 + $0x30] sm:$0xff] }
 0x2b1   : > { %v7449_v49 = vpack.c.bf16 %v952_v45, %v948_v44  ;;  %vm1074_vm3 = vcmp.gt.s32.totalorder %v671_v29, 0  ;;  %vm1077_vm5 = vcmp.gt.s32.totalorder %v674_v40, 0  ;;  %v677_v40 = vld [vmem:[%s7266_s18 + $0x48] sm:$0xff] }
 0x2b2   : > { %v7514_v39 = vsel %vm1074_vm3, -1e+20, %v6778_v31  ;;  %vm1080_vm12 = vcmp.gt.s32.totalorder %v677_v40, 0  ;;  %vm3269_vm3 = vcmask 1048320  }
 0x2b3   : > { %9418 = vst [vmem:[#allocation44_spill] sm:$0xff] %v7449_v49  ;;  %v955_v55 = vpop.f32.mrb[24].mxu0  ;;  %5611 = vmatprep.subr.msk.bf16.mxu0 %vm1127_vm0, %v7449_v49  ;;  %v1168_v57 = vsel %vm1127_vm0, %v7449_v49, 0 }
 0x2b4   : > { %v956_v15 = vadd.f32 %v955_v55, %v7326_v54  ;;  %v957_v58 = vpop.f32.mrb[25].mxu0  ;;  %5313 = vmatpush3.bf16.xpose.msra.mxu0 %v1168_v57 }
 0x2b5   : > { %v959_v63 = vpop.f32.mrb[26].mxu0  ;;  %v958_v5 = vadd.f32 %v957_v58, %v7330_v56  ;;  %v672_v58 = vld [vmem:[%s7266_s18 + $0x20] sm:$0xff] }
 0x2b6   : > { %v960_v3 = vadd.f32 %v959_v63, %v7326_v54  ;;  %v961_v4 = vpop.f32.mrb[27].mxu0  ;;  %vm1075_vm7 = vcmp.gt.s32.totalorder %v672_v58, 0 }
 0x2b7   : > { %v962_v6 = vadd.f32 %v961_v4, %v7330_v56  ;;  %v673_v4 = vld [vmem:[%s7266_s18 + $0x28] sm:$0xff] }
 0x2b8   : > { %v7464_v7 = vpack.c.bf16 %v960_v3, %v956_v15  ;;  %vm1076_vm8 = vcmp.gt.s32.totalorder %v673_v4, 0  ;;  %v7578_v4 = vsel %vm1079_vm11, -1e+20, %v6778_v31 }
 0x2b9   : > { %v7467_v8 = vpack.c.bf16 %v962_v6, %v958_v5  ;;  %v7534_v5 = vsel %vm1077_vm5, -1e+20, %v6778_v31  ;;  %9423 = vst [vmem:[#allocation49_spill] sm:$0xff] %v7578_v4 }
 0x2bb   : > { %v965_v9 = vpop.f32.mrb[28].mxu0  ;;  %5612 = vmatprep.subr.msk.bf16.mxu0 %vm1127_vm0, %v7467_v8  ;;  %v1171_v10 = vsel %vm1127_vm0, %v7467_v8, 0 }
 0x2bc   : > { %v966_v11 = vadd.f32 %v965_v9, %v7326_v54  ;;  %v967_v12 = vpop.f32.mrb[29].mxu0  ;;  %5315 = vmatpush3.bf16.xpose.msra.mxu0 %v1171_v10 }
 0x2bd   : > { %v969_v16 = vpop.f32.mrb[30].mxu0  ;;  %v968_v19 = vadd.f32 %v967_v12, %v7330_v56  ;;  %v678_v12 = vld [vmem:[%s7266_s18 + $0x50] sm:$0xff] }
 0x2be   : > { %v970_v17 = vadd.f32 %v969_v16, %v7326_v54  ;;  %v971_v18 = vpop.f32.mrb[31].mxu0  ;;  %vm1081_vm9 = vcmp.gt.s32.totalorder %v678_v12, 0 }
 0x2bf   : > { %v972_v20 = vadd.f32 %v971_v18, %v7330_v56  ;;  %v670_v56 = vld [vmem:[%s7266_s18 + $0x10] sm:$0xff] }
 0x2c0   : > { %v7477_v21 = vpack.c.bf16 %v970_v17, %v966_v11  ;;  %vm1073_vm1 = vcmp.gt.s32.totalorder %v670_v56, 0  ;;  %v7541_v11 = vsel %vm1078_vm6, -1e+20, %v6778_v31  ;;  %v7547_v17 = vsel %vm1075_vm7, -1e+20, %v6778_v31 }
 0x2c1   : > { %v7479_v26 = vpack.c.bf16 %v972_v20, %v968_v19  ;;  %v7508_v32 = vsel %vm1073_vm1, -1e+20, %v6778_v31  ;;  %9420 = vst [vmem:[#allocation46_spill] sm:$0xff] %v7547_v17  ;;  %v7551_v20 = vsel %vm1076_vm8, -1e+20, %v6778_v31 }
 0x2c3   : > { %5613 = vmatprep.subr.msk.bf16.mxu0 %vm1127_vm0, %v7479_v26  ;;  %v1174_v27 = vsel %vm1127_vm0, %v7479_v26, 0 }
 0x2c4   : > { %5317 = vmatpush3.bf16.xpose.msra.mxu0 %v1174_v27  ;;  %v679_v27 = vld [vmem:[%s7266_s18 + $0x58] sm:$0xff] }
 0x2c5   : > { %vm1082_vm10 = vcmp.gt.s32.totalorder %v679_v27, 0 }
 0x2cb   : > { %5319 = vmatmul.mubr.msk.bf16.vlgmr.msra.gmra.mrb[32].mxu0 %vm1127_vm0, %v7353_v13 }
 0x2cc   : > { %5322 = vmatprep.mubr.msk.bf16.mxu0 %vm1127_vm0, %v7373_v33 }
 0x2d3   : > { %5323 = vmatmul.mubr.msk.bf16.gmra.mrb[36].mxu0 %vm1127_vm0, %v7396_v59 }
 0x2d4   : > { %5326 = vmatprep.mubr.msk.bf16.mxu0 %vm1127_vm0, %v7420_v22 }
 0x2db   : > { %5327 = vmatmul.mubr.msk.bf16.gmra.mrb[40].mxu0 %vm1127_vm0, %v7444_v47 }
 0x2dc   : > { %5330 = vmatprep.mubr.msk.bf16.mxu0 %vm1127_vm0, %v7464_v7 }
 0x2e3   : > { %5331 = vmatmul.mubr.msk.bf16.gmra.mrb[44].mxu0 %vm1127_vm0, %v7477_v21 }
 0x2fd   : > { %v7499_v54 = vpop.permute.xlu0 %1602 }
 0x2fe   : > { %5614 = vmatprep.subr.msk.bf16.mxu1 %vm1127_vm0, %v7499_v54 }
 0x39e   : > { %v5320_v38 = vpop.f32.mrb[32].mxu0 }
 0x39f   : > { %v1219_v41 = vadd.f32 %v5320_v38, %v7508_v32  ;;  %v1210_v42 = vpop.f32.mrb[33].mxu0 }
 0x3a0   : > { %v1211_v44 = vadd.f32 %v1210_v42, %v7511_v37  ;;  %v5321_v45 = vpop.f32.mrb[34].mxu0 }
 0x3a1   : > { %v7523_v55 = vmul.f32 0.17677669, %v1219_v41  ;;  %v1222_v57 = vadd.f32 %v5321_v45, %v7514_v39  ;;  %v1213_v15 = vpop.f32.mrb[35].mxu0 }
 0x3a2   : > { %v7527_v63 = vmul.f32 0.17677669, %v1211_v44  ;;  %v1214_v3 = vadd.f32 %v1213_v15, %v7519_v43  ;;  %v7565_v44 = vsel %vm1081_vm9, -1e+20, %v6778_v31  ;;  %v682_v15 = vld [vmem:[%s7266_s18 + $0x70] sm:$0xff] }
 0x3a3   : > { %1293 = vmax.xlane.f32.xlu1 %v7523_v55  ;;  %v7536_v6 = vmul.f32 0.17677669, %v1222_v57  ;;  %9421 = vst [vmem:[#allocation47_spill] sm:$0xff] %v7565_v44  ;;  %v7571_v57 = vsel %vm1082_vm10, -1e+20, %v6778_v31  ;;  %vm1085_vm13 = vcmp.gt.s32.totalorder %v682_v15, 0 }
 0x3a4   : > { %1289 = vmax.xlane.f32.xlu0 %v7527_v63  ;;  %v7538_v9 = vmul.f32 0.17677669, %v1214_v3  ;;  %9422 = vst [vmem:[#allocation48_spill] sm:$0xff] %v7571_v57  ;;  %v7595_v40 = vsel %vm1085_vm13, -1e+20, %v6778_v31 }
 0x3a5   : > { %9425 = vst [vmem:[#allocation51_spill] sm:$0xff] %v7595_v40 }
 0x3a6   : > { %v5324_v10 = vpop.f32.mrb[36].mxu0 }
 0x3a7   : > { %v1235_v16 = vadd.f32 %v5324_v10, %v7534_v5  ;;  %1295 = vmax.xlane.f32.xlu1 %v7536_v6  ;;  %v1226_v18 = vpop.f32.mrb[37].mxu0 }
 0x3a8   : > { %v5325_v19 = vpop.f32.mrb[38].mxu0  ;;  %1291 = vmax.xlane.f32.xlu0 %v7538_v9  ;;  %v1227_v38 = vadd.f32 %v1226_v18, %v7547_v17 }
 0x3a9   : > { %v7554_v56 = vmul.f32 0.17677669, %v1235_v16  ;;  %v1238_v28 = vadd.f32 %v5325_v19, %v7541_v11  ;;  %v1229_v29 = vpop.f32.mrb[39].mxu0  ;;  %v7582_v16 = vsel %vm1080_vm12, -1e+20, %v6778_v31 }
 0x3aa   : > { %v1230_v42 = vadd.f32 %v1229_v29, %v7551_v20  ;;  %v7568_v45 = vmul.f32 0.17677669, %v1227_v38  ;;  %9424 = vst [vmem:[#allocation50_spill] sm:$0xff] %v7582_v16 }
 0x3ab   : > { %v7560_v41 = vmul.f32 0.17677669, %v1238_v28  ;;  %v680_v28 = vld [vmem:[%s7266_s18 + $0x60] sm:$0xff] }
 0x3ac   : > { %1301 = vmax.xlane.f32.xlu0 %v7554_v56  ;;  %v7574_v58 = vmul.f32 0.17677669, %v1230_v42  ;;  %vm1083_vm14 = vcmp.gt.s32.totalorder %v680_v28, 0 }
 0x3ad   : > { %1303 = vmax.xlane.f32.xlu1 %v7560_v41 }
 0x3ae   : > { %v5328_v46 = vpop.f32.mrb[40].mxu0 }
 0x3af   : > { %v1251_v3 = vadd.f32 %v5328_v46, %v7565_v44  ;;  %v1242_v10 = vpop.f32.mrb[41].mxu0 }
 0x3b0   : > { %v5329_v12 = vpop.f32.mrb[42].mxu0  ;;  %1297 = vmax.xlane.f32.xlu0 %v7568_v45  ;;  %v1243_v29 = vadd.f32 %v1242_v10, %v7578_v4  ;;  %v7604_v10 = vsel %vm1083_vm14, -1e+20, %v6778_v31 }
 0x3b1   : > { %v7584_v18 = vmul.f32 0.17677669, %v1251_v3  ;;  %v1254_v19 = vadd.f32 %v5329_v12, %v7571_v57  ;;  %v1245_v27 = vpop.f32.mrb[43].mxu0  ;;  %1299 = vmax.xlane.f32.xlu1 %v7574_v58  ;;  %9426 = vst [vmem:[#allocation52_spill] sm:$0xff] %v7604_v10 }
 0x3b2   : > { %v1246_v38 = vadd.f32 %v1245_v27, %v7582_v16  ;;  %v7598_v42 = vmul.f32 0.17677669, %v1243_v29 }
 0x3b3   : > { %v7590_v30 = vmul.f32 0.17677669, %v1254_v19 }
 0x3b4   : > { %1309 = vmax.xlane.f32.xlu0 %v7584_v18  ;;  %v7600_v15 = vmul.f32 0.17677669, %v1246_v38 }
 0x3b5   : > { %1311 = vmax.xlane.f32.xlu1 %v7590_v30 }
 0x3b6   : > { %v5332_v46 = vpop.f32.mrb[44].mxu0 }
 0x3b7   : > { %v1267_v3 = vadd.f32 %v5332_v46, %v7595_v40  ;;  %v1258_v12 = vpop.f32.mrb[45].mxu0  ;;  %v683_v46 = vld [vmem:[%s7266_s18 + $0x78] sm:$0xff] }
 0x3b8   : > { %v5333_v19 = vpop.f32.mrb[46].mxu0  ;;  %1305 = vmax.xlane.f32.xlu0 %v7598_v42  ;;  %v1259_v29 = vadd.f32 %v1258_v12, %v7604_v10  ;;  %vm1086_vm15 = vcmp.gt.s32.totalorder %v683_v46, 0  ;;  %v7635_v46 = vpop.permute.xlu1 %1604 }
 0x3b9   : > { %v7607_v27 = vmul.f32 0.17677669, %v1267_v3  ;;  %v1261_v28 = vpop.f32.mrb[47].mxu0  ;;  %1307 = vmax.xlane.f32.xlu1 %v7600_v15  ;;  %v681_v3 = vld [vmem:[%s7266_s18 + $0x68] sm:$0xff]  ;;  %v7622_v53 = vsel %vm1086_vm15, -1e+20, %v6778_v31 }
 0x3ba   : > { %v7612_v38 = vmul.f32 0.17677669, %v1259_v29  ;;  %9427 = vst [vmem:[#allocation53_spill] sm:$0xff] %v7622_v53  ;;  %vm1084_vm1 = vcmp.gt.s32.totalorder %v681_v3, 0  ;;  %v1270_v12 = vadd.f32 %v5333_v19, %v7622_v53  ;;  %s6634_s18 = sshll.u32 %s6781_s17, 4  ;;  %s6635_s18 = int_to_ptr.vmem [resolvable:$false] %s6634_s18 }
 0x3bb   : > { %v7626_v29 = vsel %vm1084_vm1, -1e+20, %v6778_v31  ;;  %p6637_p12 = scmp.lt.s32.totalorder %s9145_s29, %s6635_s18 }
 0x3bc   : > { %1317 = vmax.xlane.f32.xlu0 %v7607_v27  ;;  %9428 = vst [vmem:[#allocation54_spill] sm:$0xff] %v7626_v29  ;;  %v7628_v51 = vmul.f32 0.17677669, %v1270_v12  ;;  %v1262_v0 = vadd.f32 %v1261_v28, %v7626_v29 }
 0x3be   : > { %v7632_v50 = vmul.f32 0.17677669, %v1262_v0 }
 0x3c0   : > { %1313 = vmax.xlane.f32.xlu0 %v7612_v38 }
 0x3ca   : > { %1608 = vrot.lane.b32.xlu1 %v7401_v61, %s6777_s13 }
 0x3d6   : > { %1606 = vrot.lane.b32.xlu0 %v7377_v35, %s6777_s13 }
 0x3ee   : > { %1319 = vmax.xlane.f32.xlu1 %v7628_v51 }
 0x3f2   : > { %1315 = vmax.xlane.f32.xlu1 %v7632_v50 }
 0x430   : > { %v1294_v35 = vpop.xlane.xlu1 %1293 }
 0x431   : > { %v1323_v3 = vsub.f32 %v7523_v55, %v1294_v35  ;;  %v1290_v61 = vpop.xlane.xlu0 %1289 }
 0x432   : > { %v1321_v19 = vsub.f32 %v7527_v63, %v1290_v61 }
 0x433   : > { %v1341_v31 = vmul.f32 1.442695, %v1323_v3 }
 0x434   : > { %v1337_v53 = vmul.f32 1.442695, %v1321_v19  ;;  %v1296_v12 = vpop.xlane.xlu1 %1295 }
 0x435   : > { %5888 = vpow2.f32 %v1341_v31  ;;  %v1324_v28 = vsub.f32 %v7536_v6, %v1296_v12  ;;  %v1292_v29 = vpop.xlane.xlu0 %1291 }
 0x436   : > { %v1322_v0 = vsub.f32 %v7538_v9, %v1292_v29  ;;  %5890 = vpow2.f32 %v1337_v53 }
 0x437   : > { %v1343_v10 = vmul.f32 1.442695, %v1324_v28 }
 0x438   : > { %v1339_v40 = vmul.f32 1.442695, %v1322_v0 }
 0x439   : > { %5892 = vpow2.f32 %v1343_v10  ;;  %v1302_v53 = vpop.xlane.xlu0 %1301 }
 0x43a   : > { %5894 = vpow2.f32 %v1339_v40  ;;  %v1304_v9 = vpop.xlane.xlu1 %1303  ;;  %v1327_v29 = vsub.f32 %v7554_v56, %v1302_v53 }
 0x43b   : > { %v1328_v0 = vsub.f32 %v7560_v41, %v1304_v9 }
 0x43c   : > { %v1349_v31 = vmul.f32 1.442695, %v1327_v29 }
 0x43d   : > { %v1298_v63 = vpop.xlane.xlu0 %1297  ;;  %v1351_v44 = vmul.f32 1.442695, %v1328_v0 }
 0x43e   : > { %v1300_v10 = vpop.xlane.xlu1 %1299  ;;  %v1325_v3 = vsub.f32 %v7568_v45, %v1298_v63  ;;  %5896 = vpow2.f32 %v1349_v31 }
 0x43f   : > { %v7641_v4 = vpop.eup %5888  ;;  %v1326_v12 = vsub.f32 %v7574_v58, %v1300_v10 }
 0x440   : > { %1373 = vadd.xlane.f32.xlu0 %v7641_v4  ;;  %v7644_v35 = vpop.eup %5890  ;;  %v1345_v16 = vmul.f32 1.442695, %v1325_v3 }
 0x441   : > { %v1310_v6 = vpop.xlane.xlu0 %1309 }
 0x442   : > { %v1312_v28 = vpop.xlane.xlu1 %1311  ;;  %5898 = vpow2.f32 %v1345_v16  ;;  %v1331_v17 = vsub.f32 %v7584_v18, %v1310_v6 }
 0x443   : > { %v7646_v61 = vpop.eup %5892  ;;  %v1332_v16 = vsub.f32 %v7590_v30, %v1312_v28 }
 0x444   : > { %1375 = vadd.xlane.f32.xlu1 %v7646_v61  ;;  %1369 = vadd.xlane.f32.xlu0 %v7644_v35  ;;  %v7650_v55 = vpop.eup %5894  ;;  %v1357_v58 = vmul.f32 1.442695, %v1331_v17 }
 0x445   : > { %v1306_v40 = vpop.xlane.xlu0 %1305 }
 0x446   : > { %v1308_v56 = vpop.xlane.xlu1 %1307  ;;  %v1329_v63 = vsub.f32 %v7598_v42, %v1306_v40 }
 0x447   : > { %v1330_v42 = vsub.f32 %v7600_v15, %v1308_v56 }
 0x448   : > { %1371 = vadd.xlane.f32.xlu1 %v7650_v55  ;;  %v7667_v10 = vpop.eup %5896  ;;  %v1353_v18 = vmul.f32 1.442695, %v1329_v63 }
 0x449   : > { %v1318_v19 = vpop.xlane.xlu0 %1317 }
 0x44a   : > { %v7665_v9 = vpop.permute.xlu1 %1608 }
 0x44d   : > { %v1314_v57 = vpop.xlane.xlu0 %1313 }
 0x44e   : > { %v1333_v53 = vsub.f32 %v7612_v38, %v1314_v57  ;;  %v1359_v57 = vmul.f32 1.442695, %v1332_v16 }
 0x450   : > { %v1361_v41 = vmul.f32 1.442695, %v1333_v53 }
 0x451   : > { %v1607_v0 = vpop.permute.xlu0 %1606 }
 0x459   : > { %1612 = vrot.lane.b32.xlu1 %v7449_v49, %s6777_s13  ;;  %v1347_v49 = vmul.f32 1.442695, %v1326_v12 }
 0x45a   : > { %1610 = vrot.lane.b32.xlu0 %v7425_v24, %s6777_s13  ;;  %v1335_v24 = vsub.f32 %v7607_v27, %v1318_v19 }
 0x45b   : > { %5900 = vpow2.f32 %v1347_v49 }
 0x45c   : > { %v1365_v45 = vmul.f32 1.442695, %v1335_v24  ;;  %5902 = vpow2.f32 %v1351_v44  ;;  %v7671_v24 = vpop.eup %5898 }
 0x45e   : > { %5904 = vpow2.f32 %v1365_v45 }
 0x45f   : > { %5906 = vpow2.f32 %v1357_v58 }
 0x460   : > { %5908 = vpow2.f32 %v1361_v41 }
 0x461   : > { %5910 = vpow2.f32 %v1353_v18 }
 0x465   : > { %v7673_v44 = vpop.eup %5900 }
 0x466   : > { %v7679_v38 = vpop.eup %5902 }
 0x468   : > { %v7681_v6 = vpop.eup %5904 }
 0x469   : > { %v7686_v29 = vpop.eup %5906 }
 0x46a   : > { %v7688_v3 = vpop.eup %5908 }
 0x46b   : > { %v7692_v19 = vpop.eup %5910 }
 0x479   : > { %1381 = vadd.xlane.f32.xlu0 %v7667_v10 }
 0x47b   : > { %v1320_v49 = vpop.xlane.xlu1 %1319 }
 0x47c   : > { %v1336_v17 = vsub.f32 %v7628_v51, %v1320_v49  ;;  %v1355_v51 = vmul.f32 1.442695, %v1330_v42 }
 0x47d   : > { %1379 = vadd.xlane.f32.xlu0 %v7673_v44  ;;  %1377 = vadd.xlane.f32.xlu1 %v7671_v24 }
 0x47e   : > { %v1367_v27 = vmul.f32 1.442695, %v1336_v17 }
 0x47f   : > { %v1316_v30 = vpop.xlane.xlu1 %1315 }
 0x480   : > { %5912 = vpow2.f32 %v1367_v27  ;;  %v1334_v40 = vsub.f32 %v7632_v50, %v1316_v30  ;;  %v1643_v30 = vsel %vm1127_vm0, %v7499_v54, 0 }
 0x481   : > { %1383 = vadd.xlane.f32.xlu1 %v7679_v38  ;;  %1397 = vadd.xlane.f32.xlu0 %v7681_v6  ;;  %5914 = vpow2.f32 %v1359_v57 }
 0x482   : > { %5916 = vpow2.f32 %v1355_v51  ;;  %v1363_v15 = vmul.f32 1.442695, %v1334_v40 }
 0x484   : > { %5918 = vpow2.f32 %v1363_v15 }
 0x485   : > { %1389 = vadd.xlane.f32.xlu1 %v7686_v29  ;;  %1393 = vadd.xlane.f32.xlu0 %v7688_v3 }
 0x489   : > { %1385 = vadd.xlane.f32.xlu1 %v7692_v19 }
 0x48a   : > { %v7695_v31 = vpop.eup %5912 }
 0x48b   : > { %1399 = vadd.xlane.f32.xlu0 %v7695_v31  ;;  %v7698_v50 = vpop.eup %5914 }
 0x48c   : > { %v7701_v12 = vpop.eup %5916 }
 0x48d   : > { %1391 = vadd.xlane.f32.xlu1 %v7698_v50 }
 0x48e   : > { %v7704_v28 = vpop.eup %5918 }
 0x491   : > { %1387 = vadd.xlane.f32.xlu1 %v7701_v12 }
 0x495   : > { %1395 = vadd.xlane.f32.xlu1 %v7704_v28 }
 0x4a1   : > { %1614 = vrot.lane.b32.xlu0 %v7467_v8, %s6777_s13 }
 0x4a5   : > { %1578 = vrot.lane.b32.xlu0 %v7336_v1, %s6777_s13 }
 0x4a6   : > { %1616 = vrot.lane.b32.xlu1 %v7479_v26, %s6777_s13 }
 0x4a9   : > { %1582 = vrot.lane.b32.xlu0 %v7373_v33, %s6777_s13 }
 0x4aa   : > { %1580 = vrot.lane.b32.xlu1 %v7353_v13, %s6777_s13 }
 0x4ad   : > { %1586 = vrot.lane.b32.xlu0 %v7420_v22, %s6777_s13 }
 0x4ae   : > { %1584 = vrot.lane.b32.xlu1 %v7396_v59, %s6777_s13 }
 0x4b1   : > { %1590 = vrot.lane.b32.xlu0 %v7464_v7, %s6777_s13 }
 0x4b2   : > { %1588 = vrot.lane.b32.xlu1 %v7444_v47, %s6777_s13 }
 0x4b5   : > { %1956 = vrot.lane.b32.xlu0 %v7379_v36, %s6777_s13 }
 0x4b6   : > { %1592 = vrot.lane.b32.xlu1 %v7477_v21, %s6777_s13 }
 0x4b9   : > { %1960 = vrot.lane.b32.xlu0 %v7403_v62, %s6777_s13 }
 0x4ba   : > { %1958 = vrot.lane.b32.xlu1 %v7375_v34, %s6777_s13 }
 0x4bd   : > { %1964 = vrot.lane.b32.xlu0 %v7427_v25, %s6777_s13 }
 0x4be   : > { %1962 = vrot.lane.b32.xlu1 %v7398_v60, %s6777_s13 }
 0x4c1   : > { %1968 = vrot.lane.b32.xlu0 %v7451_v52, %s6777_s13 }
 0x4c2   : > { %1966 = vrot.lane.b32.xlu1 %v7422_v23, %s6777_s13 }
 0x4c5   : > { %2174 = vrot.lane.b32.xlu0 %v7338_v2, %s6779_s20 }
 0x4c6   : > { %1970 = vrot.lane.b32.xlu1 %v7446_v48, %s6777_s13 }
 0x4ca   : > { %2176 = vrot.lane.b32.xlu1 %v7355_v14, %s6779_s20 }
 0x4cd   : > { %v1374_v56 = vpop.xlane.xlu0 %1373 }
 0x4ce   : > { %5920 = vrcp.f32 %v1374_v56 }
 0x4d1   : > { %v1376_v45 = vpop.xlane.xlu1 %1375  ;;  %v1370_v53 = vpop.xlane.xlu0 %1369 }
 0x4d2   : > { %5922 = vrcp.f32 %v1376_v45 }
 0x4d3   : > { %5924 = vrcp.f32 %v1370_v53 }
 0x4d5   : > { %v1372_v58 = vpop.xlane.xlu1 %1371  ;;  %v1611_v54 = vpop.permute.xlu0 %1610 }
 0x4d6   : > { %5926 = vrcp.f32 %v1372_v58  ;;  %v1655_v40 = vsel %vm1127_vm0, %v1611_v54, 0 }
 0x4d8   : > { %v5921_v63 = vpop.eup %5920 }
 0x4d9   : > { %v1406_v41 = vmul.f32 %v5921_v63, %v7641_v4  ;;  %v1613_v51 = vpop.permute.xlu1 %1612 }
 0x4db   : > { %1435 = vst [vmem:[%s7749_s24 + $0x10] sm:$0xff] %v1406_v41 }
 0x4dc   : > { %v5923_v16 = vpop.eup %5922 }
 0x4dd   : > { %v5925_v18 = vpop.eup %5924  ;;  %v1408_v49 = vmul.f32 %v5923_v16, %v7646_v61  ;;  %v1649_v61 = vsel %vm1127_vm0, %v1607_v0, 0 }
 0x4de   : > { %v1402_v17 = vmul.f32 %v5925_v18, %v7644_v35  ;;  %v1646_v35 = vsel %vm1127_vm0, %v7635_v46, 0 }
 0x4df   : > { %1436 = vst [vmem:[%s7749_s24 + $0x18] sm:$0xff] %v1408_v49  ;;  %v1450_v27 = vpack.c.bf16 %v1408_v49, %v1406_v41 }
 0x4e0   : > { %v5927_v57 = vpop.eup %5926  ;;  %1433 = vst [vmem:[%s7749_s24] sm:$0xff] %v1402_v17 }
 0x4e1   : > { %v1404_v42 = vmul.f32 %v5927_v57, %v7650_v55  ;;  %v1652_v55 = vsel %vm1127_vm0, %v7665_v9, 0 }
 0x4e3   : > { %1434 = vst [vmem:[%s7749_s24 + $0x8] sm:$0xff] %v1404_v42  ;;  %v1449_v4 = vpack.c.bf16 %v1404_v42, %v1402_v17 }
 0x4e5   : > { %5350 = vmatprep.mubr.bf16.mxu1 %v1449_v4 }
 0x4e6   : > { %5351 = vmatmul.mubr.bf16.vlgmr.msra.gmra.mrb[16].mxu1 %v1450_v27 }
 0x4e7   : > { %5367 = vmatpush3.bf16.xpose.msra.mxu1 %v1643_v30 }
 0x4e8   : > { %5615 = vmatprep.subr.msk.bf16.mxu1 %vm1127_vm0, %v7635_v46 }
 0x4ef   : > { %5369 = vmatpush3.bf16.xpose.msra.mxu1 %v1646_v35 }
 0x4f0   : > { %5616 = vmatprep.subr.msk.bf16.mxu1 %vm1127_vm0, %v1607_v0 }
 0x4f7   : > { %5371 = vmatpush3.bf16.xpose.msra.mxu1 %v1649_v61 }
 0x4f8   : > { %5617 = vmatprep.subr.msk.bf16.mxu1 %vm1127_vm0, %v7665_v9  ;;  %v1658_v9 = vsel %vm1127_vm0, %v1613_v51, 0 }
 0x4ff   : > { %5373 = vmatpush3.bf16.xpose.msra.mxu1 %v1652_v55 }
 0x500   : > { %5618 = vmatprep.subr.msk.bf16.mxu1 %vm1127_vm0, %v1611_v54 }
 0x506   : > { %v1382_v46 = vpop.xlane.xlu0 %1381 }
 0x507   : > { %5375 = vmatpush3.bf16.xpose.msra.mxu1 %v1655_v40  ;;  %5928 = vrcp.f32 %v1382_v46 }
 0x508   : > { %5619 = vmatprep.subr.msk.bf16.mxu1 %vm1127_vm0, %v1613_v51 }
 0x50a   : > { %v1378_v15 = vpop.xlane.xlu1 %1377  ;;  %v1380_v0 = vpop.xlane.xlu0 %1379 }
 0x50b   : > { %5930 = vrcp.f32 %v1378_v15 }
 0x50c   : > { %5932 = vrcp.f32 %v1380_v0 }
 0x50e   : > { %v1384_v56 = vpop.xlane.xlu1 %1383  ;;  %v1398_v45 = vpop.xlane.xlu0 %1397 }
 0x50f   : > { %5934 = vrcp.f32 %v1384_v56  ;;  %5377 = vmatpush3.bf16.xpose.msra.mxu1 %v1658_v9 }
 0x510   : > { %5936 = vrcp.f32 %v1398_v45 }
 0x511   : > { %v5929_v53 = vpop.eup %5928 }
 0x512   : > { %v1390_v58 = vpop.xlane.xlu1 %1389  ;;  %v1394_v63 = vpop.xlane.xlu0 %1393  ;;  %v1414_v41 = vmul.f32 %v5929_v53, %v7667_v10 }
 0x513   : > { %5938 = vrcp.f32 %v1390_v58 }
 0x514   : > { %5940 = vrcp.f32 %v1394_v63  ;;  %1439 = vst [vmem:[%s7749_s24 + $0x30] sm:$0xff] %v1414_v41 }
 0x515   : > { %v5931_v16 = vpop.eup %5930 }
 0x516   : > { %v5933_v18 = vpop.eup %5932  ;;  %v1386_v49 = vpop.xlane.xlu1 %1385  ;;  %v1410_v17 = vmul.f32 %v5931_v16, %v7671_v24 }
 0x517   : > { %5942 = vrcp.f32 %v1386_v49  ;;  %v1412_v57 = vmul.f32 %v5933_v18, %v7673_v44 }
 0x518   : > { %v1400_v42 = vpop.xlane.xlu0 %1399  ;;  %1437 = vst [vmem:[%s7749_s24 + $0x20] sm:$0xff] %v1410_v17 }
 0x519   : > { %v5935_v4 = vpop.eup %5934  ;;  %5944 = vrcp.f32 %v1400_v42  ;;  %1438 = vst [vmem:[%s7749_s24 + $0x28] sm:$0xff] %v1412_v57  ;;  %v1451_v27 = vpack.c.bf16 %v1412_v57, %v1410_v17 }
 0x51a   : > { %v5937_v10 = vpop.eup %5936  ;;  %v1392_v30 = vpop.xlane.xlu1 %1391  ;;  %v1416_v35 = vmul.f32 %v5935_v4, %v7679_v38 }
 0x51b   : > { %5946 = vrcp.f32 %v1392_v30  ;;  %5354 = vmatprep.mubr.bf16.mxu1 %v1451_v27  ;;  %v1430_v61 = vmul.f32 %v5937_v10, %v7681_v6 }
 0x51c   : > { %v1615_v24 = vpop.permute.xlu0 %1614  ;;  %1440 = vst [vmem:[%s7749_s24 + $0x38] sm:$0xff] %v1416_v35  ;;  %v1452_v44 = vpack.c.bf16 %v1416_v35, %v1414_v41 }
 0x51d   : > { %v5939_v55 = vpop.eup %5938  ;;  %5620 = vmatprep.subr.msk.bf16.mxu1 %vm1127_vm0, %v1615_v24  ;;  %v1661_v54 = vsel %vm1127_vm0, %v1615_v24, 0  ;;  %1447 = vst [vmem:[%s7749_s24 + $0x70] sm:$0xff] %v1430_v61 }
 0x51e   : > { %v5941_v51 = vpop.eup %5940  ;;  %v1388_v40 = vpop.xlane.xlu1 %1387  ;;  %5355 = vmatmul.mubr.bf16.gmra.mrb[20].mxu1 %v1452_v44  ;;  %v1422_v38 = vmul.f32 %v5939_v55, %v7686_v29 }
 0x51f   : > { %5948 = vrcp.f32 %v1388_v40  ;;  %5379 = vmatpush3.bf16.xpose.msra.mxu1 %v1661_v54  ;;  %v1426_v6 = vmul.f32 %v5941_v51, %v7688_v3 }
 0x520   : > { %v1579_v46 = vpop.permute.xlu0 %1578  ;;  %1443 = vst [vmem:[%s7749_s24 + $0x50] sm:$0xff] %v1422_v38 }
 0x521   : > { %v5943_v15 = vpop.eup %5942  ;;  %1445 = vst [vmem:[%s7749_s24 + $0x60] sm:$0xff] %v1426_v6 }
 0x522   : > { %v1396_v0 = vpop.xlane.xlu1 %1395  ;;  %v1418_v56 = vmul.f32 %v5943_v15, %v7692_v19 }
 0x523   : > { %v5945_v9 = vpop.eup %5944  ;;  %5950 = vrcp.f32 %v1396_v0 }
 0x524   : > { %v1583_v45 = vpop.permute.xlu0 %1582  ;;  %1441 = vst [vmem:[%s7749_s24 + $0x40] sm:$0xff] %v1418_v56  ;;  %v1432_v29 = vmul.f32 %v5945_v9, %v7695_v31 }
 0x525   : > { %v5947_v53 = vpop.eup %5946 }
 0x526   : > { %v1617_v58 = vpop.permute.xlu1 %1616  ;;  %v1424_v63 = vmul.f32 %v5947_v53, %v7698_v50  ;;  %1448 = vst [vmem:[%s7749_s24 + $0x78] sm:$0xff] %v1432_v29  ;;  %v1456_v30 = vpack.c.bf16 %v1432_v29, %v1430_v61 }
 0x527   : > { %5621 = vmatprep.subr.msk.bf16.mxu1 %vm1127_vm0, %v1617_v58  ;;  %v1664_v3 = vsel %vm1127_vm0, %v1617_v58, 0 }
 0x528   : > { %5381 = vmatpush3.bf16.xpose.msra.mxu1 %v1664_v3  ;;  %v1587_v41 = vpop.permute.xlu0 %1586  ;;  %1444 = vst [vmem:[%s7749_s24 + $0x58] sm:$0xff] %v1424_v63  ;;  %v1454_v57 = vpack.c.bf16 %v1424_v63, %v1422_v38 }
 0x529   : > { %v5949_v19 = vpop.eup %5948 }
 0x52a   : > { %v1581_v16 = vpop.permute.xlu1 %1580  ;;  %v1420_v18 = vmul.f32 %v5949_v19, %v7701_v12 }
 0x52c   : > { %v1591_v49 = vpop.permute.xlu0 %1590  ;;  %1442 = vst [vmem:[%s7749_s24 + $0x48] sm:$0xff] %v1420_v18  ;;  %v1453_v31 = vpack.c.bf16 %v1420_v18, %v1418_v56 }
 0x52d   : > { %v5951_v17 = vpop.eup %5950 }
 0x52e   : > { %v1585_v42 = vpop.permute.xlu1 %1584  ;;  %5358 = vmatprep.mubr.bf16.mxu1 %v1453_v31  ;;  %v1428_v50 = vmul.f32 %v5951_v17, %v7704_v28 }
 0x52f   : > { %5359 = vmatmul.mubr.bf16.gmra.mrb[24].mxu1 %v1454_v57 }
 0x530   : > { %v1957_v4 = vpop.permute.xlu0 %1956  ;;  %1446 = vst [vmem:[%s7749_s24 + $0x68] sm:$0xff] %v1428_v50  ;;  %v1455_v27 = vpack.c.bf16 %v1428_v50, %v1426_v6 }
 0x531   : > { %5398 = vmatprep.subr.bf16.mxu0 %v1957_v4 }
 0x532   : > { %v1589_v10 = vpop.permute.xlu1 %1588  ;;  %5362 = vmatprep.mubr.bf16.mxu1 %v1455_v27  ;;  %5399 = vmatpush3.bf16.msra.mxu0 %v1957_v4 }
 0x534   : > { %v1961_v24 = vpop.permute.xlu0 %1960 }
 0x536   : > { %v1593_v35 = vpop.permute.xlu1 %1592 }
 0x537   : > { %5363 = vmatmul.mubr.bf16.gmra.mrb[28].mxu1 %v1456_v30 }
 0x538   : > { %5382 = vmatprep.mubr.msk.bf16.mxu1 %vm1127_vm0, %v1579_v46  ;;  %v1965_v44 = vpop.permute.xlu0 %1964 }
 0x53a   : > { %v1959_v12 = vpop.permute.xlu1 %1958 }
 0x53b   : > { %5400 = vmatprep.subr.bf16.mxu0 %v1959_v12 }
 0x53c   : > { %5401 = vmatpush3.bf16.msra.mxu0 %v1959_v12  ;;  %v1969_v55 = vpop.permute.xlu0 %1968 }
 0x53d   : > { %5402 = vmatprep.subr.bf16.mxu0 %v1961_v24 }
 0x53e   : > { %v1963_v28 = vpop.permute.xlu1 %1962 }
 0x53f   : > { %5383 = vmatmul.mubr.msk.bf16.vlgmr.msra.gmra.mrb[32].mxu1 %vm1127_vm0, %v1581_v16 }
 0x540   : > { %5386 = vmatprep.mubr.msk.bf16.mxu1 %vm1127_vm0, %v1583_v45  ;;  %5403 = vmatpush3.bf16.msra.mxu0 %v1961_v24  ;;  %v7809_v51 = vpop.permute.xlu0 %2174 }
 0x541   : > { %5404 = vmatprep.subr.bf16.mxu0 %v1963_v28 }
 0x542   : > { %v1967_v61 = vpop.permute.xlu1 %1966 }
 0x544   : > { %5405 = vmatpush3.bf16.msra.mxu0 %v1963_v28 }
 0x545   : > { %5406 = vmatprep.subr.bf16.mxu0 %v1965_v44 }
 0x546   : > { %v1971_v54 = vpop.permute.xlu1 %1970 }
 0x547   : > { %5387 = vmatmul.mubr.msk.bf16.gmra.mrb[36].mxu1 %vm1127_vm0, %v1585_v42 }
 0x548   : > { %5390 = vmatprep.mubr.msk.bf16.mxu1 %vm1127_vm0, %v1587_v41  ;;  %5407 = vmatpush3.bf16.msra.mxu0 %v1965_v44 }
 0x549   : > { %5408 = vmatprep.subr.bf16.mxu0 %v1967_v61 }
 0x54c   : > { %5409 = vmatpush3.bf16.msra.mxu0 %v1967_v61 }
 0x54d   : > { %5410 = vmatprep.subr.bf16.mxu0 %v1969_v55 }
 0x54f   : > { %5391 = vmatmul.mubr.msk.bf16.gmra.mrb[40].mxu1 %vm1127_vm0, %v1589_v10 }
 0x550   : > { %5394 = vmatprep.mubr.msk.bf16.mxu1 %vm1127_vm0, %v1591_v49  ;;  %5411 = vmatpush3.bf16.msra.mxu0 %v1969_v55 }
 0x551   : > { %5412 = vmatprep.subr.bf16.mxu0 %v1971_v54 }
 0x554   : > { %5413 = vmatpush3.bf16.msra.mxu0 %v1971_v54 }
 0x555   : > { %5622 = vmatprep.subr.msk.bf16.mxu0 %vm1127_vm0, %v7809_v51 }
 0x557   : > { %5395 = vmatmul.mubr.msk.bf16.gmra.mrb[44].mxu1 %vm1127_vm0, %v1593_v35 }
 0x5b9   : > { %v5352_v40 = vpop.f32.mrb[16].mxu1 }
 0x5ba   : > { %1556 = vst.msk [vmem:[#allocation2 + $0x10] sm:$0xff] %vm1127_vm0, %v5352_v40  ;;  %v1491_v38 = vpop.f32.mrb[17].mxu1 }
 0x5bb   : > { %1554 = vst.msk [vmem:[#allocation2] sm:$0xff] %vm1127_vm0, %v1491_v38  ;;  %v5353_v6 = vpop.f32.mrb[18].mxu1  ;;  %v9429_v38 = vld [vmem:[#allocation46_spill] sm:$0xff] }
 0x5bc   : > { %1557 = vst.msk [vmem:[#allocation2 + $0x18] sm:$0xff] %vm1127_vm0, %v5353_v6  ;;  %v1494_v46 = vpop.f32.mrb[19].mxu1 }
 0x5bd   : > { %1555 = vst.msk [vmem:[#allocation2 + $0x8] sm:$0xff] %vm1127_vm0, %v1494_v46 }
 0x5f1   : > { %v5356_v15 = vpop.f32.mrb[20].mxu1 }
 0x5f2   : > { %1560 = vst.msk [vmem:[#allocation2 + $0x30] sm:$0xff] %vm1127_vm0, %v5356_v15  ;;  %v1507_v0 = vpop.f32.mrb[21].mxu1 }
 0x5f3   : > { %1558 = vst.msk [vmem:[#allocation2 + $0x20] sm:$0xff] %vm1127_vm0, %v1507_v0  ;;  %v5357_v56 = vpop.f32.mrb[22].mxu1 }
 0x5f4   : > { %1561 = vst.msk [vmem:[#allocation2 + $0x38] sm:$0xff] %vm1127_vm0, %v5357_v56  ;;  %v1510_v9 = vpop.f32.mrb[23].mxu1 }
 0x5f5   : > { %1559 = vst.msk [vmem:[#allocation2 + $0x28] sm:$0xff] %vm1127_vm0, %v1510_v9 }
 0x602   : > { %v5360_v45 = vpop.f32.mrb[24].mxu1 }
 0x603   : > { %1564 = vst.msk [vmem:[#allocation2 + $0x50] sm:$0xff] %vm1127_vm0, %v5360_v45  ;;  %v1523_v29 = vpop.f32.mrb[25].mxu1  ;;  %v9430_v45 = vld [vmem:[#allocation47_spill] sm:$0xff] }
 0x604   : > { %1562 = vst.msk [vmem:[#allocation2 + $0x40] sm:$0xff] %vm1127_vm0, %v1523_v29  ;;  %v5361_v53 = vpop.f32.mrb[26].mxu1 }
 0x605   : > { %1565 = vst.msk [vmem:[#allocation2 + $0x58] sm:$0xff] %vm1127_vm0, %v5361_v53  ;;  %v1526_v58 = vpop.f32.mrb[27].mxu1  ;;  %v9431_v53 = vld [vmem:[#allocation48_spill] sm:$0xff] }
 0x606   : > { %1563 = vst.msk [vmem:[#allocation2 + $0x48] sm:$0xff] %vm1127_vm0, %v1526_v58 }
 0x60a   : > { %v5364_v63 = vpop.f32.mrb[28].mxu1 }
 0x60b   : > { %1568 = vst.msk [vmem:[#allocation2 + $0x70] sm:$0xff] %vm1127_vm0, %v5364_v63  ;;  %v1539_v3 = vpop.f32.mrb[29].mxu1 }
 0x60c   : > { %1566 = vst.msk [vmem:[#allocation2 + $0x60] sm:$0xff] %vm1127_vm0, %v1539_v3  ;;  %v5365_v41 = vpop.f32.mrb[30].mxu1 }
 0x60d   : > { %1569 = vst.msk [vmem:[#allocation2 + $0x78] sm:$0xff] %vm1127_vm0, %v5365_v41  ;;  %v1542_v19 = vpop.f32.mrb[31].mxu1  ;;  %v9432_v41 = vld [vmem:[#allocation50_spill] sm:$0xff] }
 0x60e   : > { %1567 = vst.msk [vmem:[#allocation2 + $0x68] sm:$0xff] %vm1127_vm0, %v1542_v19 }
 0x612   : > { %v5384_v16 = vpop.f32.mrb[32].mxu1 }
 0x613   : > { %v1709_v18 = vadd.f32 %v5384_v16, %v7508_v32  ;;  %v1700_v49 = vpop.f32.mrb[33].mxu1 }
 0x614   : > { %v5385_v31 = vpop.f32.mrb[34].mxu1  ;;  %v1701_v57 = vadd.f32 %v1700_v49, %v7511_v37 }
 0x615   : > { %v7831_v17 = vmul.f32 0.17677669, %v1709_v18  ;;  %v1703_v42 = vpop.f32.mrb[35].mxu1  ;;  %v1712_v10 = vadd.f32 %v5385_v31, %v7514_v39  ;;  %v9433_v18 = vld [vmem:[#allocation49_spill] sm:$0xff] }
 0x616   : > { %v1704_v50 = vadd.f32 %v1703_v42, %v7519_v43  ;;  %v7838_v27 = vmul.f32 0.17677669, %v1701_v57 }
 0x617   : > { %1783 = vmax.xlane.f32.xlu0 %v7831_v17  ;;  %v7843_v24 = vmul.f32 0.17677669, %v1712_v10 }
 0x618   : > { %v7836_v4 = vmul.f32 0.17677669, %v1704_v50 }
 0x61a   : > { %1781 = vmax.xlane.f32.xlu1 %v7836_v4  ;;  %v5388_v30 = vpop.f32.mrb[36].mxu1 }
 0x61b   : > { %1779 = vmax.xlane.f32.xlu0 %v7838_v27  ;;  %v1716_v35 = vpop.f32.mrb[37].mxu1  ;;  %v1725_v28 = vadd.f32 %v5388_v30, %v7534_v5  ;;  %v9434_v30 = vld [vmem:[#allocation51_spill] sm:$0xff] }
 0x61c   : > { %v5389_v12 = vpop.f32.mrb[38].mxu1  ;;  %v1717_v6 = vadd.f32 %v1716_v35, %v9429_v38 }
 0x61d   : > { %v1728_v44 = vadd.f32 %v5389_v12, %v7541_v11  ;;  %v1719_v61 = vpop.f32.mrb[39].mxu1  ;;  %v7851_v40 = vmul.f32 0.17677669, %v1725_v28 }
 0x61e   : > { %v1720_v54 = vadd.f32 %v1719_v61, %v7551_v20  ;;  %v7858_v9 = vmul.f32 0.17677669, %v1717_v6  ;;  %v9436_v6 = vld [vmem:[#allocation39_spill] sm:$0xff] }
 0x61f   : > { %v7847_v55 = vmul.f32 0.17677669, %v1728_v44  ;;  %1785 = vmax.xlane.f32.xlu0 %v7843_v24  ;;  %v9435_v44 = vld [vmem:[#allocation52_spill] sm:$0xff] }
 0x620   : > { %v7855_v15 = vmul.f32 0.17677669, %v1720_v54 }
 0x621   : > { %1793 = vmax.xlane.f32.xlu1 %v7847_v55 }
 0x622   : > { %v5392_v46 = vpop.f32.mrb[40].mxu1 }
 0x623   : > { %1791 = vmax.xlane.f32.xlu0 %v7851_v40  ;;  %v1732_v0 = vpop.f32.mrb[41].mxu1  ;;  %v1741_v29 = vadd.f32 %v5392_v46, %v9430_v45  ;;  %v9437_v46 = vld [vmem:[#allocation38_spill] sm:$0xff] }
 0x624   : > { %v5393_v56 = vpop.f32.mrb[42].mxu1  ;;  %v1733_v49 = vadd.f32 %v1732_v0, %v9433_v18  ;;  %v9438_v0 = vld [vmem:[#allocation53_spill] sm:$0xff] }
 0x625   : > { %v1744_v58 = vadd.f32 %v5393_v56, %v9431_v53  ;;  %1789 = vmax.xlane.f32.xlu1 %v7855_v15  ;;  %v1735_v63 = vpop.f32.mrb[43].mxu1  ;;  %v7867_v16 = vmul.f32 0.17677669, %v1741_v29 }
 0x626   : > { %v1736_v19 = vadd.f32 %v1735_v63, %v9432_v41  ;;  %v7874_v10 = vmul.f32 0.17677669, %v1733_v49  ;;  %v7898_v49 = vpop.permute.xlu1 %2176 }
 0x627   : > { %v7863_v3 = vmul.f32 0.17677669, %v1744_v58  ;;  %1787 = vmax.xlane.f32.xlu0 %v7858_v9  ;;  %v9439_v58 = vld [vmem:[#allocation54_spill] sm:$0xff] }
 0x628   : > { %v7871_v57 = vmul.f32 0.17677669, %v1736_v19 }
 0x629   : > { %1801 = vmax.xlane.f32.xlu1 %v7863_v3 }
 0x62a   : > { %v5396_v31 = vpop.f32.mrb[44].mxu1 }
 0x62b   : > { %1799 = vmax.xlane.f32.xlu0 %v7867_v16  ;;  %v1748_v42 = vpop.f32.mrb[45].mxu1  ;;  %v1757_v35 = vadd.f32 %v5396_v31, %v9434_v30 }
 0x62c   : > { %v5397_v50 = vpop.f32.mrb[46].mxu1  ;;  %v1749_v61 = vadd.f32 %v1748_v42, %v9435_v44 }
 0x62d   : > { %1797 = vmax.xlane.f32.xlu1 %v7871_v57  ;;  %v1751_v12 = vpop.f32.mrb[47].mxu1  ;;  %v7879_v28 = vmul.f32 0.17677669, %v1757_v35  ;;  %v1760_v56 = vadd.f32 %v5397_v50, %v9438_v0 }
 0x62e   : > { %v7883_v54 = vmul.f32 0.17677669, %v1749_v61  ;;  %v1752_v63 = vadd.f32 %v1751_v12, %v9439_v58 }
 0x62f   : > { %1795 = vmax.xlane.f32.xlu0 %v7874_v10  ;;  %v7891_v29 = vmul.f32 0.17677669, %v1760_v56 }
 0x630   : > { %v7895_v19 = vmul.f32 0.17677669, %v1752_v63 }
 0x633   : > { %1807 = vmax.xlane.f32.xlu0 %v7879_v28 }
 0x637   : > { %1803 = vmax.xlane.f32.xlu0 %v7883_v54 }
 0x63e   : > { %2180 = vrot.lane.b32.xlu1 %v9436_v6, %s6779_s20 }
 0x64d   : > { %2178 = vrot.lane.b32.xlu0 %v9437_v46, %s6779_s20 }
 0x662   : > { %1809 = vmax.xlane.f32.xlu1 %v7891_v29 }
 0x666   : > { %1805 = vmax.xlane.f32.xlu1 %v7895_v19 }
 0x6a4   : > { %v1784_v31 = vpop.xlane.xlu0 %1783 }
 0x6a5   : > { %v1813_v42 = vsub.f32 %v7831_v17, %v1784_v31 }
 0x6a7   : > { %v1831_v35 = vmul.f32 1.442695, %v1813_v42  ;;  %v1782_v61 = vpop.xlane.xlu1 %1781 }
 0x6a8   : > { %v1812_v46 = vsub.f32 %v7836_v4, %v1782_v61  ;;  %v1780_v50 = vpop.xlane.xlu0 %1779 }
 0x6a9   : > { %5952 = vpow2.f32 %v1831_v35  ;;  %v1811_v56 = vsub.f32 %v7838_v27, %v1780_v50 }
 0x6aa   : > { %v1829_v12 = vmul.f32 1.442695, %v1812_v46 }
 0x6ab   : > { %v1827_v58 = vmul.f32 1.442695, %v1811_v56 }
 0x6ac   : > { %5954 = vpow2.f32 %v1829_v12  ;;  %v1786_v63 = vpop.xlane.xlu0 %1785 }
 0x6ad   : > { %5956 = vpow2.f32 %v1827_v58  ;;  %v1814_v0 = vsub.f32 %v7843_v24, %v1786_v63  ;;  %v9440_v24 = vld [vmem:[#allocation41_spill] sm:$0xff] }
 0x6ae   : > { %v1794_v58 = vpop.xlane.xlu1 %1793 }
 0x6af   : > { %v1833_v6 = vmul.f32 1.442695, %v1814_v0  ;;  %v1818_v18 = vsub.f32 %v7847_v55, %v1794_v58 }
 0x6b0   : > { %v1792_v46 = vpop.xlane.xlu0 %1791 }
 0x6b1   : > { %5958 = vpow2.f32 %v1833_v6  ;;  %v9441_v6 = vld [vmem:[#allocation44_spill] sm:$0xff]  ;;  %v1817_v42 = vsub.f32 %v7851_v40, %v1792_v46  ;;  %v1841_v53 = vmul.f32 1.442695, %v1818_v18 }
 0x6b2   : > { %v1790_v35 = vpop.xlane.xlu1 %1789 }
 0x6b3   : > { %v7904_v44 = vpop.eup %5952  ;;  %v1839_v50 = vmul.f32 1.442695, %v1817_v42  ;;  %v1816_v12 = vsub.f32 %v7855_v15, %v1790_v35 }
 0x6b4   : > { %1863 = vadd.xlane.f32.xlu1 %v7904_v44  ;;  %v1788_v0 = vpop.xlane.xlu0 %1787 }
 0x6b5   : > { %v1815_v56 = vsub.f32 %v7858_v9, %v1788_v0  ;;  %5960 = vpow2.f32 %v1839_v50  ;;  %v1837_v41 = vmul.f32 1.442695, %v1816_v12 }
 0x6b6   : > { %v7907_v17 = vpop.eup %5954  ;;  %v1802_v63 = vpop.xlane.xlu1 %1801 }
 0x6b7   : > { %v7909_v4 = vpop.eup %5956  ;;  %1861 = vadd.xlane.f32.xlu0 %v7907_v17  ;;  %v1822_v55 = vsub.f32 %v7863_v3, %v1802_v63 }
 0x6b8   : > { %1859 = vadd.xlane.f32.xlu1 %v7909_v4  ;;  %v1800_v31 = vpop.xlane.xlu0 %1799 }
 0x6b9   : > { %v1849_v18 = vmul.f32 1.442695, %v1822_v55 }
 0x6ba   : > { %v1798_v45 = vpop.xlane.xlu1 %1797 }
 0x6bb   : > { %v7913_v27 = vpop.eup %5958 }
 0x6bc   : > { %1865 = vadd.xlane.f32.xlu1 %v7913_v27  ;;  %v1796_v61 = vpop.xlane.xlu0 %1795 }
 0x6bd   : > { %v1819_v9 = vsub.f32 %v7874_v10, %v1796_v61  ;;  %v1820_v10 = vsub.f32 %v7871_v57, %v1798_v45 }
 0x6bf   : > { %v1843_v58 = vmul.f32 1.442695, %v1819_v9  ;;  %v7929_v35 = vpop.eup %5960 }
 0x6c0   : > { %v1808_v30 = vpop.xlane.xlu0 %1807 }
 0x6c1   : > { %v1825_v40 = vsub.f32 %v7879_v28, %v1808_v30 }
 0x6c3   : > { %v1855_v15 = vmul.f32 1.442695, %v1825_v40 }
 0x6c4   : > { %v1804_v0 = vpop.xlane.xlu0 %1803 }
 0x6c5   : > { %v1823_v42 = vsub.f32 %v7883_v54, %v1804_v0  ;;  %v1845_v54 = vmul.f32 1.442695, %v1820_v10 }
 0x6cd   : > { %2182 = vrot.lane.b32.xlu0 %v9440_v24, %s6779_s20  ;;  %2184 = vrot.lane.b32.xlu1 %v9441_v6, %s6779_s20  ;;  %v1835_v24 = vmul.f32 1.442695, %v1815_v56  ;;  %v1821_v6 = vsub.f32 %v7867_v16, %v1800_v31  ;;  %v7931_v16 = vpop.permute.xlu1 %2180 }
 0x6cf   : > { %5962 = vpow2.f32 %v1835_v24  ;;  %v1847_v46 = vmul.f32 1.442695, %v1821_v6 }
 0x6d0   : > { %5964 = vpow2.f32 %v1837_v41  ;;  %v1851_v41 = vmul.f32 1.442695, %v1823_v42 }
 0x6d1   : > { %5966 = vpow2.f32 %v1841_v53 }
 0x6d2   : > { %5968 = vpow2.f32 %v1847_v46  ;;  %v2179_v46 = vpop.permute.xlu0 %2178 }
 0x6d3   : > { %5970 = vpow2.f32 %v1855_v15 }
 0x6d4   : > { %5972 = vpow2.f32 %v1843_v58 }
 0x6d5   : > { %5974 = vpow2.f32 %v1851_v41 }
 0x6d6   : > { %5976 = vpow2.f32 %v1849_v18 }
 0x6d9   : > { %v7935_v53 = vpop.eup %5962 }
 0x6da   : > { %v7937_v28 = vpop.eup %5964 }
 0x6db   : > { %v7942_v6 = vpop.eup %5966 }
 0x6dc   : > { %v7944_v45 = vpop.eup %5968 }
 0x6dd   : > { %v7949_v61 = vpop.eup %5970 }
 0x6de   : > { %v7951_v50 = vpop.eup %5972 }
 0x6df   : > { %v7955_v56 = vpop.eup %5974 }
 0x6e0   : > { %v7957_v12 = vpop.eup %5976 }
 0x6ec   : > { %1871 = vadd.xlane.f32.xlu0 %v7929_v35 }
 0x6ef   : > { %v1810_v30 = vpop.xlane.xlu1 %1809 }
 0x6f0   : > { %v1826_v3 = vsub.f32 %v7891_v29, %v1810_v30  ;;  %1867 = vadd.xlane.f32.xlu0 %v7935_v53 }
 0x6f1   : > { %1869 = vadd.xlane.f32.xlu1 %v7937_v28 }
 0x6f2   : > { %v1857_v24 = vmul.f32 1.442695, %v1826_v3 }
 0x6f3   : > { %v1806_v31 = vpop.xlane.xlu1 %1805 }
 0x6f4   : > { %5978 = vpow2.f32 %v1857_v24  ;;  %v1824_v57 = vsub.f32 %v7895_v19, %v1806_v31  ;;  %1873 = vadd.xlane.f32.xlu0 %v7942_v6 }
 0x6f5   : > { %1879 = vadd.xlane.f32.xlu1 %v7944_v45  ;;  %5980 = vpow2.f32 %v1845_v54 }
 0x6f6   : > { %v1853_v29 = vmul.f32 1.442695, %v1824_v57 }
 0x6f8   : > { %1887 = vadd.xlane.f32.xlu0 %v7949_v61  ;;  %5982 = vpow2.f32 %v1853_v29 }
 0x6f9   : > { %1875 = vadd.xlane.f32.xlu1 %v7951_v50 }
 0x6fc   : > { %1883 = vadd.xlane.f32.xlu0 %v7955_v56 }
 0x6fd   : > { %1881 = vadd.xlane.f32.xlu1 %v7957_v12 }
 0x6fe   : > { %v7961_v19 = vpop.eup %5978 }
 0x6ff   : > { %v7963_v63 = vpop.eup %5980 }
 0x700   : > { %1889 = vadd.xlane.f32.xlu0 %v7961_v19 }
 0x701   : > { %1877 = vadd.xlane.f32.xlu1 %v7963_v63 }
 0x702   : > { %v7967_v40 = vpop.eup %5982 }
 0x705   : > { %1885 = vadd.xlane.f32.xlu1 %v7967_v40 }
 0x716   : > { %2188 = vrot.lane.b32.xlu1 %v7479_v26, %s6779_s20  ;;  %2186 = vrot.lane.b32.xlu0 %v7467_v8, %s6779_s20 }
 0x71a   : > { %2160 = vrot.lane.b32.xlu1 %v7353_v13, %s6779_s20  ;;  %2158 = vrot.lane.b32.xlu0 %v7336_v1, %s6779_s20 }
 0x71e   : > { %2164 = vrot.lane.b32.xlu1 %v7396_v59, %s6779_s20  ;;  %2162 = vrot.lane.b32.xlu0 %v7373_v33, %s6779_s20 }
 0x722   : > { %2168 = vrot.lane.b32.xlu1 %v7444_v47, %s6779_s20  ;;  %2166 = vrot.lane.b32.xlu0 %v7420_v22, %s6779_s20 }
 0x726   : > { %2172 = vrot.lane.b32.xlu1 %v7477_v21, %s6779_s20  ;;  %2170 = vrot.lane.b32.xlu0 %v7464_v7, %s6779_s20 }
 0x72a   : > { %2522 = vrot.lane.b32.xlu1 %v7375_v34, %s6779_s20  ;;  %2520 = vrot.lane.b32.xlu0 %v7379_v36, %s6779_s20 }
 0x72e   : > { %2526 = vrot.lane.b32.xlu1 %v7398_v60, %s6779_s20  ;;  %2524 = vrot.lane.b32.xlu0 %v7403_v62, %s6779_s20 }
 0x732   : > { %2530 = vrot.lane.b32.xlu1 %v7422_v23, %s6779_s20  ;;  %2528 = vrot.lane.b32.xlu0 %v7427_v25, %s6779_s20 }
 0x736   : > { %2534 = vrot.lane.b32.xlu1 %v7446_v48, %s6779_s20  ;;  %2532 = vrot.lane.b32.xlu0 %v7451_v52, %s6779_s20 }
 0x73a   : > { %2740 = vrot.lane.b32.xlu1 %v7355_v14, %s6780_s30  ;;  %2738 = vrot.lane.b32.xlu0 %v7338_v2, %s6780_s30 }
 0x741   : > { %v1864_v9 = vpop.xlane.xlu1 %1863 }
 0x742   : > { %5984 = vrcp.f32 %v1864_v9 }
 0x744   : > { %v1862_v0 = vpop.xlane.xlu0 %1861 }
 0x745   : > { %5986 = vrcp.f32 %v1862_v0  ;;  %v1860_v15 = vpop.xlane.xlu1 %1859 }
 0x746   : > { %5988 = vrcp.f32 %v1860_v15 }
 0x749   : > { %v1866_v42 = vpop.xlane.xlu1 %1865 }
 0x74a   : > { %5990 = vrcp.f32 %v1866_v42 }
 0x74c   : > { %v5985_v55 = vpop.eup %5984 }
 0x74d   : > { %v1896_v58 = vmul.f32 %v5985_v55, %v7904_v44  ;;  %v2215_v44 = vsel %vm1127_vm0, %v7809_v51, 0  ;;  %v2183_v51 = vpop.permute.xlu0 %2182 }
 0x74e   : > { %v2227_v24 = vsel %vm1127_vm0, %v2183_v51, 0 }
 0x74f   : > { %v5987_v41 = vpop.eup %5986  ;;  %4928 = vst [vmem:[%s7749_s24 + $0x90] sm:$0xff] %v1896_v58 }
 0x750   : > { %v5989_v14 = vpop.eup %5988  ;;  %v1894_v2 = vmul.f32 %v5987_v41, %v7907_v17  ;;  %v2218_v17 = vsel %vm1127_vm0, %v7898_v49, 0 }
 0x751   : > { %v1892_v18 = vmul.f32 %v5989_v14, %v7909_v4  ;;  %v2221_v4 = vsel %vm1127_vm0, %v2179_v46, 0 }
 0x752   : > { %4927 = vst [vmem:[%s7749_s24 + $0x88] sm:$0xff] %v1894_v2 }
 0x753   : > { %4926 = vst [vmem:[%s7749_s24 + $0x80] sm:$0xff] %v1892_v18  ;;  %v1940_v10 = vpack.c.bf16 %v1894_v2, %v1892_v18 }
 0x754   : > { %v5991_v30 = vpop.eup %5990 }
 0x755   : > { %v1898_v3 = vmul.f32 %v5991_v30, %v7913_v27  ;;  %5414 = vmatprep.mubr.bf16.mxu0 %v1940_v10  ;;  %v2224_v27 = vsel %vm1127_vm0, %v7931_v16, 0 }
 0x757   : > { %4929 = vst [vmem:[%s7749_s24 + $0x98] sm:$0xff] %v1898_v3  ;;  %v1941_v54 = vpack.c.bf16 %v1898_v3, %v1896_v58 }
 0x759   : > { %5415 = vmatmul.mubr.bf16.vlgmr.msra.gmra.mrb[48].mxu0 %v1941_v54 }
 0x75a   : > { %5431 = vmatpush3.bf16.xpose.msra.mxu0 %v2215_v44 }
 0x75b   : > { %5623 = vmatprep.subr.msk.bf16.mxu0 %vm1127_vm0, %v7898_v49  ;;  %v2185_v49 = vpop.permute.xlu1 %2184 }
 0x762   : > { %5433 = vmatpush3.bf16.xpose.msra.mxu0 %v2218_v17 }
 0x763   : > { %5624 = vmatprep.subr.msk.bf16.mxu0 %vm1127_vm0, %v2179_v46  ;;  %v2230_v46 = vsel %vm1127_vm0, %v2185_v49, 0 }
 0x76a   : > { %5435 = vmatpush3.bf16.xpose.msra.mxu0 %v2221_v4 }
 0x76b   : > { %5625 = vmatprep.subr.msk.bf16.mxu0 %vm1127_vm0, %v7931_v16 }
 0x772   : > { %5437 = vmatpush3.bf16.xpose.msra.mxu0 %v2224_v27 }
 0x773   : > { %5626 = vmatprep.subr.msk.bf16.mxu0 %vm1127_vm0, %v2183_v51 }
 0x779   : > { %v1872_v31 = vpop.xlane.xlu0 %1871 }
 0x77a   : > { %5439 = vmatpush3.bf16.xpose.msra.mxu0 %v2227_v24  ;;  %5992 = vrcp.f32 %v1872_v31 }
 0x77b   : > { %5627 = vmatprep.subr.msk.bf16.mxu0 %vm1127_vm0, %v2185_v49 }
 0x77d   : > { %v1868_v57 = vpop.xlane.xlu0 %1867 }
 0x77e   : > { %5994 = vrcp.f32 %v1868_v57  ;;  %v1870_v29 = vpop.xlane.xlu1 %1869 }
 0x77f   : > { %5996 = vrcp.f32 %v1870_v29 }
 0x781   : > { %v1874_v16 = vpop.xlane.xlu0 %1873 }
 0x782   : > { %5441 = vmatpush3.bf16.xpose.msra.mxu0 %v2230_v46  ;;  %5998 = vrcp.f32 %v1874_v16  ;;  %v1880_v9 = vpop.xlane.xlu1 %1879 }
 0x783   : > { %6000 = vrcp.f32 %v1880_v9 }
 0x784   : > { %v5993_v0 = vpop.eup %5992 }
 0x785   : > { %v1888_v15 = vpop.xlane.xlu0 %1887  ;;  %v1904_v42 = vmul.f32 %v5993_v0, %v7929_v35 }
 0x786   : > { %6002 = vrcp.f32 %v1888_v15  ;;  %v1876_v55 = vpop.xlane.xlu1 %1875 }
 0x787   : > { %6004 = vrcp.f32 %v1876_v55  ;;  %4932 = vst [vmem:[%s7749_s24 + $0xb0] sm:$0xff] %v1904_v42 }
 0x788   : > { %v5995_v58 = vpop.eup %5994 }
 0x789   : > { %v5997_v41 = vpop.eup %5996  ;;  %v1884_v14 = vpop.xlane.xlu0 %1883  ;;  %v1900_v2 = vmul.f32 %v5995_v58, %v7935_v53 }
 0x78a   : > { %6006 = vrcp.f32 %v1884_v14  ;;  %v1882_v18 = vpop.xlane.xlu1 %1881  ;;  %v1902_v10 = vmul.f32 %v5997_v41, %v7937_v28 }
 0x78b   : > { %6008 = vrcp.f32 %v1882_v18  ;;  %4930 = vst [vmem:[%s7749_s24 + $0xa0] sm:$0xff] %v1900_v2 }
 0x78c   : > { %v5999_v30 = vpop.eup %5998  ;;  %4931 = vst [vmem:[%s7749_s24 + $0xa8] sm:$0xff] %v1902_v10  ;;  %v1942_v35 = vpack.c.bf16 %v1902_v10, %v1900_v2 }
 0x78d   : > { %v6001_v3 = vpop.eup %6000  ;;  %v1890_v54 = vpop.xlane.xlu0 %1889  ;;  %v1906_v44 = vmul.f32 %v5999_v30, %v7942_v6 }
 0x78e   : > { %6010 = vrcp.f32 %v1890_v54  ;;  %v1878_v17 = vpop.xlane.xlu1 %1877  ;;  %5418 = vmatprep.mubr.bf16.mxu0 %v1942_v35  ;;  %v1912_v53 = vmul.f32 %v6001_v3, %v7944_v45 }
 0x78f   : > { %6012 = vrcp.f32 %v1878_v17  ;;  %4933 = vst [vmem:[%s7749_s24 + $0xb8] sm:$0xff] %v1906_v44  ;;  %v1943_v28 = vpack.c.bf16 %v1906_v44, %v1904_v42 }
 0x790   : > { %v6003_v4 = vpop.eup %6002  ;;  %4936 = vst [vmem:[%s7749_s24 + $0xd0] sm:$0xff] %v1912_v53 }
 0x791   : > { %v6005_v27 = vpop.eup %6004  ;;  %5419 = vmatmul.mubr.bf16.gmra.mrb[52].mxu0 %v1943_v28  ;;  %v2187_v51 = vpop.permute.xlu0 %2186  ;;  %v1920_v24 = vmul.f32 %v6003_v4, %v7949_v61 }
 0x792   : > { %v1886_v31 = vpop.xlane.xlu1 %1885  ;;  %5628 = vmatprep.subr.msk.bf16.mxu0 %vm1127_vm0, %v2187_v51  ;;  %v2233_v6 = vsel %vm1127_vm0, %v2187_v51, 0  ;;  %v1908_v45 = vmul.f32 %v6005_v27, %v7951_v50 }
 0x793   : > { %6014 = vrcp.f32 %v1886_v31  ;;  %5443 = vmatpush3.bf16.xpose.msra.mxu0 %v2233_v6  ;;  %4940 = vst [vmem:[%s7749_s24 + $0xf0] sm:$0xff] %v1920_v24 }
 0x794   : > { %v6007_v49 = vpop.eup %6006  ;;  %4934 = vst [vmem:[%s7749_s24 + $0xc0] sm:$0xff] %v1908_v45 }
 0x795   : > { %v6009_v57 = vpop.eup %6008  ;;  %v2159_v29 = vpop.permute.xlu0 %2158  ;;  %v1916_v61 = vmul.f32 %v6007_v49, %v7955_v56 }
 0x796   : > { %v2189_v46 = vpop.permute.xlu1 %2188  ;;  %v1914_v16 = vmul.f32 %v6009_v57, %v7957_v12 }
 0x797   : > { %5629 = vmatprep.subr.msk.bf16.mxu0 %vm1127_vm0, %v2189_v46  ;;  %4938 = vst [vmem:[%s7749_s24 + $0xe0] sm:$0xff] %v1916_v61  ;;  %v2236_v55 = vsel %vm1127_vm0, %v2189_v46, 0 }
 0x798   : > { %v6011_v9 = vpop.eup %6010  ;;  %4937 = vst [vmem:[%s7749_s24 + $0xd8] sm:$0xff] %v1914_v16  ;;  %v1945_v14 = vpack.c.bf16 %v1914_v16, %v1912_v53 }
 0x799   : > { %v6013_v50 = vpop.eup %6012  ;;  %v2163_v0 = vpop.permute.xlu0 %2162  ;;  %v1922_v15 = vmul.f32 %v6011_v9, %v7961_v19 }
 0x79a   : > { %v2161_v42 = vpop.permute.xlu1 %2160  ;;  %v1910_v58 = vmul.f32 %v6013_v50, %v7963_v63 }
 0x79b   : > { %5445 = vmatpush3.bf16.xpose.msra.mxu0 %v2236_v55  ;;  %4941 = vst [vmem:[%s7749_s24 + $0xf8] sm:$0xff] %v1922_v15  ;;  %v1947_v3 = vpack.c.bf16 %v1922_v15, %v1920_v24 }
 0x79c   : > { %4935 = vst [vmem:[%s7749_s24 + $0xc8] sm:$0xff] %v1910_v58  ;;  %v1944_v56 = vpack.c.bf16 %v1910_v58, %v1908_v45 }
 0x79d   : > { %v6015_v12 = vpop.eup %6014  ;;  %v2167_v41 = vpop.permute.xlu0 %2166 }
 0x79e   : > { %v2165_v2 = vpop.permute.xlu1 %2164  ;;  %5422 = vmatprep.mubr.bf16.mxu0 %v1944_v56  ;;  %v1918_v18 = vmul.f32 %v6015_v12, %v7967_v40 }
 0x79f   : > { %5423 = vmatmul.mubr.bf16.gmra.mrb[56].mxu0 %v1945_v14 }
 0x7a0   : > { %4939 = vst [vmem:[%s7749_s24 + $0xe8] sm:$0xff] %v1918_v18  ;;  %v1946_v10 = vpack.c.bf16 %v1918_v18, %v1916_v61 }
 0x7a1   : > { %v2171_v19 = vpop.permute.xlu0 %2170 }
 0x7a2   : > { %v2169_v30 = vpop.permute.xlu1 %2168  ;;  %5426 = vmatprep.mubr.bf16.mxu0 %v1946_v10 }
 0x7a5   : > { %v2521_v35 = vpop.permute.xlu0 %2520 }
 0x7a6   : > { %v2173_v63 = vpop.permute.xlu1 %2172  ;;  %5462 = vmatprep.subr.bf16.mxu1 %v2521_v35 }
 0x7a7   : > { %5427 = vmatmul.mubr.bf16.gmra.mrb[60].mxu0 %v1947_v3  ;;  %5463 = vmatpush3.bf16.msra.mxu1 %v2521_v35 }
 0x7a8   : > { %5446 = vmatprep.mubr.msk.bf16.mxu0 %vm1127_vm0, %v2159_v29 }
 0x7a9   : > { %v2525_v44 = vpop.permute.xlu0 %2524 }
 0x7aa   : > { %v2523_v54 = vpop.permute.xlu1 %2522 }
 0x7ab   : > { %5464 = vmatprep.subr.bf16.mxu1 %v2523_v54 }
 0x7ac   : > { %5465 = vmatpush3.bf16.msra.mxu1 %v2523_v54 }
 0x7ad   : > { %5466 = vmatprep.subr.bf16.mxu1 %v2525_v44  ;;  %v2529_v17 = vpop.permute.xlu0 %2528 }
 0x7ae   : > { %v2527_v40 = vpop.permute.xlu1 %2526 }
 0x7af   : > { %5447 = vmatmul.mubr.msk.bf16.vlgmr.msra.gmra.mrb[64].mxu0 %vm1127_vm0, %v2161_v42 }
 0x7b0   : > { %5450 = vmatprep.mubr.msk.bf16.mxu0 %vm1127_vm0, %v2163_v0  ;;  %5467 = vmatpush3.bf16.msra.mxu1 %v2525_v44 }
 0x7b1   : > { %5468 = vmatprep.subr.bf16.mxu1 %v2527_v40  ;;  %v2533_v28 = vpop.permute.xlu0 %2532 }
 0x7b2   : > { %v2531_v53 = vpop.permute.xlu1 %2530 }
 0x7b4   : > { %5469 = vmatpush3.bf16.msra.mxu1 %v2527_v40 }
 0x7b5   : > { %5470 = vmatprep.subr.bf16.mxu1 %v2529_v17  ;;  %v8069_v27 = vpop.permute.xlu0 %2738 }
 0x7b6   : > { %v2535_v4 = vpop.permute.xlu1 %2534 }
 0x7b7   : > { %5451 = vmatmul.mubr.msk.bf16.gmra.mrb[68].mxu0 %vm1127_vm0, %v2165_v2 }
 0x7b8   : > { %5454 = vmatprep.mubr.msk.bf16.mxu0 %vm1127_vm0, %v2167_v41  ;;  %5471 = vmatpush3.bf16.msra.mxu1 %v2529_v17 }
 0x7b9   : > { %5472 = vmatprep.subr.bf16.mxu1 %v2531_v53 }
 0x7bc   : > { %5473 = vmatpush3.bf16.msra.mxu1 %v2531_v53 }
 0x7bd   : > { %5474 = vmatprep.subr.bf16.mxu1 %v2533_v28 }
 0x7bf   : > { %5455 = vmatmul.mubr.msk.bf16.gmra.mrb[72].mxu0 %vm1127_vm0, %v2169_v30 }
 0x7c0   : > { %5458 = vmatprep.mubr.msk.bf16.mxu0 %vm1127_vm0, %v2171_v19  ;;  %5475 = vmatpush3.bf16.msra.mxu1 %v2533_v28 }
 0x7c1   : > { %5476 = vmatprep.subr.bf16.mxu1 %v2535_v4 }
 0x7c4   : > { %5477 = vmatpush3.bf16.msra.mxu1 %v2535_v4 }
 0x7c5   : > { %5630 = vmatprep.subr.msk.bf16.mxu1 %vm1127_vm0, %v8069_v27 }
 0x7c7   : > { %5459 = vmatmul.mubr.msk.bf16.gmra.mrb[76].mxu0 %vm1127_vm0, %v2173_v63 }
 0x82c   : > { %v8074_v51 = vpop.f32.mrb[48].mxu0 }
 0x82d   : > { %9442 = vst [vmem:[#allocation46_spill] sm:$0xff] %v8074_v51  ;;  %v8076_v24 = vpop.f32.mrb[49].mxu0 }
 0x82e   : > { %9443 = vst [vmem:[#allocation55_spill] sm:$0xff] %v8076_v24  ;;  %v8078_v31 = vpop.f32.mrb[50].mxu0 }
 0x82f   : > { %9444 = vst [vmem:[#allocation56_spill] sm:$0xff] %v8078_v31  ;;  %v8080_v6 = vpop.f32.mrb[51].mxu0 }
 0x830   : > { %9445 = vst [vmem:[#allocation57_spill] sm:$0xff] %v8080_v6 }
 0x864   : > { %v8082_v45 = vpop.f32.mrb[52].mxu0 }
 0x865   : > { %9446 = vst [vmem:[#allocation58_spill] sm:$0xff] %v8082_v45  ;;  %v8084_v49 = vpop.f32.mrb[53].mxu0 }
 0x866   : > { %9447 = vst [vmem:[#allocation59_spill] sm:$0xff] %v8084_v49  ;;  %v8086_v57 = vpop.f32.mrb[54].mxu0 }
 0x867   : > { %9448 = vst [vmem:[#allocation60_spill] sm:$0xff] %v8086_v57  ;;  %v8088_v29 = vpop.f32.mrb[55].mxu0 }
 0x868   : > { %9449 = vst [vmem:[#allocation61_spill] sm:$0xff] %v8088_v29 }
 0x872   : > { %v8090_v61 = vpop.f32.mrb[56].mxu0 }
 0x873   : > { %9450 = vst [vmem:[#allocation62_spill] sm:$0xff] %v8090_v61  ;;  %v8092_v46 = vpop.f32.mrb[57].mxu0 }
 0x874   : > { %9451 = vst [vmem:[#allocation63_spill] sm:$0xff] %v8092_v46  ;;  %v8094_v16 = vpop.f32.mrb[58].mxu0 }
 0x875   : > { %9452 = vst [vmem:[#allocation64_spill] sm:$0xff] %v8094_v16  ;;  %v8096_v9 = vpop.f32.mrb[59].mxu0 }
 0x876   : > { %9453 = vst [vmem:[#allocation65_spill] sm:$0xff] %v8096_v9  ;;  %v9466_v9 = vld [vmem:[#allocation53_spill] sm:$0xff] }
 0x87a   : > { %v8098_v50 = vpop.f32.mrb[60].mxu0 }
 0x87b   : > { %9454 = vst [vmem:[#allocation66_spill] sm:$0xff] %v8098_v50  ;;  %v8100_v0 = vpop.f32.mrb[61].mxu0 }
 0x87c   : > { %9455 = vst [vmem:[#allocation67_spill] sm:$0xff] %v8100_v0  ;;  %v8102_v15 = vpop.f32.mrb[62].mxu0 }
 0x87d   : > { %9456 = vst [vmem:[#allocation68_spill] sm:$0xff] %v8102_v15  ;;  %v8104_v42 = vpop.f32.mrb[63].mxu0  ;;  %v9461_v15 = vld [vmem:[#allocation49_spill] sm:$0xff] }
 0x87e   : > { %9457 = vst [vmem:[#allocation69_spill] sm:$0xff] %v8104_v42 }
 0x882   : > { %v5448_v55 = vpop.f32.mrb[64].mxu0 }
 0x883   : > { %v2281_v58 = vadd.f32 %v5448_v55, %v7508_v32  ;;  %v2272_v56 = vpop.f32.mrb[65].mxu0 }
 0x884   : > { %v5449_v12 = vpop.f32.mrb[66].mxu0  ;;  %v2273_v14 = vadd.f32 %v2272_v56, %v7511_v37 }
 0x885   : > { %v8107_v41 = vmul.f32 0.17677669, %v2281_v58  ;;  %v2275_v2 = vpop.f32.mrb[67].mxu0  ;;  %v2284_v30 = vadd.f32 %v5449_v12, %v7514_v39 }
 0x886   : > { %v2276_v18 = vadd.f32 %v2275_v2, %v7519_v43  ;;  %v8114_v19 = vmul.f32 0.17677669, %v2273_v14 }
 0x887   : > { %2355 = vmax.xlane.f32.xlu0 %v8107_v41  ;;  %v8119_v54 = vmul.f32 0.17677669, %v2284_v30 }
 0x888   : > { %v8112_v10 = vmul.f32 0.17677669, %v2276_v18  ;;  %v9458_v18 = vld [vmem:[#allocation47_spill] sm:$0xff] }
 0x88a   : > { %2353 = vmax.xlane.f32.xlu1 %v8112_v10  ;;  %v5452_v35 = vpop.f32.mrb[68].mxu0 }
 0x88b   : > { %2351 = vmax.xlane.f32.xlu0 %v8114_v19  ;;  %v2288_v3 = vpop.f32.mrb[69].mxu0  ;;  %v2297_v44 = vadd.f32 %v5452_v35, %v7534_v5  ;;  %v9459_v35 = vld [vmem:[#allocation48_spill] sm:$0xff] }
 0x88c   : > { %v5453_v63 = vpop.f32.mrb[70].mxu0  ;;  %v2289_v55 = vadd.f32 %v2288_v3, %v9429_v38  ;;  %v9460_v3 = vld [vmem:[#allocation50_spill] sm:$0xff] }
 0x88d   : > { %v2300_v40 = vadd.f32 %v5453_v63, %v7541_v11  ;;  %v2291_v17 = vpop.f32.mrb[71].mxu0  ;;  %v8127_v4 = vmul.f32 0.17677669, %v2297_v44 }
 0x88e   : > { %v2292_v28 = vadd.f32 %v2291_v17, %v7551_v20  ;;  %v8134_v2 = vmul.f32 0.17677669, %v2289_v55 }
 0x88f   : > { %v8123_v53 = vmul.f32 0.17677669, %v2300_v40  ;;  %2357 = vmax.xlane.f32.xlu0 %v8119_v54 }
 0x890   : > { %v8131_v56 = vmul.f32 0.17677669, %v2292_v28 }
 0x891   : > { %2365 = vmax.xlane.f32.xlu1 %v8123_v53 }
 0x892   : > { %v5456_v58 = vpop.f32.mrb[72].mxu0 }
 0x893   : > { %2363 = vmax.xlane.f32.xlu0 %v8127_v4  ;;  %v2304_v12 = vpop.f32.mrb[73].mxu0  ;;  %v2313_v30 = vadd.f32 %v5456_v58, %v9458_v18 }
 0x894   : > { %v5457_v14 = vpop.f32.mrb[74].mxu0  ;;  %v2305_v50 = vadd.f32 %v2304_v12, %v9461_v15  ;;  %v9463_v12 = vld [vmem:[#allocation52_spill] sm:$0xff] }
 0x895   : > { %v2316_v63 = vadd.f32 %v5457_v14, %v9459_v35  ;;  %2361 = vmax.xlane.f32.xlu1 %v8131_v56  ;;  %v2307_v44 = vpop.f32.mrb[75].mxu0  ;;  %v8143_v28 = vmul.f32 0.17677669, %v2313_v30 }
 0x896   : > { %v2308_v17 = vadd.f32 %v2307_v44, %v9460_v3  ;;  %v8150_v0 = vmul.f32 0.17677669, %v2305_v50  ;;  %v9464_v50 = vld [vmem:[#allocation39_spill] sm:$0xff] }
 0x897   : > { %v8139_v40 = vmul.f32 0.17677669, %v2316_v63  ;;  %2359 = vmax.xlane.f32.xlu0 %v8134_v2  ;;  %v9462_v63 = vld [vmem:[#allocation51_spill] sm:$0xff] }
 0x898   : > { %v8147_v42 = vmul.f32 0.17677669, %v2308_v17 }
 0x899   : > { %2373 = vmax.xlane.f32.xlu1 %v8139_v40 }
 0x89a   : > { %v5460_v55 = vpop.f32.mrb[76].mxu0 }
 0x89b   : > { %2371 = vmax.xlane.f32.xlu0 %v8143_v28  ;;  %v2320_v58 = vpop.f32.mrb[77].mxu0  ;;  %v2329_v16 = vadd.f32 %v5460_v55, %v9462_v63  ;;  %v9465_v55 = vld [vmem:[#allocation38_spill] sm:$0xff] }
 0x89c   : > { %v5461_v14 = vpop.f32.mrb[78].mxu0  ;;  %v2321_v61 = vadd.f32 %v2320_v58, %v9463_v12 }
 0x89d   : > { %2369 = vmax.xlane.f32.xlu1 %v8147_v42  ;;  %v2323_v44 = vpop.f32.mrb[79].mxu0  ;;  %v8155_v30 = vmul.f32 0.17677669, %v2329_v16  ;;  %v2332_v46 = vadd.f32 %v5461_v14, %v9466_v9  ;;  %v9467_v16 = vld [vmem:[#allocation54_spill] sm:$0xff] }
 0x89e   : > { %v8159_v17 = vmul.f32 0.17677669, %v2321_v61  ;;  %v2324_v45 = vadd.f32 %v2323_v44, %v9467_v16  ;;  %v8174_v61 = vpop.permute.xlu1 %2740 }
 0x89f   : > { %2367 = vmax.xlane.f32.xlu0 %v8150_v0  ;;  %v8167_v57 = vmul.f32 0.17677669, %v2332_v46 }
 0x8a0   : > { %v8171_v58 = vmul.f32 0.17677669, %v2324_v45 }
 0x8a3   : > { %2379 = vmax.xlane.f32.xlu0 %v8155_v30 }
 0x8a7   : > { %2375 = vmax.xlane.f32.xlu0 %v8159_v17 }
 0x8ae   : > { %2744 = vrot.lane.b32.xlu1 %v9464_v50, %s6780_s30 }
 0x8bd   : > { %2742 = vrot.lane.b32.xlu0 %v9465_v55, %s6780_s30 }
 0x8d2   : > { %2381 = vmax.xlane.f32.xlu1 %v8167_v57 }
 0x8d6   : > { %2377 = vmax.xlane.f32.xlu1 %v8171_v58 }
 0x914   : > { %v2356_v29 = vpop.xlane.xlu0 %2355 }
 0x915   : > { %v2385_v50 = vsub.f32 %v8107_v41, %v2356_v29 }
 0x917   : > { %v2403_v49 = vmul.f32 1.442695, %v2385_v50  ;;  %v2354_v31 = vpop.xlane.xlu1 %2353 }
 0x918   : > { %v2384_v55 = vsub.f32 %v8112_v10, %v2354_v31  ;;  %v2352_v14 = vpop.xlane.xlu0 %2351 }
 0x919   : > { %6016 = vpow2.f32 %v2403_v49  ;;  %v2383_v46 = vsub.f32 %v8114_v19, %v2352_v14 }
 0x91a   : > { %v2401_v44 = vmul.f32 1.442695, %v2384_v55 }
 0x91b   : > { %v2399_v24 = vmul.f32 1.442695, %v2383_v46 }
 0x91c   : > { %6018 = vpow2.f32 %v2401_v44  ;;  %v2358_v45 = vpop.xlane.xlu0 %2357 }
 0x91d   : > { %6020 = vpow2.f32 %v2399_v24  ;;  %v2386_v51 = vsub.f32 %v8119_v54, %v2358_v45 }
 0x91e   : > { %v2366_v10 = vpop.xlane.xlu1 %2365 }
 0x91f   : > { %v2405_v6 = vmul.f32 1.442695, %v2386_v51  ;;  %v9468_v51 = vld [vmem:[#allocation41_spill] sm:$0xff]  ;;  %v2390_v16 = vsub.f32 %v8123_v53, %v2366_v10 }
 0x920   : > { %v2364_v24 = vpop.xlane.xlu0 %2363 }
 0x921   : > { %6022 = vpow2.f32 %v2405_v6  ;;  %v9469_v6 = vld [vmem:[#allocation44_spill] sm:$0xff]  ;;  %v2389_v54 = vsub.f32 %v8127_v4, %v2364_v24  ;;  %v2413_v25 = vmul.f32 1.442695, %v2390_v16 }
 0x922   : > { %v2362_v50 = vpop.xlane.xlu1 %2361 }
 0x923   : > { %v8180_v52 = vpop.eup %6016  ;;  %v2411_v14 = vmul.f32 1.442695, %v2389_v54  ;;  %v2388_v44 = vsub.f32 %v8131_v56, %v2362_v50 }
 0x924   : > { %2435 = vadd.xlane.f32.xlu1 %v8180_v52  ;;  %v2360_v41 = vpop.xlane.xlu0 %2359 }
 0x925   : > { %v2387_v46 = vsub.f32 %v8134_v2, %v2360_v41  ;;  %6024 = vpow2.f32 %v2411_v14  ;;  %v2409_v9 = vmul.f32 1.442695, %v2388_v44 }
 0x926   : > { %v8183_v29 = vpop.eup %6018  ;;  %v2374_v45 = vpop.xlane.xlu1 %2373 }
 0x927   : > { %v8185_v31 = vpop.eup %6020  ;;  %2433 = vadd.xlane.f32.xlu0 %v8183_v29  ;;  %v2394_v53 = vsub.f32 %v8139_v40, %v2374_v45 }
 0x928   : > { %2431 = vadd.xlane.f32.xlu1 %v8185_v31  ;;  %v2372_v19 = vpop.xlane.xlu0 %2371 }
 0x92a   : > { %v2370_v23 = vpop.xlane.xlu1 %2369 }
 0x92b   : > { %v8189_v49 = vpop.eup %6022 }
 0x92c   : > { %2437 = vadd.xlane.f32.xlu1 %v8189_v49  ;;  %v2368_v55 = vpop.xlane.xlu0 %2367 }
 0x92d   : > { %v2391_v2 = vsub.f32 %v8150_v0, %v2368_v55  ;;  %v2392_v0 = vsub.f32 %v8147_v42, %v2370_v23 }
 0x92f   : > { %v2415_v10 = vmul.f32 1.442695, %v2391_v2  ;;  %v8205_v50 = vpop.eup %6024  ;;  %v2417_v16 = vmul.f32 1.442695, %v2392_v0 }
 0x930   : > { %v2380_v48 = vpop.xlane.xlu0 %2379 }
 0x931   : > { %v2397_v4 = vsub.f32 %v8155_v30, %v2380_v48 }
 0x933   : > { %v2427_v56 = vmul.f32 1.442695, %v2397_v4 }
 0x934   : > { %v2376_v41 = vpop.xlane.xlu0 %2375 }
 0x935   : > { %v2395_v54 = vsub.f32 %v8159_v17, %v2376_v41 }
 0x937   : > { %v2423_v48 = vmul.f32 1.442695, %v2395_v54 }
 0x93d   : > { %2746 = vrot.lane.b32.xlu0 %v9468_v51, %s6780_s30  ;;  %2748 = vrot.lane.b32.xlu1 %v9469_v6, %s6780_s30  ;;  %v2407_v51 = vmul.f32 1.442695, %v2387_v46  ;;  %v2393_v6 = vsub.f32 %v8143_v28, %v2372_v19  ;;  %v8207_v28 = vpop.permute.xlu1 %2744 }
 0x93f   : > { %6026 = vpow2.f32 %v2407_v51  ;;  %v2419_v24 = vmul.f32 1.442695, %v2393_v6 }
 0x940   : > { %6028 = vpow2.f32 %v2409_v9  ;;  %v2421_v9 = vmul.f32 1.442695, %v2394_v53 }
 0x941   : > { %6030 = vpow2.f32 %v2413_v25 }
 0x942   : > { %6032 = vpow2.f32 %v2419_v24 }
 0x943   : > { %6034 = vpow2.f32 %v2427_v56 }
 0x944   : > { %6036 = vpow2.f32 %v2415_v10 }
 0x945   : > { %6038 = vpow2.f32 %v2423_v48 }
 0x946   : > { %6040 = vpow2.f32 %v2421_v9 }
 0x949   : > { %v8211_v25 = vpop.eup %6026 }
 0x94a   : > { %v8213_v17 = vpop.eup %6028 }
 0x94b   : > { %v8218_v55 = vpop.eup %6030 }
 0x94c   : > { %v8220_v23 = vpop.eup %6032 }
 0x94d   : > { %v8225_v46 = vpop.eup %6034 }
 0x94e   : > { %v8227_v44 = vpop.eup %6036 }
 0x94f   : > { %v8231_v45 = vpop.eup %6038 }
 0x950   : > { %v8233_v51 = vpop.eup %6040 }
 0x95c   : > { %2443 = vadd.xlane.f32.xlu0 %v8205_v50 }
 0x95f   : > { %v2382_v30 = vpop.xlane.xlu1 %2381 }
 0x960   : > { %v2398_v40 = vsub.f32 %v8167_v57, %v2382_v30  ;;  %2439 = vadd.xlane.f32.xlu0 %v8211_v25 }
 0x961   : > { %2441 = vadd.xlane.f32.xlu1 %v8213_v17 }
 0x962   : > { %v2429_v19 = vmul.f32 1.442695, %v2398_v40 }
 0x963   : > { %v2378_v14 = vpop.xlane.xlu1 %2377 }
 0x964   : > { %6042 = vpow2.f32 %v2429_v19  ;;  %v2396_v42 = vsub.f32 %v8171_v58, %v2378_v14  ;;  %2445 = vadd.xlane.f32.xlu0 %v8218_v55 }
 0x965   : > { %2451 = vadd.xlane.f32.xlu1 %v8220_v23  ;;  %6044 = vpow2.f32 %v2417_v16 }
 0x966   : > { %v2425_v57 = vmul.f32 1.442695, %v2396_v42 }
 0x968   : > { %2459 = vadd.xlane.f32.xlu0 %v8225_v46  ;;  %6046 = vpow2.f32 %v2425_v57 }
 0x969   : > { %2447 = vadd.xlane.f32.xlu1 %v8227_v44 }
 0x96c   : > { %2455 = vadd.xlane.f32.xlu0 %v8231_v45 }
 0x96d   : > { %2453 = vadd.xlane.f32.xlu1 %v8233_v51 }
 0x96e   : > { %v8237_v58 = vpop.eup %6042 }
 0x96f   : > { %v8239_v6 = vpop.eup %6044 }
 0x970   : > { %2461 = vadd.xlane.f32.xlu0 %v8237_v58 }
 0x971   : > { %2449 = vadd.xlane.f32.xlu1 %v8239_v6 }
 0x972   : > { %v8243_v4 = vpop.eup %6046 }
 0x975   : > { %2457 = vadd.xlane.f32.xlu1 %v8243_v4 }
 0x986   : > { %2752 = vrot.lane.b32.xlu1 %v7479_v26, %s6780_s30  ;;  %2750 = vrot.lane.b32.xlu0 %v7467_v8, %s6780_s30 }
 0x98a   : > { %2724 = vrot.lane.b32.xlu1 %v7353_v13, %s6780_s30  ;;  %2722 = vrot.lane.b32.xlu0 %v7336_v1, %s6780_s30  ;;  %v2743_v1 = vpop.permute.xlu0 %2742 }
 0x98e   : > { %2728 = vrot.lane.b32.xlu1 %v7396_v59, %s6780_s30  ;;  %2726 = vrot.lane.b32.xlu0 %v7373_v33, %s6780_s30 }
 0x992   : > { %2732 = vrot.lane.b32.xlu1 %v7444_v47, %s6780_s30  ;;  %2730 = vrot.lane.b32.xlu0 %v7420_v22, %s6780_s30 }
 0x996   : > { %2736 = vrot.lane.b32.xlu1 %v7477_v21, %s6780_s30  ;;  %2734 = vrot.lane.b32.xlu0 %v7464_v7, %s6780_s30 }
 0x99a   : > { %3086 = vrot.lane.b32.xlu1 %v7375_v34, %s6780_s30  ;;  %3084 = vrot.lane.b32.xlu0 %v7379_v36, %s6780_s30 }
 0x99e   : > { %3088 = vrot.lane.b32.xlu0 %v7403_v62, %s6780_s30 }
 0x9a2   : > { %3090 = vrot.lane.b32.xlu0 %v7398_v60, %s6780_s30 }
 0x9b1   : > { %v2436_v13 = vpop.xlane.xlu1 %2435 }
 0x9b2   : > { %6048 = vrcp.f32 %v2436_v13 }
 0x9b4   : > { %v2434_v33 = vpop.xlane.xlu0 %2433 }
 0x9b5   : > { %6050 = vrcp.f32 %v2434_v33  ;;  %v2432_v59 = vpop.xlane.xlu1 %2431 }
 0x9b6   : > { %6052 = vrcp.f32 %v2432_v59 }
 0x9b9   : > { %v2438_v34 = vpop.xlane.xlu1 %2437 }
 0x9ba   : > { %6054 = vrcp.f32 %v2438_v34 }
 0x9bc   : > { %v6049_v22 = vpop.eup %6048 }
 0x9bd   : > { %v2468_v36 = vmul.f32 %v6049_v22, %v8180_v52  ;;  %v2779_v52 = vsel %vm1127_vm0, %v8069_v27, 0  ;;  %v2747_v27 = vpop.permute.xlu0 %2746 }
 0x9be   : > { %v2791_v2 = vsel %vm1127_vm0, %v2747_v27, 0 }
 0x9bf   : > { %v6051_v47 = vpop.eup %6050  ;;  %4952 = vst [vmem:[%s7749_s24 + $0x110] sm:$0xff] %v2468_v36 }
 0x9c0   : > { %v6053_v62 = vpop.eup %6052  ;;  %v2466_v60 = vmul.f32 %v6051_v47, %v8183_v29  ;;  %v2782_v29 = vsel %vm1127_vm0, %v8174_v61, 0 }
 0x9c1   : > { %v2464_v7 = vmul.f32 %v6053_v62, %v8185_v31  ;;  %v2785_v31 = vsel %vm1127_vm0, %v2743_v1, 0 }
 0x9c2   : > { %4951 = vst [vmem:[%s7749_s24 + $0x108] sm:$0xff] %v2466_v60 }
 0x9c3   : > { %4950 = vst [vmem:[%s7749_s24 + $0x100] sm:$0xff] %v2464_v7  ;;  %v2512_v8 = vpack.c.bf16 %v2466_v60, %v2464_v7 }
 0x9c4   : > { %v6055_v21 = vpop.eup %6054 }
 0x9c5   : > { %v2470_v26 = vmul.f32 %v6055_v21, %v8189_v49  ;;  %5478 = vmatprep.mubr.bf16.mxu1 %v2512_v8  ;;  %v2788_v49 = vsel %vm1127_vm0, %v8207_v28, 0 }
 0x9c7   : > { %4953 = vst [vmem:[%s7749_s24 + $0x118] sm:$0xff] %v2470_v26  ;;  %v2513_v24 = vpack.c.bf16 %v2470_v26, %v2468_v36 }
 0x9c9   : > { %5479 = vmatmul.mubr.bf16.vlgmr.msra.gmra.mrb[48].mxu1 %v2513_v24 }
 0x9ca   : > { %5495 = vmatpush3.bf16.xpose.msra.mxu1 %v2779_v52 }
 0x9cb   : > { %5631 = vmatprep.subr.msk.bf16.mxu1 %vm1127_vm0, %v8174_v61  ;;  %v2749_v61 = vpop.permute.xlu1 %2748 }
 0x9cc   : > { %v2794_v53 = vsel %vm1127_vm0, %v2749_v61, 0 }
 0x9d2   : > { %5497 = vmatpush3.bf16.xpose.msra.mxu1 %v2782_v29 }
 0x9d3   : > { %5632 = vmatprep.subr.msk.bf16.mxu1 %vm1127_vm0, %v2743_v1 }
 0x9da   : > { %5499 = vmatpush3.bf16.xpose.msra.mxu1 %v2785_v31 }
 0x9db   : > { %5633 = vmatprep.subr.msk.bf16.mxu1 %vm1127_vm0, %v8207_v28 }
 0x9e2   : > { %5501 = vmatpush3.bf16.xpose.msra.mxu1 %v2788_v49 }
 0x9e3   : > { %5634 = vmatprep.subr.msk.bf16.mxu1 %vm1127_vm0, %v2747_v27 }
 0x9e9   : > { %v2444_v41 = vpop.xlane.xlu0 %2443 }
 0x9ea   : > { %5503 = vmatpush3.bf16.xpose.msra.mxu1 %v2791_v2  ;;  %6056 = vrcp.f32 %v2444_v41 }
 0x9eb   : > { %5635 = vmatprep.subr.msk.bf16.mxu1 %vm1127_vm0, %v2749_v61 }
 0x9ed   : > { %v2440_v56 = vpop.xlane.xlu0 %2439 }
 0x9ee   : > { %6058 = vrcp.f32 %v2440_v56  ;;  %v2442_v54 = vpop.xlane.xlu1 %2441 }
 0x9ef   : > { %6060 = vrcp.f32 %v2442_v54 }
 0x9f1   : > { %v2446_v10 = vpop.xlane.xlu0 %2445 }
 0x9f2   : > { %5505 = vmatpush3.bf16.xpose.msra.mxu1 %v2794_v53  ;;  %6062 = vrcp.f32 %v2446_v10  ;;  %v2452_v28 = vpop.xlane.xlu1 %2451 }
 0x9f3   : > { %6064 = vrcp.f32 %v2452_v28 }
 0x9f4   : > { %v6057_v48 = vpop.eup %6056 }
 0x9f5   : > { %v2460_v9 = vpop.xlane.xlu0 %2459  ;;  %v2476_v0 = vmul.f32 %v6057_v48, %v8205_v50 }
 0x9f6   : > { %6066 = vrcp.f32 %v2460_v9  ;;  %v2448_v30 = vpop.xlane.xlu1 %2447 }
 0x9f7   : > { %6068 = vrcp.f32 %v2448_v30  ;;  %4956 = vst [vmem:[%s7749_s24 + $0x130] sm:$0xff] %v2476_v0  ;;  %v9470_v30 = vmov 0  }
 0x9f8   : > { %v6059_v40 = vpop.eup %6058 }
 0x9f9   : > { %v6061_v16 = vpop.eup %6060  ;;  %v2456_v19 = vpop.xlane.xlu0 %2455  ;;  %v2472_v14 = vmul.f32 %v6059_v40, %v8211_v25 }
 0x9fa   : > { %6070 = vrcp.f32 %v2456_v19  ;;  %v2454_v42 = vpop.xlane.xlu1 %2453  ;;  %v2474_v57 = vmul.f32 %v6061_v16, %v8213_v17 }
 0x9fb   : > { %6072 = vrcp.f32 %v2454_v42  ;;  %4954 = vst [vmem:[%s7749_s24 + $0x120] sm:$0xff] %v2472_v14 }
 0x9fc   : > { %v6063_v1 = vpop.eup %6062  ;;  %4955 = vst [vmem:[%s7749_s24 + $0x128] sm:$0xff] %v2474_v57  ;;  %v2514_v50 = vpack.c.bf16 %v2474_v57, %v2472_v14 }
 0x9fd   : > { %v6065_v13 = vpop.eup %6064  ;;  %v2462_v33 = vpop.xlane.xlu0 %2461  ;;  %v2478_v59 = vmul.f32 %v6063_v1, %v8218_v55 }
 0x9fe   : > { %6074 = vrcp.f32 %v2462_v33  ;;  %v2450_v34 = vpop.xlane.xlu1 %2449  ;;  %5482 = vmatprep.mubr.bf16.mxu1 %v2514_v50  ;;  %v2484_v25 = vmul.f32 %v6065_v13, %v8220_v23 }
 0x9ff   : > { %6076 = vrcp.f32 %v2450_v34  ;;  %4957 = vst [vmem:[%s7749_s24 + $0x138] sm:$0xff] %v2478_v59  ;;  %v2515_v17 = vpack.c.bf16 %v2478_v59, %v2476_v0 }
 0xa00   : > { %v6067_v22 = vpop.eup %6066  ;;  %4960 = vst [vmem:[%s7749_s24 + $0x150] sm:$0xff] %v2484_v25 }
 0xa01   : > { %v6069_v36 = vpop.eup %6068  ;;  %5483 = vmatmul.mubr.bf16.gmra.mrb[52].mxu1 %v2515_v17  ;;  %v2751_v47 = vpop.permute.xlu0 %2750  ;;  %v2492_v62 = vmul.f32 %v6067_v22, %v8225_v46 }
 0xa02   : > { %v2458_v60 = vpop.xlane.xlu1 %2457  ;;  %5636 = vmatprep.subr.msk.bf16.mxu1 %vm1127_vm0, %v2751_v47  ;;  %v2797_v55 = vsel %vm1127_vm0, %v2751_v47, 0  ;;  %v2480_v23 = vmul.f32 %v6069_v36, %v8227_v44 }
 0xa03   : > { %6078 = vrcp.f32 %v2458_v60  ;;  %5507 = vmatpush3.bf16.xpose.msra.mxu1 %v2797_v55  ;;  %4964 = vst [vmem:[%s7749_s24 + $0x170] sm:$0xff] %v2492_v62 }
 0xa04   : > { %v6071_v7 = vpop.eup %6070  ;;  %4958 = vst [vmem:[%s7749_s24 + $0x140] sm:$0xff] %v2480_v23 }
 0xa05   : > { %v6073_v8 = vpop.eup %6072  ;;  %v2723_v21 = vpop.permute.xlu0 %2722  ;;  %v2488_v46 = vmul.f32 %v6071_v7, %v8231_v45 }
 0xa06   : > { %v2753_v26 = vpop.permute.xlu1 %2752  ;;  %v2486_v24 = vmul.f32 %v6073_v8, %v8233_v51 }
 0xa07   : > { %5637 = vmatprep.subr.msk.bf16.mxu1 %vm1127_vm0, %v2753_v26  ;;  %4962 = vst [vmem:[%s7749_s24 + $0x160] sm:$0xff] %v2488_v46  ;;  %v2800_v27 = vsel %vm1127_vm0, %v2753_v26, 0 }
 0xa08   : > { %v6075_v52 = vpop.eup %6074  ;;  %4961 = vst [vmem:[%s7749_s24 + $0x158] sm:$0xff] %v2486_v24  ;;  %v2517_v61 = vpack.c.bf16 %v2486_v24, %v2484_v25 }
 0xa09   : > { %v6077_v44 = vpop.eup %6076  ;;  %v2727_v29 = vpop.permute.xlu0 %2726  ;;  %v2494_v31 = vmul.f32 %v6075_v52, %v8237_v58 }
 0xa0a   : > { %v2725_v49 = vpop.permute.xlu1 %2724  ;;  %v2482_v2 = vmul.f32 %v6077_v44, %v8239_v6 }
 0xa0b   : > { %5509 = vmatpush3.bf16.xpose.msra.mxu1 %v2800_v27  ;;  %4965 = vst [vmem:[%s7749_s24 + $0x178] sm:$0xff] %v2494_v31  ;;  %v2519_v48 = vpack.c.bf16 %v2494_v31, %v2492_v62 }
 0xa0c   : > { %4959 = vst [vmem:[%s7749_s24 + $0x148] sm:$0xff] %v2482_v2  ;;  %v2516_v45 = vpack.c.bf16 %v2482_v2, %v2480_v23 }
 0xa0d   : > { %v6079_v51 = vpop.eup %6078  ;;  %v2731_v41 = vpop.permute.xlu0 %2730 }
 0xa0e   : > { %v2729_v56 = vpop.permute.xlu1 %2728  ;;  %5486 = vmatprep.mubr.bf16.mxu1 %v2516_v45  ;;  %v2490_v54 = vmul.f32 %v6079_v51, %v8243_v4 }
 0xa0f   : > { %5487 = vmatmul.mubr.bf16.gmra.mrb[56].mxu1 %v2517_v61 }
 0xa10   : > { %4963 = vst [vmem:[%s7749_s24 + $0x168] sm:$0xff] %v2490_v54  ;;  %v2518_v53 = vpack.c.bf16 %v2490_v54, %v2488_v46 }
 0xa11   : > { %v2735_v58 = vpop.permute.xlu0 %2734 }
 0xa12   : > { %v2733_v10 = vpop.permute.xlu1 %2732  ;;  %5490 = vmatprep.mubr.bf16.mxu1 %v2518_v53 }
 0xa15   : > { %v3085_v28 = vpop.permute.xlu0 %3084 }
 0xa16   : > { %v2737_v6 = vpop.permute.xlu1 %2736  ;;  %5526 = vmatprep.subr.bf16.mxu0 %v3085_v28 }
 0xa17   : > { %5491 = vmatmul.mubr.bf16.gmra.mrb[60].mxu1 %v2519_v48  ;;  %5527 = vmatpush3.bf16.msra.mxu0 %v3085_v28 }
 0xa18   : > { %5510 = vmatprep.mubr.msk.bf16.mxu1 %vm1127_vm0, %v2723_v21 }
 0xa19   : > { %v3089_v9 = vpop.permute.xlu0 %3088 }
 0xa1a   : > { %v3087_v0 = vpop.permute.xlu1 %3086 }
 0xa1b   : > { %5528 = vmatprep.subr.bf16.mxu0 %v3087_v0 }
 0xa1c   : > { %5529 = vmatpush3.bf16.msra.mxu0 %v3087_v0 }
 0xa1d   : > { %5530 = vmatprep.subr.bf16.mxu0 %v3089_v9  ;;  %v3091_v4 = vpop.permute.xlu0 %3090 }
 0xa1f   : > { %5511 = vmatmul.mubr.msk.bf16.vlgmr.msra.gmra.mrb[64].mxu1 %vm1127_vm0, %v2725_v49 }
 0xa20   : > { %5514 = vmatprep.mubr.msk.bf16.mxu1 %vm1127_vm0, %v2727_v29  ;;  %5531 = vmatpush3.bf16.msra.mxu0 %v3089_v9 }
 0xa21   : > { %5532 = vmatprep.subr.bf16.mxu0 %v3091_v4 }
 0xa24   : > { %5533 = vmatpush3.bf16.msra.mxu0 %v3091_v4  ;;  %v9471_v4 = vld [vmem:[#allocation40_spill] sm:$0xff] }
 0xa27   : > { %5515 = vmatmul.mubr.msk.bf16.gmra.mrb[68].mxu1 %vm1127_vm0, %v2729_v56 }
 0xa28   : > { %5518 = vmatprep.mubr.msk.bf16.mxu1 %vm1127_vm0, %v2731_v41 }
 0xa2f   : > { %5519 = vmatmul.mubr.msk.bf16.gmra.mrb[72].mxu1 %vm1127_vm0, %v2733_v10 }
 0xa30   : > { %5522 = vmatprep.mubr.msk.bf16.mxu1 %vm1127_vm0, %v2735_v58 }
 0xa37   : > { %5523 = vmatmul.mubr.msk.bf16.gmra.mrb[76].mxu1 %vm1127_vm0, %v2737_v6  ;;  %vm2141_vm0 = vcmask 523520  }
 0xa38   : > { %3865 = vmatprep.mubr.bf16.mxu1 %v9470_v30 }
 0xa9c   : > { %v8335_v40 = vpop.f32.mrb[48].mxu1 }
 0xa9d   : > { %v8337_v16 = vpop.f32.mrb[49].mxu1 }
 0xa9e   : > { %v8339_v19 = vpop.f32.mrb[50].mxu1 }
 0xa9f   : > { %v8341_v14 = vpop.f32.mrb[51].mxu1 }
 0xad4   : > { %v8343_v42 = vpop.f32.mrb[52].mxu1 }
 0xad5   : > { %v8345_v57 = vpop.f32.mrb[53].mxu1 }
 0xad6   : > { %v8347_v1 = vpop.f32.mrb[54].mxu1 }
 0xad7   : > { %v8349_v50 = vpop.f32.mrb[55].mxu1 }
 0xae2   : > { %v8351_v13 = vpop.f32.mrb[56].mxu1 }
 0xae3   : > { %v8353_v33 = vpop.f32.mrb[57].mxu1 }
 0xae4   : > { %v8355_v59 = vpop.f32.mrb[58].mxu1 }
 0xae5   : > { %v8357_v34 = vpop.f32.mrb[59].mxu1 }
 0xaea   : > { %v8359_v25 = vpop.f32.mrb[60].mxu1 }
 0xaeb   : > { %v8361_v17 = vpop.f32.mrb[61].mxu1 }
 0xaec   : > { %v8363_v22 = vpop.f32.mrb[62].mxu1 }
 0xaed   : > { %v8365_v36 = vpop.f32.mrb[63].mxu1 }
 0xaf2   : > { %v5512_v47 = vpop.f32.mrb[64].mxu1 }
 0xaf3   : > { %v2845_v62 = vadd.f32 %v5512_v47, %v7508_v32  ;;  %v2836_v60 = vpop.f32.mrb[65].mxu1  ;;  %v9473_v47 = vld [vmem:[#allocation53_spill] sm:$0xff] }
 0xaf4   : > { %v5513_v55 = vpop.f32.mrb[66].mxu1  ;;  %v2837_v7 = vadd.f32 %v2836_v60, %v7511_v37 }
 0xaf5   : > { %v8368_v23 = vmul.f32 0.17677669, %v2845_v62  ;;  %v2839_v8 = vpop.f32.mrb[67].mxu1  ;;  %v2848_v24 = vadd.f32 %v5513_v55, %v7514_v39  ;;  %v9474_v55 = vld [vmem:[#allocation54_spill] sm:$0xff] }
 0xaf6   : > { %v2840_v21 = vadd.f32 %v2839_v8, %v7519_v43  ;;  %v8375_v26 = vmul.f32 0.17677669, %v2837_v7 }
 0xaf7   : > { %2919 = vmax.xlane.f32.xlu0 %v8368_v23  ;;  %v2902_v29 = vmul.f32 0.17677669, %v2848_v24 }
 0xaf8   : > { %v8373_v46 = vmul.f32 0.17677669, %v2840_v21 }
 0xafa   : > { %2917 = vmax.xlane.f32.xlu1 %v8373_v46  ;;  %v5516_v32 = vpop.f32.mrb[68].mxu1 }
 0xafb   : > { %2915 = vmax.xlane.f32.xlu0 %v8375_v26  ;;  %v2852_v52 = vpop.f32.mrb[69].mxu1  ;;  %v2861_v37 = vadd.f32 %v5516_v32, %v7534_v5 }
 0xafc   : > { %v5517_v44 = vpop.f32.mrb[70].mxu1  ;;  %v2853_v39 = vadd.f32 %v2852_v52, %v9429_v38 }
 0xafd   : > { %v2864_v43 = vadd.f32 %v5517_v44, %v7541_v11  ;;  %v2855_v31 = vpop.f32.mrb[71].mxu1  ;;  %v8385_v2 = vmul.f32 0.17677669, %v2861_v37 }
 0xafe   : > { %v2856_v27 = vadd.f32 %v2855_v31, %v7551_v20  ;;  %v8392_v11 = vmul.f32 0.17677669, %v2853_v39 }
 0xaff   : > { %v8382_v49 = vmul.f32 0.17677669, %v2864_v43  ;;  %2921 = vmax.xlane.f32.xlu0 %v2902_v29 }
 0xb00   : > { %v8389_v51 = vmul.f32 0.17677669, %v2856_v27 }
 0xb01   : > { %2929 = vmax.xlane.f32.xlu1 %v8382_v49 }
 0xb02   : > { %v5520_v45 = vpop.f32.mrb[72].mxu1 }
 0xb03   : > { %2927 = vmax.xlane.f32.xlu0 %v8385_v2  ;;  %v2868_v5 = vpop.f32.mrb[73].mxu1  ;;  %v2877_v61 = vadd.f32 %v5520_v45, %v9458_v18 }
 0xb04   : > { %v5521_v41 = vpop.f32.mrb[74].mxu1  ;;  %v2869_v58 = vadd.f32 %v2868_v5, %v9461_v15 }
 0xb05   : > { %v2880_v20 = vadd.f32 %v5521_v41, %v9459_v35  ;;  %2925 = vmax.xlane.f32.xlu1 %v8389_v51  ;;  %v2871_v56 = vpop.f32.mrb[75].mxu1  ;;  %v8401_v53 = vmul.f32 0.17677669, %v2877_v61 }
 0xb06   : > { %v2872_v38 = vadd.f32 %v2871_v56, %v9460_v3  ;;  %v8408_v48 = vmul.f32 0.17677669, %v2869_v58 }
 0xb07   : > { %v8397_v54 = vmul.f32 0.17677669, %v2880_v20  ;;  %2923 = vmax.xlane.f32.xlu0 %v8392_v11 }
 0xb08   : > { %v8405_v28 = vmul.f32 0.17677669, %v2872_v38 }
 0xb09   : > { %2937 = vmax.xlane.f32.xlu1 %v8397_v54 }
 0xb0a   : > { %v5524_v10 = vpop.f32.mrb[76].mxu1 }
 0xb0b   : > { %2935 = vmax.xlane.f32.xlu0 %v8401_v53  ;;  %v2884_v18 = vpop.f32.mrb[77].mxu1  ;;  %v2893_v6 = vadd.f32 %v5524_v10, %v9462_v63  ;;  %v9472_v63 = vld [vmem:[#allocation42_spill] sm:$0xff] }
 0xb0c   : > { %v5525_v35 = vpop.f32.mrb[78].mxu1  ;;  %v2885_v15 = vadd.f32 %v2884_v18, %v9463_v12 }
 0xb0d   : > { %2933 = vmax.xlane.f32.xlu1 %v8405_v28  ;;  %v2887_v3 = vpop.f32.mrb[79].mxu1  ;;  %v8413_v9 = vmul.f32 0.17677669, %v2893_v6  ;;  %v2896_v62 = vadd.f32 %v5525_v35, %v9473_v47 }
 0xb0e   : > { %v8417_v0 = vmul.f32 0.17677669, %v2885_v15  ;;  %v2888_v7 = vadd.f32 %v2887_v3, %v9474_v55 }
 0xb0f   : > { %2931 = vmax.xlane.f32.xlu0 %v8408_v48  ;;  %v8425_v60 = vmul.f32 0.17677669, %v2896_v62 }
 0xb10   : > { %v8429_v12 = vmul.f32 0.17677669, %v2888_v7 }
 0xb13   : > { %2943 = vmax.xlane.f32.xlu0 %v8413_v9 }
 0xb17   : > { %2939 = vmax.xlane.f32.xlu0 %v8417_v0 }
 0xb1e   : > { %3094 = vrot.lane.b32.xlu1 %v9471_v4, %s6780_s30 }
 0xb2d   : > { %3092 = vrot.lane.b32.xlu0 %v9472_v63, %s6780_s30 }
 0xb42   : > { %2945 = vmax.xlane.f32.xlu1 %v8425_v60 }
 0xb46   : > { %2941 = vmax.xlane.f32.xlu1 %v8429_v12 }
 0xb84   : > { %v2920_v8 = vpop.xlane.xlu0 %2919 }
 0xb85   : > { %v2949_v21 = vsub.f32 %v8368_v23, %v2920_v8 }
 0xb87   : > { %v2967_v24 = vmul.f32 1.442695, %v2949_v21  ;;  %v2918_v52 = vpop.xlane.xlu1 %2917  ;;  %v9475_v21 = vld [vmem:[#allocation43_spill] sm:$0xff] }
 0xb88   : > { %v2916_v32 = vpop.xlane.xlu0 %2915  ;;  %v2948_v43 = vsub.f32 %v8373_v46, %v2918_v52 }
 0xb89   : > { %6080 = vpow2.f32 %v2967_v24  ;;  %v2947_v44 = vsub.f32 %v8375_v26, %v2916_v32  ;;  %v9476_v24 = vld [vmem:[#allocation45_spill] sm:$0xff] }
 0xb8a   : > { %v2965_v5 = vmul.f32 1.442695, %v2948_v43 }
 0xb8b   : > { %v2963_v37 = vmul.f32 1.442695, %v2947_v44 }
 0xb8c   : > { %v2922_v31 = vpop.xlane.xlu0 %2921 }
 0xb8d   : > { %6082 = vpow2.f32 %v2963_v37  ;;  %v2950_v27 = vsub.f32 %v2902_v29, %v2922_v31 }
 0xb8e   : > { %v2930_v39 = vpop.xlane.xlu1 %2929 }
 0xb8f   : > { %v2969_v45 = vmul.f32 1.442695, %v2950_v27  ;;  %v2954_v41 = vsub.f32 %v8382_v49, %v2930_v39 }
 0xb90   : > { %v2928_v61 = vpop.xlane.xlu0 %2927 }
 0xb91   : > { %6084 = vpow2.f32 %v2969_v45  ;;  %v2953_v23 = vsub.f32 %v8385_v2, %v2928_v61  ;;  %v2977_v26 = vmul.f32 1.442695, %v2954_v41 }
 0xb92   : > { %v2926_v20 = vpop.xlane.xlu1 %2925  ;;  %6086 = vpow2.f32 %v2965_v5 }
 0xb93   : > { %v8437_v56 = vpop.eup %6080  ;;  %v2975_v38 = vmul.f32 1.442695, %v2953_v23  ;;  %v2952_v29 = vsub.f32 %v8389_v51, %v2926_v20 }
 0xb94   : > { %2999 = vadd.xlane.f32.xlu1 %v8437_v56  ;;  %v2924_v46 = vpop.xlane.xlu0 %2923 }
 0xb95   : > { %6088 = vpow2.f32 %v2975_v38  ;;  %v2951_v58 = vsub.f32 %v8392_v11, %v2924_v46  ;;  %v2973_v18 = vmul.f32 1.442695, %v2952_v29 }
 0xb96   : > { %6090 = vpow2.f32 %v2977_v26  ;;  %v2938_v51 = vpop.xlane.xlu1 %2937 }
 0xb97   : > { %v8442_v10 = vpop.eup %6082  ;;  %v2971_v49 = vmul.f32 1.442695, %v2951_v58  ;;  %v2958_v52 = vsub.f32 %v8397_v54, %v2938_v51  ;;  %v9477_v58 = vld [vmem:[#allocation57_spill] sm:$0xff] }
 0xb98   : > { %2995 = vadd.xlane.f32.xlu1 %v8442_v10  ;;  %v2936_v2 = vpop.xlane.xlu0 %2935  ;;  %v9482_v51 = vld [vmem:[#allocation61_spill] sm:$0xff] }
 0xb99   : > { %6092 = vpow2.f32 %v2971_v49  ;;  %v2985_v43 = vmul.f32 1.442695, %v2958_v52  ;;  %v2957_v31 = vsub.f32 %v8401_v53, %v2936_v2  ;;  %v9478_v49 = vld [vmem:[#allocation46_spill] sm:$0xff]  ;;  %v9479_v2 = vld [vmem:[#allocation55_spill] sm:$0xff] }
 0xb9a   : > { %6094 = vpow2.f32 %v2973_v18  ;;  %v2934_v47 = vpop.xlane.xlu1 %2933  ;;  %v9480_v18 = vld [vmem:[#allocation56_spill] sm:$0xff] }
 0xb9b   : > { %v8445_v35 = vpop.eup %6084  ;;  %v2956_v44 = vsub.f32 %v8405_v28, %v2934_v47  ;;  %v2983_v45 = vmul.f32 1.442695, %v2957_v31 }
 0xb9c   : > { %3001 = vadd.xlane.f32.xlu1 %v8445_v35  ;;  %v2932_v6 = vpop.xlane.xlu0 %2931  ;;  %v8448_v3 = vpop.eup %6086 }
 0xb9d   : > { %v2955_v32 = vsub.f32 %v8408_v48, %v2932_v6  ;;  %v2981_v27 = vmul.f32 1.442695, %v2956_v44  ;;  %v9481_v6 = vld [vmem:[#allocation59_spill] sm:$0xff] }
 0xb9e   : > { %v3095_v8 = vpop.permute.xlu1 %3094 }
 0xb9f   : > { %v8450_v15 = vpop.eup %6088  ;;  %v2979_v37 = vmul.f32 1.442695, %v2955_v32 }
 0xba0   : > { %2997 = vadd.xlane.f32.xlu1 %v8448_v3  ;;  %3007 = vadd.xlane.f32.xlu0 %v8450_v15  ;;  %v2944_v11 = vpop.xlane.xlu0 %2943  ;;  %v8454_v4 = vpop.eup %6090 }
 0xba1   : > { %6096 = vpow2.f32 %v2979_v37  ;;  %v2961_v54 = vsub.f32 %v8413_v9, %v2944_v11  ;;  %v9483_v11 = vld [vmem:[#allocation58_spill] sm:$0xff] }
 0xba2   : > { %6098 = vpow2.f32 %v2985_v43 }
 0xba3   : > { %v8456_v63 = vpop.eup %6092  ;;  %6100 = vpow2.f32 %v2981_v27  ;;  %v2991_v38 = vmul.f32 1.442695, %v2961_v54 }
 0xba4   : > { %3009 = vadd.xlane.f32.xlu0 %v8454_v4  ;;  %3003 = vadd.xlane.f32.xlu1 %v8456_v63  ;;  %v2940_v62 = vpop.xlane.xlu0 %2939  ;;  %v8460_v55 = vpop.eup %6094  ;;  %6102 = vpow2.f32 %v2983_v45 }
 0xba5   : > { %v2959_v5 = vsub.f32 %v8417_v0, %v2940_v62 }
 0xba7   : > { %v2987_v28 = vmul.f32 1.442695, %v2959_v5 }
 0xba8   : > { %3005 = vadd.xlane.f32.xlu0 %v8460_v55  ;;  %v3093_v7 = vpop.permute.xlu0 %3092 }
 0xba9   : > { %5534 = vmatprep.subr.bf16.mxu0 %v3093_v7 }
 0xbaa   : > { %5535 = vmatpush3.bf16.msra.mxu0 %v3093_v7 }
 0xbab   : > { %5536 = vmatprep.subr.bf16.mxu0 %v3095_v8  ;;  %v8475_v20 = vpop.eup %6096 }
 0xbac   : > { %v8478_v26 = vpop.eup %6098 }
 0xbad   : > { %v8480_v0 = vpop.eup %6100 }
 0xbae   : > { %5537 = vmatpush3.bf16.msra.mxu0 %v3095_v8  ;;  %v8484_v9 = vpop.eup %6102 }
 0xbb5   : > { %3098 = vrot.lane.b32.xlu1 %v9475_v21, %s6780_s30 }
 0xbbe   : > { %3096 = vrot.lane.b32.xlu0 %v9476_v24, %s6780_s30 }
 0xbcf   : > { %v2946_v39 = vpop.xlane.xlu1 %2945 }
 0xbd0   : > { %v2962_v61 = vsub.f32 %v8425_v60, %v2946_v39 }
 0xbd2   : > { %v2993_v53 = vmul.f32 1.442695, %v2962_v61 }
 0xbd3   : > { %v2942_v41 = vpop.xlane.xlu1 %2941 }
 0xbd4   : > { %v2960_v48 = vsub.f32 %v8429_v12, %v2942_v41 }
 0xbd6   : > { %v2989_v23 = vmul.f32 1.442695, %v2960_v48 }
 0xbd8   : > { %6104 = vpow2.f32 %v2989_v23 }
 0xbd9   : > { %3011 = vadd.xlane.f32.xlu1 %v8475_v20  ;;  %6106 = vpow2.f32 %v2987_v28 }
 0xbda   : > { %6108 = vpow2.f32 %v2993_v53 }
 0xbdb   : > { %6110 = vpow2.f32 %v2991_v38 }
 0xbdd   : > { %3013 = vadd.xlane.f32.xlu0 %v8480_v0  ;;  %3017 = vadd.xlane.f32.xlu1 %v8478_v26 }
 0xbe1   : > { %3015 = vadd.xlane.f32.xlu0 %v8484_v9 }
 0xbe2   : > { %v8487_v60 = vpop.eup %6104 }
 0xbe3   : > { %3021 = vadd.xlane.f32.xlu1 %v8487_v60  ;;  %v8490_v12 = vpop.eup %6106 }
 0xbe4   : > { %v8493_v46 = vpop.eup %6108 }
 0xbe5   : > { %3019 = vadd.xlane.f32.xlu0 %v8490_v12  ;;  %v8496_v29 = vpop.eup %6110 }
 0xbe7   : > { %3025 = vadd.xlane.f32.xlu1 %v8493_v46 }
 0xbe9   : > { %3023 = vadd.xlane.f32.xlu0 %v8496_v29 }
 0xbf8   : > { %2095 = vrot.lane.b32.xlu1 %v9477_v58, %s6780_s30 }
 0xbfc   : > { %2097 = vrot.lane.b32.xlu1 %v9478_v49, %s6780_s30 }
 0xbff   : > { %2093 = vrot.lane.b32.xlu0 %v9479_v2, %s6780_s30 }
 0xc00   : > { %2099 = vrot.lane.b32.xlu1 %v9480_v18, %s6780_s30 }
 0xc03   : > { %2657 = vrot.lane.b32.xlu0 %v8337_v16, %s6779_s20  ;;  %v9484_v16 = vld [vmem:[#allocation60_spill] sm:$0xff] }
 0xc04   : > { %2659 = vrot.lane.b32.xlu1 %v8341_v14, %s6779_s20 }
 0xc07   : > { %2661 = vrot.lane.b32.xlu0 %v8335_v40, %s6779_s20  ;;  %v9485_v40 = vld [vmem:[#allocation63_spill] sm:$0xff] }
 0xc08   : > { %2663 = vrot.lane.b32.xlu1 %v8339_v19, %s6779_s20  ;;  %v9486_v19 = vld [vmem:[#allocation65_spill] sm:$0xff] }
 0xc0b   : > { %2101 = vrot.lane.b32.xlu0 %v9481_v6, %s6780_s30 }
 0xc0c   : > { %2103 = vrot.lane.b32.xlu1 %v9482_v51, %s6780_s30 }
 0xc0f   : > { %2105 = vrot.lane.b32.xlu0 %v9483_v11, %s6780_s30 }
 0xc10   : > { %2107 = vrot.lane.b32.xlu1 %v9484_v16, %s6780_s30 }
 0xc13   : > { %2665 = vrot.lane.b32.xlu0 %v8345_v57, %s6779_s20 }
 0xc14   : > { %2667 = vrot.lane.b32.xlu1 %v8349_v50, %s6779_s20 }
 0xc17   : > { %2669 = vrot.lane.b32.xlu0 %v8343_v42, %s6779_s20 }
 0xc18   : > { %2671 = vrot.lane.b32.xlu1 %v8347_v1, %s6779_s20 }
 0xc1b   : > { %2109 = vrot.lane.b32.xlu0 %v9485_v40, %s6780_s30 }
 0xc1c   : > { %2111 = vrot.lane.b32.xlu1 %v9486_v19, %s6780_s30 }
 0xc21   : > { %v3000_v14 = vpop.xlane.xlu1 %2999 }
 0xc22   : > { %6112 = vrcp.f32 %v3000_v14 }
 0xc25   : > { %v2996_v47 = vpop.xlane.xlu1 %2995 }
 0xc26   : > { %6114 = vrcp.f32 %v2996_v47 }
 0xc29   : > { %v3002_v57 = vpop.xlane.xlu1 %3001 }
 0xc2a   : > { %6116 = vrcp.f32 %v3002_v57 }
 0xc2c   : > { %v6113_v50 = vpop.eup %6112 }
 0xc2d   : > { %v3032_v62 = vmul.f32 %v6113_v50, %v8437_v56  ;;  %v2998_v42 = vpop.xlane.xlu1 %2997  ;;  %v3008_v7 = vpop.xlane.xlu0 %3007 }
 0xc2e   : > { %6118 = vrcp.f32 %v2998_v42 }
 0xc2f   : > { %4976 = vst [vmem:[%s7749_s24 + $0x190] sm:$0xff] %v3032_v62  ;;  %6120 = vrcp.f32 %v3008_v7 }
 0xc30   : > { %v6115_v1 = vpop.eup %6114 }
 0xc31   : > { %v3004_v8 = vpop.xlane.xlu1 %3003  ;;  %v3010_v21 = vpop.xlane.xlu0 %3009  ;;  %v3028_v24 = vmul.f32 %v6115_v1, %v8442_v10 }
 0xc32   : > { %6122 = vrcp.f32 %v3004_v8 }
 0xc33   : > { %6124 = vrcp.f32 %v3010_v21  ;;  %4974 = vst [vmem:[%s7749_s24 + $0x180] sm:$0xff] %v3028_v24 }
 0xc34   : > { %v6117_v32 = vpop.eup %6116 }
 0xc35   : > { %v3034_v52 = vmul.f32 %v6117_v32, %v8445_v35  ;;  %v3006_v56 = vpop.xlane.xlu0 %3005  ;;  %v3099_v27 = vpop.permute.xlu1 %3098 }
 0xc36   : > { %6126 = vrcp.f32 %v3006_v56 }
 0xc37   : > { %4977 = vst [vmem:[%s7749_s24 + $0x198] sm:$0xff] %v3034_v52  ;;  %v3077_v61 = vpack.c.bf16 %v3034_v52, %v3032_v62 }
 0xc38   : > { %v6119_v44 = vpop.eup %6118 }
 0xc39   : > { %v6121_v37 = vpop.eup %6120  ;;  %v3097_v43 = vpop.permute.xlu0 %3096  ;;  %v3030_v31 = vmul.f32 %v6119_v44, %v8448_v3 }
 0xc3a   : > { %5538 = vmatprep.subr.bf16.mxu0 %v3097_v43  ;;  %v3040_v10 = vmul.f32 %v6121_v37, %v8450_v15 }
 0xc3b   : > { %5539 = vmatpush3.bf16.msra.mxu0 %v3097_v43  ;;  %4975 = vst [vmem:[%s7749_s24 + $0x188] sm:$0xff] %v3030_v31  ;;  %v3076_v39 = vpack.c.bf16 %v3030_v31, %v3028_v24 }
 0xc3c   : > { %v6123_v35 = vpop.eup %6122  ;;  %5540 = vmatprep.subr.bf16.mxu0 %v3099_v27  ;;  %4980 = vst [vmem:[%s7749_s24 + $0x1b0] sm:$0xff] %v3040_v10 }
 0xc3d   : > { %v6125_v45 = vpop.eup %6124  ;;  %5542 = vmatprep.mubr.bf16.mxu0 %v3076_v39  ;;  %v3036_v5 = vmul.f32 %v6123_v35, %v8456_v63  ;;  %v5840_v35 = vld [vmem:[#allocation11] sm:$0xff]  }
 0xc3e   : > { %v3042_v41 = vmul.f32 %v6125_v45, %v8454_v4  ;;  %v5841_v45 = vld [vmem:[#allocation11 + $0x8] sm:$0xff]  }
 0xc3f   : > { %5541 = vmatpush3.bf16.msra.mxu0 %v3099_v27  ;;  %4978 = vst [vmem:[%s7749_s24 + $0x1a0] sm:$0xff] %v3036_v5 }
 0xc40   : > { %v6127_v3 = vpop.eup %6126  ;;  %4981 = vst [vmem:[%s7749_s24 + $0x1b8] sm:$0xff] %v3042_v41  ;;  %v3079_v54 = vpack.c.bf16 %v3042_v41, %v3040_v10  ;;  %5558 = vmatprep.subr.bf16.mxu0 %v5840_v35  ;;  %v5843_v41 = vld [vmem:[#allocation11 + $0x18] sm:$0xff]  }
 0xc41   : > { %v3038_v15 = vmul.f32 %v6127_v3, %v8460_v55  ;;  %v5844_v3 = vld [vmem:[#allocation11 + $0x20] sm:$0xff]  }
 0xc42   : > { %5543 = vmatmul.mubr.bf16.vlgmr.msra.gmra.mrb[80].mxu0 %v3077_v61  ;;  %v5845_v61 = vld [vmem:[#allocation11 + $0x28] sm:$0xff]  }
 0xc43   : > { %4979 = vst [vmem:[%s7749_s24 + $0x1a8] sm:$0xff] %v3038_v15  ;;  %v3078_v48 = vpack.c.bf16 %v3038_v15, %v3036_v5  ;;  %5559 = vmatpush3.bf16.msra.mxu0 %v5840_v35  ;;  %v5842_v5 = vld [vmem:[#allocation11 + $0x10] sm:$0xff]  }
 0xc44   : > { %5560 = vmatprep.subr.bf16.mxu0 %v5841_v45  ;;  %v5846_v15 = vld [vmem:[#allocation11 + $0x30] sm:$0xff]  }
 0xc45   : > { %5546 = vmatprep.mubr.bf16.mxu0 %v3078_v48 }
 0xc47   : > { %5561 = vmatpush3.bf16.msra.mxu0 %v5841_v45 }
 0xc48   : > { %5562 = vmatprep.subr.bf16.mxu0 %v5842_v5 }
 0xc4a   : > { %5547 = vmatmul.mubr.bf16.gmra.mrb[84].mxu0 %v3079_v54  ;;  %v5847_v54 = vld [vmem:[#allocation11 + $0x38] sm:$0xff]  }
 0xc4b   : > { %5563 = vmatpush3.bf16.msra.mxu0 %v5842_v5 }
 0xc4c   : > { %5564 = vmatprep.subr.bf16.mxu0 %v5843_v41 }
 0xc4f   : > { %5565 = vmatpush3.bf16.msra.mxu0 %v5843_v41 }
 0xc50   : > { %5566 = vmatprep.subr.bf16.mxu0 %v5844_v3 }
 0xc53   : > { %5567 = vmatpush3.bf16.msra.mxu0 %v5844_v3 }
 0xc54   : > { %5568 = vmatprep.subr.bf16.mxu0 %v5845_v61 }
 0xc57   : > { %5569 = vmatpush3.bf16.msra.mxu0 %v5845_v61 }
 0xc58   : > { %5570 = vmatprep.subr.bf16.mxu0 %v5846_v15 }
 0xc5b   : > { %5571 = vmatpush3.bf16.msra.mxu0 %v5846_v15 }
 0xc5c   : > { %5572 = vmatprep.subr.bf16.mxu0 %v5847_v54 }
 0xc5f   : > { %5573 = vmatpush3.bf16.msra.mxu0 %v5847_v54 }
 0xc66   : > { %v3012_v28 = vpop.xlane.xlu1 %3011 }
 0xc67   : > { %6128 = vrcp.f32 %v3012_v28 }
 0xc6a   : > { %v3018_v23 = vpop.xlane.xlu1 %3017  ;;  %v3014_v63 = vpop.xlane.xlu0 %3013 }
 0xc6b   : > { %6130 = vrcp.f32 %v3018_v23 }
 0xc6c   : > { %6132 = vrcp.f32 %v3014_v63 }
 0xc6e   : > { %v3016_v4 = vpop.xlane.xlu0 %3015 }
 0xc6f   : > { %6134 = vrcp.f32 %v3016_v4 }
 0xc70   : > { %v3022_v53 = vpop.xlane.xlu1 %3021 }
 0xc71   : > { %v6129_v38 = vpop.eup %6128  ;;  %6136 = vrcp.f32 %v3022_v53  ;;  %v9487_v53 = vld [vmem:[#allocation62_spill] sm:$0xff] }
 0xc72   : > { %v3020_v55 = vpop.xlane.xlu0 %3019  ;;  %v3044_v58 = vmul.f32 %v6129_v38, %v8475_v20 }
 0xc73   : > { %6138 = vrcp.f32 %v3020_v55 }
 0xc74   : > { %v3026_v49 = vpop.xlane.xlu1 %3025  ;;  %4982 = vst [vmem:[%s7749_s24 + $0x1c0] sm:$0xff] %v3044_v58 }
 0xc75   : > { %v6131_v2 = vpop.eup %6130  ;;  %6140 = vrcp.f32 %v3026_v49 }
 0xc76   : > { %v6133_v18 = vpop.eup %6132  ;;  %v3024_v6 = vpop.xlane.xlu0 %3023  ;;  %v3050_v51 = vmul.f32 %v6131_v2, %v8478_v26  ;;  %v9489_v2 = vld [vmem:[#allocation67_spill] sm:$0xff] }
 0xc77   : > { %6142 = vrcp.f32 %v3024_v6  ;;  %v3046_v11 = vmul.f32 %v6133_v18, %v8480_v0 }
 0xc78   : > { %v2096_v16 = vpop.permute.xlu1 %2095  ;;  %4985 = vst [vmem:[%s7749_s24 + $0x1d8] sm:$0xff] %v3050_v51 }
 0xc79   : > { %v6135_v40 = vpop.eup %6134  ;;  %2143 = vst.msk [vmem:[#allocation2 + $0x8] sm:$0xff] %vm2141_vm0, %v2096_v16  ;;  %4983 = vst [vmem:[%s7749_s24 + $0x1c8] sm:$0xff] %v3046_v11  ;;  %v3080_v20 = vpack.c.bf16 %v3046_v11, %v3044_v58  ;;  %v9488_v58 = vld [vmem:[#allocation64_spill] sm:$0xff] }
 0xc7a   : > { %v2094_v19 = vpop.permute.xlu0 %2093  ;;  %v3048_v14 = vmul.f32 %v6135_v40, %v8484_v9  ;;  %v9492_v40 = vld [vmem:[#allocation68_spill] sm:$0xff] }
 0xc7b   : > { %v6137_v47 = vpop.eup %6136  ;;  %5550 = vmatprep.mubr.bf16.mxu0 %v3080_v20  ;;  %2142 = vst.msk [vmem:[#allocation2] sm:$0xff] %vm2141_vm0, %v2094_v19 }
 0xc7c   : > { %v2098_v26 = vpop.permute.xlu1 %2097  ;;  %4984 = vst [vmem:[%s7749_s24 + $0x1d0] sm:$0xff] %v3048_v14  ;;  %v3081_v57 = vpack.c.bf16 %v3050_v51, %v3048_v14  ;;  %v3054_v0 = vmul.f32 %v6137_v47, %v8487_v60 }
 0xc7d   : > { %v6139_v50 = vpop.eup %6138  ;;  %2144 = vst.msk [vmem:[#allocation2 + $0x10] sm:$0xff] %vm2141_vm0, %v2098_v26 }
 0xc7e   : > { %5551 = vmatmul.mubr.bf16.gmra.mrb[88].mxu0 %v3081_v57  ;;  %v2658_v62 = vpop.permute.xlu0 %2657  ;;  %v3052_v42 = vmul.f32 %v6139_v50, %v8490_v12  ;;  %4987 = vst [vmem:[%s7749_s24 + $0x1e8] sm:$0xff] %v3054_v0 }
 0xc7f   : > { %v6141_v9 = vpop.eup %6140  ;;  %2706 = vst.msk [vmem:[#allocation2] sm:$0xff] %vm2705_vm2, %v2658_v62 }
 0xc80   : > { %v2100_v7 = vpop.permute.xlu1 %2099  ;;  %4986 = vst [vmem:[%s7749_s24 + $0x1e0] sm:$0xff] %v3052_v42  ;;  %v3082_v1 = vpack.c.bf16 %v3054_v0, %v3052_v42  ;;  %v3058_v8 = vmul.f32 %v6141_v9, %v8493_v46 }
 0xc81   : > { %v6143_v21 = vpop.eup %6142  ;;  %2145 = vst.msk [vmem:[#allocation2 + $0x18] sm:$0xff] %vm2141_vm0, %v2100_v7 }
 0xc82   : > { %5554 = vmatprep.mubr.bf16.mxu0 %v3082_v1  ;;  %v2662_v60 = vpop.permute.xlu0 %2661  ;;  %v3056_v24 = vmul.f32 %v6143_v21, %v8496_v29  ;;  %4989 = vst [vmem:[%s7749_s24 + $0x1f8] sm:$0xff] %v3058_v8 }
 0xc83   : > { %2708 = vst.msk [vmem:[#allocation2 + $0x10] sm:$0xff] %vm2705_vm2, %v2662_v60 }
 0xc84   : > { %v2660_v12 = vpop.permute.xlu1 %2659  ;;  %4988 = vst [vmem:[%s7749_s24 + $0x1f0] sm:$0xff] %v3056_v24  ;;  %v3083_v32 = vpack.c.bf16 %v3058_v8, %v3056_v24 }
 0xc85   : > { %2707 = vst.msk [vmem:[#allocation2 + $0x8] sm:$0xff] %vm2705_vm2, %v2660_v12 }
 0xc86   : > { %5555 = vmatmul.mubr.bf16.gmra.mrb[92].mxu0 %v3083_v32  ;;  %v2102_v52 = vpop.permute.xlu0 %2101 }
 0xc87   : > { %2146 = vst.msk [vmem:[#allocation2 + $0x20] sm:$0xff] %vm2141_vm0, %v2102_v52 }
 0xc88   : > { %v2664_v46 = vpop.permute.xlu1 %2663 }
 0xc89   : > { %2709 = vst.msk [vmem:[#allocation2 + $0x18] sm:$0xff] %vm2705_vm2, %v2664_v46 }
 0xc8a   : > { %v2106_v56 = vpop.permute.xlu0 %2105 }
 0xc8b   : > { %2148 = vst.msk [vmem:[#allocation2 + $0x30] sm:$0xff] %vm2141_vm0, %v2106_v56 }
 0xc8c   : > { %v2104_v44 = vpop.permute.xlu1 %2103 }
 0xc8d   : > { %2147 = vst.msk [vmem:[#allocation2 + $0x28] sm:$0xff] %vm2141_vm0, %v2104_v44 }
 0xc8e   : > { %v2666_v29 = vpop.permute.xlu0 %2665 }
 0xc8f   : > { %2710 = vst.msk [vmem:[#allocation2 + $0x20] sm:$0xff] %vm2705_vm2, %v2666_v29 }
 0xc90   : > { %v2108_v37 = vpop.permute.xlu1 %2107 }
 0xc91   : > { %2149 = vst.msk [vmem:[#allocation2 + $0x38] sm:$0xff] %vm2141_vm0, %v2108_v37 }
 0xc92   : > { %v2670_v43 = vpop.permute.xlu0 %2669 }
 0xc93   : > { %2712 = vst.msk [vmem:[#allocation2 + $0x30] sm:$0xff] %vm2705_vm2, %v2670_v43 }
 0xc94   : > { %v2668_v31 = vpop.permute.xlu1 %2667 }
 0xc95   : > { %2711 = vst.msk [vmem:[#allocation2 + $0x28] sm:$0xff] %vm2705_vm2, %v2668_v31 }
 0xc96   : > { %v2110_v10 = vpop.permute.xlu0 %2109 }
 0xc97   : > { %2150 = vst.msk [vmem:[#allocation2 + $0x40] sm:$0xff] %vm2141_vm0, %v2110_v10 }
 0xc98   : > { %v2672_v27 = vpop.permute.xlu1 %2671 }
 0xc99   : > { %2713 = vst.msk [vmem:[#allocation2 + $0x38] sm:$0xff] %vm2705_vm2, %v2672_v27 }
 0xc9c   : > { %v2112_v39 = vpop.permute.xlu1 %2111 }
 0xc9d   : > { %2151 = vst.msk [vmem:[#allocation2 + $0x48] sm:$0xff] %vm2141_vm0, %v2112_v39 }
 0xd15   : > { %v5544_v48 = vpop.f32.mrb[80].mxu0 }
 0xd16   : > { %3225 = vrot.lane.b32.xlu0 %v5544_v48, %s6777_s13  ;;  %v3142_v28 = vpop.f32.mrb[81].mxu0 }
 0xd17   : > { %v5545_v23 = vpop.f32.mrb[82].mxu0 }
 0xd18   : > { %3227 = vrot.lane.b32.xlu1 %v5545_v23, %s6777_s13  ;;  %v3145_v63 = vpop.f32.mrb[83].mxu0 }
 0xd1a   : > { %3221 = vrot.lane.b32.xlu0 %v3142_v28, %s6777_s13 }
 0xd1c   : > { %3223 = vrot.lane.b32.xlu1 %v3145_v63, %s6777_s13 }
 0xd1d   : > { %v5548_v4 = vpop.f32.mrb[84].mxu0 }
 0xd1e   : > { %2113 = vrot.lane.b32.xlu0 %v9487_v53, %s6780_s30  ;;  %v3158_v38 = vpop.f32.mrb[85].mxu0 }
 0xd1f   : > { %v5549_v55 = vpop.f32.mrb[86].mxu0 }
 0xd20   : > { %2115 = vrot.lane.b32.xlu1 %v9488_v58, %s6780_s30  ;;  %v3161_v49 = vpop.f32.mrb[87].mxu0 }
 0xd22   : > { %2673 = vrot.lane.b32.xlu0 %v8353_v33, %s6779_s20  ;;  %v9490_v33 = vld [vmem:[#allocation69_spill] sm:$0xff] }
 0xd24   : > { %2675 = vrot.lane.b32.xlu1 %v8357_v34, %s6779_s20 }
 0xd26   : > { %3233 = vrot.lane.b32.xlu0 %v5548_v4, %s6777_s13 }
 0xd28   : > { %3235 = vrot.lane.b32.xlu1 %v5549_v55, %s6777_s13 }
 0xd2a   : > { %3229 = vrot.lane.b32.xlu0 %v3158_v38, %s6777_s13 }
 0xd2c   : > { %3231 = vrot.lane.b32.xlu1 %v3161_v49, %s6777_s13 }
 0xd2e   : > { %2677 = vrot.lane.b32.xlu0 %v8351_v13, %s6779_s20 }
 0xd30   : > { %2679 = vrot.lane.b32.xlu1 %v8355_v59, %s6779_s20  ;;  %v9491_v59 = vld [vmem:[#allocation66_spill] sm:$0xff] }
 0xd32   : > { %2117 = vrot.lane.b32.xlu0 %v9489_v2, %s6780_s30 }
 0xd34   : > { %2119 = vrot.lane.b32.xlu1 %v9490_v33, %s6780_s30 }
 0xd51   : > { %v5552_v34 = vpop.f32.mrb[88].mxu0 }
 0xd52   : > { %3241 = vrot.lane.b32.xlu0 %v5552_v34, %s6777_s13  ;;  %v3174_v18 = vpop.f32.mrb[89].mxu0 }
 0xd53   : > { %v5553_v6 = vpop.f32.mrb[90].mxu0 }
 0xd54   : > { %3243 = vrot.lane.b32.xlu1 %v5553_v6, %s6777_s13  ;;  %v3177_v51 = vpop.f32.mrb[91].mxu0 }
 0xd56   : > { %3237 = vrot.lane.b32.xlu0 %v3174_v18, %s6777_s13  ;;  %v8659_v18 = vld [vmem:[#allocation12] ss:$0 sm:$0xff] }
 0xd58   : > { %3239 = vrot.lane.b32.xlu1 %v3177_v51, %s6777_s13 }
 0xd59   : > { %v5556_v13 = vpop.f32.mrb[92].mxu0 }
 0xd5a   : > { %2121 = vrot.lane.b32.xlu0 %v9491_v59, %s6780_s30  ;;  %v3190_v11 = vpop.f32.mrb[93].mxu0 }
 0xd5b   : > { %v5557_v16 = vpop.f32.mrb[94].mxu0 }
 0xd5c   : > { %2123 = vrot.lane.b32.xlu1 %v9492_v40, %s6780_s30  ;;  %v3193_v20 = vpop.f32.mrb[95].mxu0  ;;  %v6272_v40 = vld [vmem:[%s7258_s7] sm:$0xff] }
 0xd5e   : > { %2681 = vrot.lane.b32.xlu0 %v8361_v17, %s6779_s20 }
 0xd60   : > { %2683 = vrot.lane.b32.xlu1 %v8365_v36, %s6779_s20 }
 0xd62   : > { %2685 = vrot.lane.b32.xlu0 %v8359_v25, %s6779_s20 }
 0xd64   : > { %2687 = vrot.lane.b32.xlu1 %v8363_v22, %s6779_s20 }
 0xd66   : > { %3245 = vrot.lane.b32.xlu0 %v3190_v11, %s6777_s13 }
 0xd68   : > { %3247 = vrot.lane.b32.xlu1 %v3193_v20, %s6777_s13 }
 0xd6a   : > { %3249 = vrot.lane.b32.xlu0 %v5556_v13, %s6777_s13 }
 0xd6c   : > { %3251 = vrot.lane.b32.xlu1 %v5557_v16, %s6777_s13  ;;  %s6636_s13 = scalar_lea.vmem %s6635_s18, 16384 }
 0xd6d   : > { %p6638_p13 = scmp.lt.s32.totalorder %s6636_s13, %s6630_s5 }
 0xd6f   : > { %p6639_p1 = por %p6638_p13, %p6637_p12 }
 0xd71   : > { %p6640_p3 = pnand %p6639_p1, %p6633_p0 }
 0xd88   : > { %v3226_v19 = vpop.permute.xlu0 %3225 }
 0xd89   : > { %3272 = vst.msk [vmem:[#allocation2 + $0x10] sm:$0xff] %vm3269_vm3, %v3226_v19 }
 0xd8a   : > { %v3228_v17 = vpop.permute.xlu1 %3227 }
 0xd8b   : > { %3273 = vst.msk [vmem:[#allocation2 + $0x18] sm:$0xff] %vm3269_vm3, %v3228_v17  ;;  %v6273_v17 = vld [vmem:[%s7258_s7 + $0x8] sm:$0xff] }
 0xd8c   : > { %v3222_v36 = vpop.permute.xlu0 %3221 }
 0xd8d   : > { %3270 = vst.msk [vmem:[#allocation2] sm:$0xff] %vm3269_vm3, %v3222_v36 }
 0xd8e   : > { %v3224_v25 = vpop.permute.xlu1 %3223 }
 0xd8f   : > { %3271 = vst.msk [vmem:[#allocation2 + $0x8] sm:$0xff] %vm3269_vm3, %v3224_v25  ;;  %v6274_v25 = vld [vmem:[%s7258_s7 + $0x10] sm:$0xff] }
 0xd90   : > { %v2114_v22 = vpop.permute.xlu0 %2113  ;;  %v3288_v42 = vld [vmem:[#allocation2 + $0x10] sm:$0xff] }
 0xd91   : > { %2152 = vst.msk [vmem:[#allocation2 + $0x50] sm:$0xff] %vm2141_vm0, %v2114_v22 }
 0xd92   : > { %v2116_v14 = vpop.permute.xlu1 %2115  ;;  %v3289_v26 = vld [vmem:[#allocation2 + $0x18] sm:$0xff] }
 0xd93   : > { %2153 = vst.msk [vmem:[#allocation2 + $0x58] sm:$0xff] %vm2141_vm0, %v2116_v14  ;;  %v3303_v7 = vpack.c.bf16 %v3289_v26, %v3288_v42 }
 0xd94   : > { %v2674_v47 = vpop.permute.xlu0 %2673  ;;  %v3286_v0 = vld [vmem:[#allocation2] sm:$0xff] }
 0xd95   : > { %2714 = vst.msk [vmem:[#allocation2 + $0x40] sm:$0xff] %vm2705_vm2, %v2674_v47  ;;  %v6275_v47 = vld [vmem:[%s7258_s7 + $0x18] sm:$0xff] }
 0xd96   : > { %v2676_v57 = vpop.permute.xlu1 %2675  ;;  %v3287_v50 = vld [vmem:[#allocation2 + $0x8] sm:$0xff] }
 0xd97   : > { %2715 = vst.msk [vmem:[#allocation2 + $0x48] sm:$0xff] %vm2705_vm2, %v2676_v57  ;;  %v3302_v62 = vpack.c.bf16 %v3287_v50, %v3286_v0 }
 0xd98   : > { %v3234_v9 = vpop.permute.xlu0 %3233 }
 0xd99   : > { %3276 = vst.msk [vmem:[#allocation2 + $0x30] sm:$0xff] %vm3269_vm3, %v3234_v9  ;;  %5574 = vmatprep.mubr.bf16.mxu0 %v3302_v62 }
 0xd9a   : > { %v3236_v1 = vpop.permute.xlu1 %3235  ;;  %5575 = vmatmul.mubr.bf16.vlgmr.msra.gmra.mrb[96].mxu0 %v3303_v7  ;;  %v6276_v7 = vld [vmem:[%s7258_s7 + $0x20] sm:$0xff] }
 0xd9b   : > { %3277 = vst.msk [vmem:[#allocation2 + $0x38] sm:$0xff] %vm3269_vm3, %v3236_v1 }
 0xd9c   : > { %v3230_v8 = vpop.permute.xlu0 %3229 }
 0xd9d   : > { %3274 = vst.msk [vmem:[#allocation2 + $0x20] sm:$0xff] %vm3269_vm3, %v3230_v8 }
 0xd9e   : > { %v3232_v21 = vpop.permute.xlu1 %3231 }
 0xd9f   : > { %3275 = vst.msk [vmem:[#allocation2 + $0x28] sm:$0xff] %vm3269_vm3, %v3232_v21 }
 0xda0   : > { %v2678_v60 = vpop.permute.xlu0 %2677  ;;  %v3292_v29 = vld [vmem:[#allocation2 + $0x30] sm:$0xff] }
 0xda1   : > { %2716 = vst.msk [vmem:[#allocation2 + $0x50] sm:$0xff] %vm2705_vm2, %v2678_v60  ;;  %v6277_v60 = vld [vmem:[%s7258_s7 + $0x28] sm:$0xff] }
 0xda2   : > { %v2680_v24 = vpop.permute.xlu1 %2679  ;;  %v3293_v32 = vld [vmem:[#allocation2 + $0x38] sm:$0xff] }
 0xda3   : > { %2717 = vst.msk [vmem:[#allocation2 + $0x58] sm:$0xff] %vm2705_vm2, %v2680_v24  ;;  %v3305_v37 = vpack.c.bf16 %v3293_v32, %v3292_v29 }
 0xda4   : > { %v2118_v12 = vpop.permute.xlu0 %2117  ;;  %v3290_v46 = vld [vmem:[#allocation2 + $0x20] sm:$0xff] }
 0xda5   : > { %2154 = vst.msk [vmem:[#allocation2 + $0x60] sm:$0xff] %vm2141_vm0, %v2118_v12  ;;  %v6278_v12 = vld [vmem:[%s7258_s7 + $0x30] sm:$0xff] }
 0xda6   : > { %v2120_v52 = vpop.permute.xlu1 %2119  ;;  %v3291_v56 = vld [vmem:[#allocation2 + $0x28] sm:$0xff] }
 0xda7   : > { %2155 = vst.msk [vmem:[#allocation2 + $0x68] sm:$0xff] %vm2141_vm0, %v2120_v52  ;;  %v3304_v44 = vpack.c.bf16 %v3291_v56, %v3290_v46  ;;  %v6279_v52 = vld [vmem:[%s7258_s7 + $0x38] sm:$0xff] }
 0xda9   : > { %5578 = vmatprep.mubr.bf16.mxu0 %v3304_v44 }
 0xdaa   : > { %5579 = vmatmul.mubr.bf16.gmra.mrb[100].mxu0 %v3305_v37 }
 0xdc4   : > { %v3242_v43 = vpop.permute.xlu0 %3241 }
 0xdc5   : > { %3280 = vst.msk [vmem:[#allocation2 + $0x50] sm:$0xff] %vm3269_vm3, %v3242_v43 }
 0xdc6   : > { %v3244_v31 = vpop.permute.xlu1 %3243 }
 0xdc7   : > { %3281 = vst.msk [vmem:[#allocation2 + $0x58] sm:$0xff] %vm3269_vm3, %v3244_v31 }
 0xdc8   : > { %v3238_v10 = vpop.permute.xlu0 %3237 }
 0xdc9   : > { %3278 = vst.msk [vmem:[#allocation2 + $0x40] sm:$0xff] %vm3269_vm3, %v3238_v10  ;;  %v6280_v10 = vld [vmem:[%s7258_s7 + $0x40] sm:$0xff] }
 0xdca   : > { %v3240_v27 = vpop.permute.xlu1 %3239 }
 0xdcb   : > { %3279 = vst.msk [vmem:[#allocation2 + $0x48] sm:$0xff] %vm3269_vm3, %v3240_v27 }
 0xdcc   : > { %v2122_v39 = vpop.permute.xlu0 %2121  ;;  %v3296_v48 = vld [vmem:[#allocation2 + $0x50] sm:$0xff] }
 0xdcd   : > { %2156 = vst.msk [vmem:[#allocation2 + $0x70] sm:$0xff] %vm2141_vm0, %v2122_v39 }
 0xdce   : > { %v2124_v35 = vpop.permute.xlu1 %2123  ;;  %v3297_v5 = vld [vmem:[#allocation2 + $0x58] sm:$0xff] }
 0xdcf   : > { %2157 = vst.msk [vmem:[#allocation2 + $0x78] sm:$0xff] %vm2141_vm0, %v2124_v35  ;;  %v3307_v28 = vpack.c.bf16 %v3297_v5, %v3296_v48 }
 0xdd0   : > { %v2682_v45 = vpop.permute.xlu0 %2681  ;;  %v3294_v3 = vld [vmem:[#allocation2 + $0x40] sm:$0xff] }
 0xdd1   : > { %2718 = vst.msk [vmem:[#allocation2 + $0x60] sm:$0xff] %vm2705_vm2, %v2682_v45  ;;  %v6281_v45 = vld [vmem:[%s7258_s7 + $0x48] sm:$0xff] }
 0xdd2   : > { %v2684_v41 = vpop.permute.xlu1 %2683  ;;  %v3295_v61 = vld [vmem:[#allocation2 + $0x48] sm:$0xff] }
 0xdd3   : > { %2719 = vst.msk [vmem:[#allocation2 + $0x68] sm:$0xff] %vm2705_vm2, %v2684_v41  ;;  %v3306_v15 = vpack.c.bf16 %v3295_v61, %v3294_v3  ;;  %v6282_v41 = vld [vmem:[%s7258_s7 + $0x50] sm:$0xff]  ;;  %v6283_v61 = vld [vmem:[%s7258_s7 + $0x58] sm:$0xff] }
 0xdd4   : > { %v2686_v54 = vpop.permute.xlu0 %2685 }
 0xdd5   : > { %2720 = vst.msk [vmem:[#allocation2 + $0x70] sm:$0xff] %vm2705_vm2, %v2686_v54  ;;  %5582 = vmatprep.mubr.bf16.mxu0 %v3306_v15 }
 0xdd6   : > { %v2688_v23 = vpop.permute.xlu1 %2687  ;;  %5583 = vmatmul.mubr.bf16.gmra.mrb[104].mxu0 %v3307_v28 }
 0xdd7   : > { %2721 = vst.msk [vmem:[#allocation2 + $0x78] sm:$0xff] %vm2705_vm2, %v2688_v23 }
 0xdd8   : > { %v3246_v63 = vpop.permute.xlu0 %3245 }
 0xdd9   : > { %3282 = vst.msk [vmem:[#allocation2 + $0x60] sm:$0xff] %vm3269_vm3, %v3246_v63 }
 0xdda   : > { %v3248_v4 = vpop.permute.xlu1 %3247 }
 0xddb   : > { %3283 = vst.msk [vmem:[#allocation2 + $0x68] sm:$0xff] %vm3269_vm3, %v3248_v4 }
 0xddc   : > { %v3250_v53 = vpop.permute.xlu0 %3249 }
 0xddd   : > { %3284 = vst.msk [vmem:[#allocation2 + $0x70] sm:$0xff] %vm3269_vm3, %v3250_v53  ;;  %v6284_v53 = vld [vmem:[%s7258_s7 + $0x60] sm:$0xff] }
 0xdde   : > { %v3252_v38 = vpop.permute.xlu1 %3251 }
 0xddf   : > { %3285 = vst.msk [vmem:[#allocation2 + $0x78] sm:$0xff] %vm3269_vm3, %v3252_v38 }
 0xde0   : > { %v3298_v55 = vld [vmem:[#allocation2 + $0x60] sm:$0xff] }
 0xde2   : > { %v3299_v58 = vld [vmem:[#allocation2 + $0x68] sm:$0xff] }
 0xde3   : > { %v3308_v49 = vpack.c.bf16 %v3299_v58, %v3298_v55 }
 0xde4   : > { %v3300_v2 = vld [vmem:[#allocation2 + $0x70] sm:$0xff] }
 0xde5   : > { %5586 = vmatprep.mubr.bf16.mxu0 %v3308_v49  ;;  %v6285_v49 = vld [vmem:[%s7258_s7 + $0x68] sm:$0xff] }
 0xde6   : > { %v3301_v33 = vld [vmem:[#allocation2 + $0x78] sm:$0xff] }
 0xde7   : > { %v3309_v34 = vpack.c.bf16 %v3301_v33, %v3300_v2  ;;  %v6286_v33 = vld [vmem:[%s7258_s7 + $0x70] sm:$0xff] }
 0xde9   : > { %5587 = vmatmul.mubr.bf16.gmra.mrb[108].mxu0 %v3309_v34 }
 0xe6d   : > { %v5576_v6 = vpop.f32.mrb[96].mxu0 }
 0xe6e   : > { %v3415_v51 = vpop.f32.mrb[97].mxu0  ;;  %v3424_v16 = vadd.f32 %v5576_v6, %v8659_v18  ;;  %v6287_v6 = vld [vmem:[%s7258_s7 + $0x78] sm:$0xff]  ;;  %s4600_s7 = scalar_lea.sflag [#allocation25], %s7251_s19 }
 0xe6f   : > { %v3416_v13 = vadd.f32 %v8659_v18, %v3415_v51  ;;  %v5577_v59 = vpop.f32.mrb[98].mxu0 }
 0xe70   : > { %v3418_v11 = vpop.f32.mrb[99].mxu0  ;;  %v8672_v22 = vadd.f32 %v6274_v25, %v3424_v16  ;;  %v3427_v14 = vadd.f32 %v5577_v59, %v8659_v18  ;;  %v5850_v59 = vld [vmem:[#allocation17 + $0x4] ss:$8 sps:$4 sm:$0xff]  }
 0xe71   : > { %v8664_v20 = vadd.f32 %v6272_v40, %v3416_v13  ;;  %v3419_v19 = vadd.f32 %v8659_v18, %v3418_v11  ;;  %v5848_v13 = vld [vmem:[#allocation17] ss:$8 sps:$4 sm:$0xff]   ;;  %3833 = vmatprep.subr.bf16.mxu1 %v5850_v59  ;;  %v5851_v11 = vld [vmem:[#allocation17 + $0x10] ss:$8 sps:$4 sm:$0xff]  }
 0xe72   : > { %v8678_v26 = vadd.f32 %v6275_v47, %v3427_v14  ;;  %3834 = vmatpush1.bf16.msra.mxu1 %v5848_v13 }
 0xe73   : > { %v8668_v36 = vadd.f32 %v6273_v17, %v3419_v19  ;;  %3494 = vadd.xlane.f32.xlu0 %v8664_v20 }
 0xe75   : > { %3496 = vadd.xlane.f32.xlu1 %v8668_v36 }
 0xe77   : > { %3498 = vadd.xlane.f32.xlu0 %v8672_v22 }
 0xe7b   : > { %3500 = vadd.xlane.f32.xlu0 %v8678_v26 }
 0xe7d   : > { %v5580_v57 = vpop.f32.mrb[100].mxu0 }
 0xe7e   : > { %v3431_v0 = vpop.f32.mrb[101].mxu0  ;;  %v3440_v9 = vadd.f32 %v5580_v57, %v8659_v18 }
 0xe7f   : > { %v3432_v50 = vadd.f32 %v8659_v18, %v3431_v0  ;;  %v5581_v62 = vpop.f32.mrb[102].mxu0 }
 0xe80   : > { %v3434_v42 = vpop.f32.mrb[103].mxu0  ;;  %v3443_v21 = vadd.f32 %v5581_v62, %v8659_v18  ;;  %v8693_v32 = vadd.f32 %v6278_v12, %v3440_v9 }
 0xe81   : > { %v8684_v1 = vadd.f32 %v6276_v7, %v3432_v50  ;;  %v3435_v8 = vadd.f32 %v8659_v18, %v3434_v42 }
 0xe82   : > { %v8697_v46 = vadd.f32 %v6279_v52, %v3443_v21 }
 0xe83   : > { %v8689_v24 = vadd.f32 %v6277_v60, %v3435_v8  ;;  %3502 = vadd.xlane.f32.xlu0 %v8684_v1 }
 0xe85   : > { %3504 = vadd.xlane.f32.xlu1 %v8689_v24 }
 0xe87   : > { %3506 = vadd.xlane.f32.xlu0 %v8693_v32 }
 0xe89   : > { %3508 = vadd.xlane.f32.xlu1 %v8697_v46 }
 0xea9   : > { %v5584_v56 = vpop.f32.mrb[104].mxu0 }
 0xeaa   : > { %v3447_v44 = vpop.f32.mrb[105].mxu0  ;;  %v3456_v31 = vadd.f32 %v5584_v56, %v8659_v18 }
 0xeab   : > { %v3448_v29 = vadd.f32 %v8659_v18, %v3447_v44  ;;  %v5585_v37 = vpop.f32.mrb[106].mxu0 }
 0xeac   : > { %v3450_v43 = vpop.f32.mrb[107].mxu0  ;;  %v3459_v35 = vadd.f32 %v5585_v37, %v8659_v18  ;;  %v8713_v3 = vadd.f32 %v6282_v41, %v3456_v31  ;;  %v5862_v41 = vld [vmem:[#allocation17 + $0x44] ss:$8 sps:$4 sm:$0xff]  }
 0xead   : > { %v8704_v27 = vadd.f32 %v6280_v10, %v3448_v29  ;;  %v3451_v39 = vadd.f32 %v8659_v18, %v3450_v43  ;;  %v5856_v29 = vld [vmem:[#allocation17 + $0x24] ss:$8 sps:$4 sm:$0xff]   ;;  %v5854_v43 = vld [vmem:[#allocation17 + $0x20] ss:$8 sps:$4 sm:$0xff]  }
 0xeae   : > { %v8717_v15 = vadd.f32 %v6283_v61, %v3459_v35  ;;  %v5859_v35 = vld [vmem:[#allocation17 + $0x34] ss:$8 sps:$4 sm:$0xff]   ;;  %v5860_v61 = vld [vmem:[#allocation17 + $0x40] ss:$8 sps:$4 sm:$0xff]  }
 0xeaf   : > { %v8709_v5 = vadd.f32 %v6281_v45, %v3451_v39  ;;  %3510 = vadd.xlane.f32.xlu0 %v8704_v27  ;;  %v5857_v45 = vld [vmem:[#allocation17 + $0x30] ss:$8 sps:$4 sm:$0xff]  }
 0xeb1   : > { %3512 = vadd.xlane.f32.xlu1 %v8709_v5 }
 0xeb3   : > { %3514 = vadd.xlane.f32.xlu0 %v8713_v3 }
 0xeb5   : > { %3516 = vadd.xlane.f32.xlu1 %v8717_v15 }
 0xebc   : > { %v5588_v48 = vpop.f32.mrb[108].mxu0 }
 0xebd   : > { %v3463_v54 = vpop.f32.mrb[109].mxu0  ;;  %v3472_v4 = vadd.f32 %v5588_v48, %v8659_v18  ;;  %v5865_v48 = vld [vmem:[#allocation17 + $0x54] ss:$8 sps:$4 sm:$0xff]  }
 0xebe   : > { %v3464_v28 = vadd.f32 %v8659_v18, %v3463_v54  ;;  %v5589_v23 = vpop.f32.mrb[110].mxu0  ;;  %v5868_v54 = vld [vmem:[#allocation17 + $0x64] ss:$8 sps:$4 sm:$0xff]  }
 0xebf   : > { %v3466_v63 = vpop.f32.mrb[111].mxu0  ;;  %v3475_v58 = vadd.f32 %v5589_v23, %v8659_v18  ;;  %v8733_v34 = vadd.f32 %v6286_v33, %v3472_v4  ;;  %v5871_v23 = vld [vmem:[#allocation17 + $0x74] ss:$8 sps:$4 sm:$0xff]  }
 0xec0   : > { %v8724_v38 = vadd.f32 %v6284_v53, %v3464_v28  ;;  %v3467_v55 = vadd.f32 %v8659_v18, %v3466_v63  ;;  %v5853_v18 = vld [vmem:[#allocation17 + $0x14] ss:$8 sps:$4 sm:$0xff]   ;;  %v5866_v28 = vld [vmem:[#allocation17 + $0x60] ss:$8 sps:$4 sm:$0xff]   ;;  %v5869_v63 = vld [vmem:[#allocation17 + $0x70] ss:$8 sps:$4 sm:$0xff]  }
 0xec1   : > { %v8737_v51 = vadd.f32 %v6287_v6, %v3475_v58  ;;  %3835 = vmatprep.subr.bf16.mxu1 %v5853_v18 }
 0xec2   : > { %v8729_v2 = vadd.f32 %v6285_v49, %v3467_v55  ;;  %3518 = vadd.xlane.f32.xlu0 %v8724_v38  ;;  %3836 = vmatpush1.bf16.msra.mxu1 %v5851_v11 }
 0xec3   : > { %3837 = vmatprep.subr.bf16.mxu1 %v5856_v29 }
 0xec4   : > { %3520 = vadd.xlane.f32.xlu1 %v8729_v2 }
 0xec6   : > { %3522 = vadd.xlane.f32.xlu0 %v8733_v34  ;;  %3838 = vmatpush1.bf16.msra.mxu1 %v5854_v43 }
 0xec7   : > { %3839 = vmatprep.subr.bf16.mxu1 %v5859_v35 }
 0xec8   : > { %3524 = vadd.xlane.f32.xlu1 %v8737_v51 }
 0xeca   : > { %3840 = vmatpush1.bf16.msra.mxu1 %v5857_v45 }
 0xecb   : > { %3841 = vmatprep.subr.bf16.mxu1 %v5862_v41 }
 0xece   : > { %3842 = vmatpush1.bf16.msra.mxu1 %v5860_v61 }
 0xecf   : > { %3843 = vmatprep.subr.bf16.mxu1 %v5865_v48  ;;  %v8821_v48 = vld [vmem:[#allocation14] ss:$0 sm:$0xff] }
 0xf00   : > { %v3495_v16 = vpop.xlane.xlu0 %3494 }
 0xf01   : > { %v3527_v40 = vmul.f32 0.0078125, %v3495_v16 }
 0xf02   : > { %v3497_v19 = vpop.xlane.xlu1 %3496 }
 0xf03   : > { %v8742_v17 = vsub.f32 %v8664_v20, %v3527_v40  ;;  %v3528_v25 = vmul.f32 0.0078125, %v3497_v19 }
 0xf04   : > { %v3499_v14 = vpop.xlane.xlu0 %3498 }
 0xf05   : > { %v8745_v47 = vsub.f32 %v8668_v36, %v3528_v25  ;;  %v3529_v57 = vmul.f32 0.0078125, %v3499_v14  ;;  %v3559_v0 = vmul.f32 %v8742_v17, %v8742_v17 }
 0xf07   : > { %v8750_v50 = vsub.f32 %v8672_v22, %v3529_v57  ;;  %3575 = vadd.xlane.f32.xlu0 %v3559_v0  ;;  %v3560_v62 = vmul.f32 %v8745_v47, %v8745_v47 }
 0xf08   : > { %v3501_v42 = vpop.xlane.xlu0 %3500 }
 0xf09   : > { %v3530_v9 = vmul.f32 0.0078125, %v3501_v42  ;;  %3577 = vadd.xlane.f32.xlu1 %v3560_v62  ;;  %v3561_v20 = vmul.f32 %v8750_v50, %v8750_v50 }
 0xf0b   : > { %v8757_v36 = vsub.f32 %v8678_v26, %v3530_v9  ;;  %3579 = vadd.xlane.f32.xlu0 %v3561_v20 }
 0xf0d   : > { %v3562_v7 = vmul.f32 %v8757_v36, %v8757_v36 }
 0xf0f   : > { %3581 = vadd.xlane.f32.xlu1 %v3562_v7 }
 0xf10   : > { %v3503_v22 = vpop.xlane.xlu0 %3502 }
 0xf11   : > { %v3531_v8 = vmul.f32 0.0078125, %v3503_v22 }
 0xf12   : > { %v3505_v21 = vpop.xlane.xlu1 %3504 }
 0xf13   : > { %v8762_v60 = vsub.f32 %v8684_v1, %v3531_v8  ;;  %v3532_v12 = vmul.f32 0.0078125, %v3505_v21 }
 0xf14   : > { %v3507_v52 = vpop.xlane.xlu0 %3506 }
 0xf15   : > { %v8765_v56 = vsub.f32 %v8689_v24, %v3532_v12  ;;  %v3533_v44 = vmul.f32 0.0078125, %v3507_v52  ;;  %v3563_v26 = vmul.f32 %v8762_v60, %v8762_v60  ;;  %v5872_v12 = vld [vmem:[#allocation20 + $0x40] sm:$0xff]   ;;  %v5874_v52 = vld [vmem:[#allocation20 + $0x48] sm:$0xff]  }
 0xf16   : > { %v3509_v37 = vpop.xlane.xlu1 %3508  ;;  %5206 = vmatprep.subr.bf16.mxu0 %v5872_v12 }
 0xf17   : > { %v8770_v31 = vsub.f32 %v8693_v32, %v3533_v44  ;;  %v3534_v10 = vmul.f32 0.0078125, %v3509_v37  ;;  %3583 = vadd.xlane.f32.xlu0 %v3563_v26  ;;  %v3564_v1 = vmul.f32 %v8765_v56, %v8765_v56  ;;  %v5875_v44 = vld [vmem:[#allocation20 + $0x8] sm:$0xff]  }
 0xf19   : > { %v8775_v24 = vsub.f32 %v8697_v46, %v3534_v10  ;;  %3585 = vadd.xlane.f32.xlu1 %v3564_v1  ;;  %v3565_v39 = vmul.f32 %v8770_v31, %v8770_v31  ;;  %v5863_v46 = vld [vmem:[#allocation17 + $0x50] ss:$8 sps:$4 sm:$0xff]  }
 0xf1a   : > { %3844 = vmatpush1.bf16.msra.mxu1 %v5863_v46 }
 0xf1b   : > { %3587 = vadd.xlane.f32.xlu0 %v3565_v39  ;;  %v3566_v32 = vmul.f32 %v8775_v24, %v8775_v24  ;;  %3845 = vmatprep.subr.bf16.mxu1 %v5868_v54 }
 0xf1d   : > { %3589 = vadd.xlane.f32.xlu1 %v3566_v32 }
 0xf1e   : > { %3846 = vmatpush1.bf16.msra.mxu1 %v5866_v28 }
 0xf1f   : > { %3847 = vmatprep.subr.bf16.mxu1 %v5871_v23 }
 0xf22   : > { %3848 = vmatpush1.bf16.msra.mxu1 %v5869_v63 }
 0xf23   : > { %5590 = vmatprep.subr.bf16.mxu1 %v5872_v12 }
 0xf3c   : > { %v3511_v4 = vpop.xlane.xlu0 %3510 }
 0xf3d   : > { %v3535_v53 = vmul.f32 0.0078125, %v3511_v4 }
 0xf3e   : > { %v3513_v55 = vpop.xlane.xlu1 %3512 }
 0xf3f   : > { %v8782_v58 = vsub.f32 %v8704_v27, %v3535_v53  ;;  %v3536_v49 = vmul.f32 0.0078125, %v3513_v55 }
 0xf40   : > { %v3515_v33 = vpop.xlane.xlu0 %3514 }
 0xf41   : > { %v8785_v6 = vsub.f32 %v8709_v5, %v3536_v49  ;;  %v3537_v13 = vmul.f32 0.0078125, %v3515_v33  ;;  %v3567_v59 = vmul.f32 %v8782_v58, %v8782_v58 }
 0xf42   : > { %v3517_v18 = vpop.xlane.xlu1 %3516 }
 0xf43   : > { %v8790_v11 = vsub.f32 %v8713_v3, %v3537_v13  ;;  %v3538_v16 = vmul.f32 0.0078125, %v3517_v18  ;;  %3591 = vadd.xlane.f32.xlu0 %v3567_v59  ;;  %v3568_v40 = vmul.f32 %v8785_v6, %v8785_v6  ;;  %v8826_v13 = vld [vmem:[#allocation15] ss:$0 sm:$0xff] }
 0xf45   : > { %v8795_v27 = vsub.f32 %v8717_v15, %v3538_v16  ;;  %3593 = vadd.xlane.f32.xlu1 %v3568_v40  ;;  %v3569_v5 = vmul.f32 %v8790_v11, %v8790_v11 }
 0xf47   : > { %3595 = vadd.xlane.f32.xlu0 %v3569_v5  ;;  %v3570_v19 = vmul.f32 %v8795_v27, %v8795_v27 }
 0xf49   : > { %3597 = vadd.xlane.f32.xlu1 %v3570_v19 }
 0xf4f   : > { %v3519_v25 = vpop.xlane.xlu0 %3518 }
 0xf50   : > { %v3539_v3 = vmul.f32 0.0078125, %v3519_v25 }
 0xf51   : > { %v3521_v14 = vpop.xlane.xlu1 %3520 }
 0xf52   : > { %v8802_v57 = vsub.f32 %v8724_v38, %v3539_v3  ;;  %v3540_v0 = vmul.f32 0.0078125, %v3521_v14 }
 0xf53   : > { %v3523_v62 = vpop.xlane.xlu0 %3522 }
 0xf54   : > { %v8805_v15 = vsub.f32 %v8729_v2, %v3540_v0  ;;  %v3541_v42 = vmul.f32 0.0078125, %v3523_v62  ;;  %v3571_v9 = vmul.f32 %v8802_v57, %v8802_v57 }
 0xf55   : > { %v3525_v20 = vpop.xlane.xlu1 %3524 }
 0xf56   : > { %v8810_v7 = vsub.f32 %v8733_v34, %v3541_v42  ;;  %v3542_v22 = vmul.f32 0.0078125, %v3525_v20  ;;  %3599 = vadd.xlane.f32.xlu0 %v3571_v9  ;;  %v3572_v8 = vmul.f32 %v8805_v15, %v8805_v15  ;;  %v5873_v34 = vld [vmem:[#allocation20] sm:$0xff]  }
 0xf57   : > { %5207 = vmatpush3.bf16.msra.mxu0 %v5873_v34 }
 0xf58   : > { %v8815_v38 = vsub.f32 %v8737_v51, %v3542_v22  ;;  %3601 = vadd.xlane.f32.xlu1 %v3572_v8  ;;  %v3573_v2 = vmul.f32 %v8810_v7, %v8810_v7  ;;  %5208 = vmatprep.subr.bf16.mxu0 %v5874_v52 }
 0xf5a   : > { %3603 = vadd.xlane.f32.xlu0 %v3573_v2  ;;  %v3574_v21 = vmul.f32 %v8815_v38, %v8815_v38 }
 0xf5b   : > { %5209 = vmatpush3.bf16.msra.mxu0 %v5875_v44 }
 0xf5c   : > { %3605 = vadd.xlane.f32.xlu1 %v3574_v21 }
 0xf94   : > { %v3576_v51 = vpop.xlane.xlu0 %3575 }
 0xf95   : > { %v3607_v26 = vmul.f32 0.0078125, %v3576_v51 }
 0xf96   : > { %v3578_v29 = vpop.xlane.xlu1 %3577 }
 0xf97   : > { %v3623_v37 = vadd.f32 1e-05, %v3607_v26  ;;  %v3608_v43 = vmul.f32 0.0078125, %v3578_v29 }
 0xf98   : > { %v3580_v10 = vpop.xlane.xlu0 %3579 }
 0xf99   : > { %6144 = vrsqrt.f32 %v3623_v37  ;;  %v3624_v1 = vadd.f32 1e-05, %v3608_v43  ;;  %v3609_v39 = vmul.f32 0.0078125, %v3580_v10 }
 0xf9b   : > { %6146 = vrsqrt.f32 %v3624_v1  ;;  %v3625_v35 = vadd.f32 1e-05, %v3609_v39 }
 0xf9c   : > { %v3582_v45 = vpop.xlane.xlu1 %3581 }
 0xf9d   : > { %6148 = vrsqrt.f32 %v3625_v35  ;;  %v3610_v32 = vmul.f32 0.0078125, %v3582_v45 }
 0xf9f   : > { %v3626_v41 = vadd.f32 1e-05, %v3610_v32 }
 0xfa1   : > { %6150 = vrsqrt.f32 %v3626_v41 }
 0xfa3   : > { %v6145_v61 = vpop.eup %6144 }
 0xfa4   : > { %v3655_v46 = vmul.f32 %v6145_v61, %v8742_v17  ;;  %v3584_v54 = vpop.xlane.xlu0 %3583 }
 0xfa5   : > { %v6147_v28 = vpop.eup %6146  ;;  %v3611_v23 = vmul.f32 0.0078125, %v3584_v54 }
 0xfa6   : > { %v3678_v63 = vmul.f32 %v8821_v48, %v3655_v46  ;;  %v3656_v4 = vmul.f32 %v6147_v28, %v8745_v47  ;;  %v3586_v53 = vpop.xlane.xlu1 %3585 }
 0xfa7   : > { %v6149_v55 = vpop.eup %6148  ;;  %v3627_v49 = vadd.f32 1e-05, %v3611_v23  ;;  %v3612_v33 = vmul.f32 0.0078125, %v3586_v53 }
 0xfa8   : > { %v3679_v59 = vmul.f32 %v8821_v48, %v3656_v4  ;;  %v3588_v18 = vpop.xlane.xlu0 %3587  ;;  %v8830_v5 = vadd.f32 %v8826_v13, %v3678_v63  ;;  %v3657_v47 = vmul.f32 %v6149_v55, %v8750_v50 }
 0xfa9   : > { %6152 = vrsqrt.f32 %v3627_v49  ;;  %v3628_v16 = vadd.f32 1e-05, %v3612_v33  ;;  %v3613_v40 = vmul.f32 0.0078125, %v3588_v18 }
 0xfaa   : > { %v3590_v17 = vpop.xlane.xlu1 %3589  ;;  %v8833_v19 = vadd.f32 %v8826_v13, %v3679_v59  ;;  %v3680_v9 = vmul.f32 %v8821_v48, %v3657_v47 }
 0xfab   : > { %v6151_v25 = vpop.eup %6150  ;;  %6154 = vrsqrt.f32 %v3628_v16  ;;  %v3629_v3 = vadd.f32 1e-05, %v3613_v40  ;;  %v3614_v14 = vmul.f32 0.0078125, %v3590_v17 }
 0xfac   : > { %v3717_v0 = vpack.c.bf16 %v8833_v19, %v8830_v5  ;;  %v3658_v62 = vmul.f32 %v6151_v25, %v8757_v36  ;;  %v8846_v22 = vadd.f32 %v8826_v13, %v3680_v9 }
 0xfad   : > { %6156 = vrsqrt.f32 %v3629_v3  ;;  %v3630_v42 = vadd.f32 1e-05, %v3614_v14 }
 0xfae   : > { %3866 = vmatmul.mubr.bf16.vlgmr.msra.gmra.mrb[80].mxu1 %v3717_v0  ;;  %v3681_v20 = vmul.f32 %v8821_v48, %v3658_v62 }
 0xfaf   : > { %6158 = vrsqrt.f32 %v3630_v42  ;;  %3875 = vmatprep.mubr.bf16.mxu1 %v9470_v30  ;;  %5598 = vmatpush3.bf16.msra.mxu1 %v5873_v34 }
 0xfb0   : > { %v8843_v50 = vadd.f32 %v8826_v13, %v3681_v20  ;;  %5591 = vmatprep.subr.bf16.mxu1 %v5874_v52 }
 0xfb2   : > { %v3718_v36 = vpack.c.bf16 %v8843_v50, %v8846_v22 }
 0xfb3   : > { %v6153_v8 = vpop.eup %6152  ;;  %5599 = vmatpush3.bf16.msra.mxu1 %v5875_v44 }
 0xfb4   : > { %v3659_v2 = vmul.f32 %v6153_v8, %v8762_v60 }
 0xfb5   : > { %v6155_v21 = vpop.eup %6154 }
 0xfb6   : > { %3876 = vmatmul.mubr.bf16.gmra.mrb[84].mxu1 %v3718_v36  ;;  %v3660_v12 = vmul.f32 %v6155_v21, %v8765_v56  ;;  %v3682_v34 = vmul.f32 %v8821_v48, %v3659_v2 }
 0xfb7   : > { %v6157_v51 = vpop.eup %6156  ;;  %3885 = vmatprep.mubr.bf16.mxu1 %v9470_v30 }
 0xfb8   : > { %v3683_v52 = vmul.f32 %v8821_v48, %v3660_v12  ;;  %v8856_v29 = vadd.f32 %v8826_v13, %v3682_v34  ;;  %v3661_v60 = vmul.f32 %v6157_v51, %v8770_v31 }
 0xfb9   : > { %v6159_v26 = vpop.eup %6158 }
 0xfba   : > { %v8859_v44 = vadd.f32 %v8826_v13, %v3683_v52  ;;  %v3662_v37 = vmul.f32 %v6159_v26, %v8775_v24  ;;  %v3684_v10 = vmul.f32 %v8821_v48, %v3661_v60 }
 0xfbc   : > { %v3719_v56 = vpack.c.bf16 %v8859_v44, %v8856_v29  ;;  %v3685_v43 = vmul.f32 %v8821_v48, %v3662_v37  ;;  %v8872_v39 = vadd.f32 %v8826_v13, %v3684_v10 }
 0xfbe   : > { %3886 = vmatmul.mubr.bf16.gmra.mrb[88].mxu1 %v3719_v56  ;;  %v8869_v1 = vadd.f32 %v8826_v13, %v3685_v43 }
 0xfbf   : > { %3895 = vmatprep.mubr.bf16.mxu1 %v9470_v30 }
 0xfc0   : > { %v3720_v31 = vpack.c.bf16 %v8869_v1, %v8872_v39 }
 0xfc6   : > { %3896 = vmatmul.mubr.bf16.gmra.mrb[92].mxu1 %v3720_v31 }
 0xfc7   : > { %3905 = vmatprep.mubr.bf16.mxu1 %v9470_v30 }
 0xfd0   : > { %v3592_v24 = vpop.xlane.xlu0 %3591 }
 0xfd1   : > { %v3615_v35 = vmul.f32 0.0078125, %v3592_v24 }
 0xfd2   : > { %v3594_v45 = vpop.xlane.xlu1 %3593 }
 0xfd3   : > { %v3631_v32 = vadd.f32 1e-05, %v3615_v35  ;;  %v3616_v41 = vmul.f32 0.0078125, %v3594_v45 }
 0xfd4   : > { %v3596_v61 = vpop.xlane.xlu0 %3595 }
 0xfd5   : > { %6160 = vrsqrt.f32 %v3631_v32  ;;  %v3632_v46 = vadd.f32 1e-05, %v3616_v41  ;;  %v3617_v54 = vmul.f32 0.0078125, %v3596_v61 }
 0xfd6   : > { %v3598_v28 = vpop.xlane.xlu1 %3597 }
 0xfd7   : > { %6162 = vrsqrt.f32 %v3632_v46  ;;  %v3633_v23 = vadd.f32 1e-05, %v3617_v54  ;;  %v3618_v63 = vmul.f32 0.0078125, %v3598_v28  ;;  %v5876_v28 = vld [vmem:[#allocation20 + $0x50] sm:$0xff]  }
 0xfd8   : > { %5210 = vmatprep.subr.bf16.mxu0 %v5876_v28  ;;  %5592 = vmatprep.subr.bf16.mxu1 %v5876_v28 }
 0xfd9   : > { %6164 = vrsqrt.f32 %v3633_v23  ;;  %v3634_v4 = vadd.f32 1e-05, %v3618_v63  ;;  %v5878_v23 = vld [vmem:[#allocation20 + $0x58] sm:$0xff]   ;;  %v5881_v63 = vld [vmem:[#allocation20 + $0x20] sm:$0xff]  }
 0xfdb   : > { %6166 = vrsqrt.f32 %v3634_v4  ;;  %v5883_v4 = vld [vmem:[#allocation20 + $0x28] sm:$0xff]  }
 0xfdf   : > { %v6161_v53 = vpop.eup %6160 }
 0xfe0   : > { %v3663_v55 = vmul.f32 %v6161_v53, %v8782_v58  ;;  %v5884_v53 = vld [vmem:[#allocation20 + $0x70] sm:$0xff]  }
 0xfe1   : > { %v6163_v49 = vpop.eup %6162 }
 0xfe2   : > { %v3664_v33 = vmul.f32 %v6163_v49, %v8785_v6  ;;  %v3686_v59 = vmul.f32 %v8821_v48, %v3663_v55  ;;  %v5885_v55 = vld [vmem:[#allocation20 + $0x30] sm:$0xff]   ;;  %v5886_v49 = vld [vmem:[#allocation20 + $0x78] sm:$0xff]  }
 0xfe3   : > { %v6165_v18 = vpop.eup %6164  ;;  %v3600_v16 = vpop.xlane.xlu0 %3599 }
 0xfe4   : > { %v3619_v40 = vmul.f32 0.0078125, %v3600_v16  ;;  %v3687_v17 = vmul.f32 %v8821_v48, %v3664_v33  ;;  %v8882_v3 = vadd.f32 %v8826_v13, %v3686_v59  ;;  %v3665_v14 = vmul.f32 %v6165_v18, %v8790_v11  ;;  %v5887_v33 = vld [vmem:[#allocation20 + $0x38] sm:$0xff]   ;;  %v9493_v18 = vld [vmem:[#allocation37_spill] sm:$0xff] }
 0xfe5   : > { %v6167_v47 = vpop.eup %6166  ;;  %v3602_v25 = vpop.xlane.xlu1 %3601  ;;  %v3741_v59 = vld [vmem:[#allocation18] sm:$0x3]  ;;  %v9494_v16 = vsub.s32 0, %v9493_v18 }
 0xfe6   : > { %v3635_v0 = vadd.f32 1e-05, %v3619_v40  ;;  %v3620_v62 = vmul.f32 0.0078125, %v3602_v25  ;;  %v8886_v58 = vadd.f32 %v8826_v13, %v3687_v17  ;;  %v3666_v6 = vmul.f32 %v6167_v47, %v8795_v27 }
 0xfe7   : > { %v3604_v42 = vpop.xlane.xlu0 %3603  ;;  %v3688_v12 = vmul.f32 %v8821_v48, %v3665_v14  ;;  %v8930_v40 = vrot.slane %v3741_v59, %v9494_v16  ;;  %v9495_v17 = vsub.s32 1, %v9493_v18 }
 0xfe8   : > { %6168 = vrsqrt.f32 %v3635_v0  ;;  %v3636_v9 = vadd.f32 1e-05, %v3620_v62  ;;  %v3621_v20 = vmul.f32 0.0078125, %v3604_v42  ;;  %v3721_v8 = vpack.c.bf16 %v8886_v58, %v8882_v3 }
 0xfe9   : > { %v3606_v36 = vpop.xlane.xlu1 %3605  ;;  %v3689_v2 = vmul.f32 %v8821_v48, %v3666_v6  ;;  %v8898_v51 = vadd.f32 %v8826_v13, %v3688_v12  ;;  %v8934_v47 = vrot.slane %v3741_v59, %v9495_v17 }
 0xfea   : > { %6170 = vrsqrt.f32 %v3636_v9  ;;  %v3637_v21 = vadd.f32 1e-05, %v3621_v20  ;;  %v3622_v11 = vmul.f32 0.0078125, %v3606_v36  ;;  %3906 = vmatmul.mubr.bf16.gmra.mrb[96].mxu1 %v3721_v8 }
 0xfeb   : > { %3915 = vmatprep.mubr.bf16.mxu1 %v9470_v30  ;;  %v8895_v34 = vadd.f32 %v8826_v13, %v3689_v2 }
 0xfec   : > { %6172 = vrsqrt.f32 %v3637_v21  ;;  %v3638_v27 = vadd.f32 1e-05, %v3622_v11 }
 0xfed   : > { %v3722_v52 = vpack.c.bf16 %v8895_v34, %v8898_v51 }
 0xfee   : > { %6174 = vrsqrt.f32 %v3638_v27 }
 0xff2   : > { %v6169_v26 = vpop.eup %6168  ;;  %3916 = vmatmul.mubr.bf16.gmra.mrb[100].mxu1 %v3722_v52 }
 0xff3   : > { %3925 = vmatprep.mubr.bf16.mxu1 %v9470_v30  ;;  %v3667_v60 = vmul.f32 %v6169_v26, %v8802_v57 }
 0xff4   : > { %v6171_v37 = vpop.eup %6170 }
 0xff5   : > { %v3668_v56 = vmul.f32 %v6171_v37, %v8805_v15  ;;  %v3690_v43 = vmul.f32 %v8821_v48, %v3667_v60 }
 0xff6   : > { %v6173_v10 = vpop.eup %6172 }
 0xff7   : > { %v3691_v31 = vmul.f32 %v8821_v48, %v3668_v56  ;;  %v8908_v35 = vadd.f32 %v8826_v13, %v3690_v43  ;;  %v3669_v32 = vmul.f32 %v6173_v10, %v8810_v7 }
 0xff8   : > { %v6175_v24 = vpop.eup %6174 }
 0xff9   : > { %v8911_v45 = vadd.f32 %v8826_v13, %v3691_v31  ;;  %v3670_v41 = vmul.f32 %v6175_v24, %v8815_v38  ;;  %v3692_v61 = vmul.f32 %v8821_v48, %v3669_v32  ;;  %v5877_v38 = vld [vmem:[#allocation20 + $0x10] sm:$0xff]  }
 0xffa   : > { %5211 = vmatpush3.bf16.msra.mxu0 %v5877_v38  ;;  %5600 = vmatpush3.bf16.msra.mxu1 %v5877_v38 }
 0xffb   : > { %v3723_v57 = vpack.c.bf16 %v8911_v45, %v8908_v35  ;;  %v3693_v15 = vmul.f32 %v8821_v48, %v3670_v41  ;;  %v8924_v54 = vadd.f32 %v8826_v13, %v3692_v61  ;;  %v5879_v48 = vld [vmem:[#allocation20 + $0x18] sm:$0xff]   ;;  %5212 = vmatprep.subr.bf16.mxu0 %v5878_v23  ;;  %5593 = vmatprep.subr.bf16.mxu1 %v5878_v23 }
 0xffd   : > { %3926 = vmatmul.mubr.bf16.gmra.mrb[104].mxu1 %v3723_v57  ;;  %v8921_v46 = vadd.f32 %v8826_v13, %v3693_v15  ;;  %v5882_v13 = vld [vmem:[#allocation20 + $0x68] sm:$0xff]  }
 0xffe   : > { %3935 = vmatprep.mubr.bf16.mxu1 %v9470_v30  ;;  %5213 = vmatpush3.bf16.msra.mxu0 %v5879_v48  ;;  %v5880_v30 = vld [vmem:[#allocation20 + $0x60] sm:$0xff]  }
 0xfff   : > { %v3724_v7 = vpack.c.bf16 %v8921_v46, %v8924_v54  ;;  %5601 = vmatpush3.bf16.msra.mxu1 %v5879_v48  ;;  %5214 = vmatprep.subr.bf16.mxu0 %v5880_v30 }
0x1000   : > { %5594 = vmatprep.subr.bf16.mxu1 %v5880_v30 }
0x1002   : > { %5215 = vmatpush3.bf16.msra.mxu0 %v5881_v63 }
0x1003   : > { %5602 = vmatpush3.bf16.msra.mxu1 %v5881_v63  ;;  %5216 = vmatprep.subr.bf16.mxu0 %v5882_v13 }
0x1004   : > { %5595 = vmatprep.subr.bf16.mxu1 %v5882_v13 }
0x1005   : > { %3936 = vmatmul.mubr.bf16.gmra.mrb[108].mxu1 %v3724_v7 }
0x1006   : > { %5217 = vmatpush3.bf16.msra.mxu0 %v5883_v4 }
0x1007   : > { %5603 = vmatpush3.bf16.msra.mxu1 %v5883_v4  ;;  %5218 = vmatprep.subr.bf16.mxu0 %v5884_v53 }
0x1008   : > { %5596 = vmatprep.subr.bf16.mxu1 %v5884_v53 }
0x100a   : > { %5219 = vmatpush3.bf16.msra.mxu0 %v5885_v55 }
0x100b   : > { %5604 = vmatpush3.bf16.msra.mxu1 %v5885_v55  ;;  %5220 = vmatprep.subr.bf16.mxu0 %v5886_v49 }
0x100c   : > { %5597 = vmatprep.subr.bf16.mxu1 %v5886_v49 }
0x100e   : > { %5221 = vmatpush3.bf16.msra.mxu0 %v5887_v33 }
0x100f   : > { %5605 = vmatpush3.bf16.msra.mxu1 %v5887_v33 }
0x1081   : > { %v3867_v25 = vpop.f32.mrb[80].mxu1 }
0x1082   : > { %v3868_v14 = vadd.f32 %v3867_v25, %v8930_v40  ;;  %v3869_v0 = vpop.f32.mrb[81].mxu1 }
0x1083   : > { %v3870_v62 = vadd.f32 %v3869_v0, %v8934_v47  ;;  %v3871_v6 = vpop.f32.mrb[82].mxu1 }
0x1084   : > { %v3978_v42 = vmul.f32 0.70710677, %v3868_v14  ;;  %v3872_v9 = vadd.f32 %v3871_v6, %v8930_v40  ;;  %v3873_v20 = vpop.f32.mrb[83].mxu1  ;;  %v3946_v48 = vmul.f32 0.5, %v3868_v14 }
0x1085   : > { %v3979_v8 = vmul.f32 0.70710677, %v3870_v62  ;;  %v3874_v36 = vadd.f32 %v3873_v20, %v8934_v47  ;;  %v3947_v53 = vmul.f32 0.5, %v3870_v62 }
0x1086   : > { %6176 = verf.f32 %v3978_v42  ;;  %v3980_v2 = vmul.f32 0.70710677, %v3872_v9  ;;  %v3948_v30 = vmul.f32 0.5, %v3872_v9 }
0x1087   : > { %6178 = verf.f32 %v3979_v8  ;;  %v3981_v21 = vmul.f32 0.70710677, %v3874_v36  ;;  %v3949_v55 = vmul.f32 0.5, %v3874_v36 }
0x1088   : > { %6180 = verf.f32 %v3980_v2 }
0x1089   : > { %6182 = verf.f32 %v3981_v21  ;;  %v3877_v11 = vpop.f32.mrb[84].mxu1 }
0x108a   : > { %v3878_v12 = vadd.f32 %v3877_v11, %v8930_v40  ;;  %v3879_v27 = vpop.f32.mrb[85].mxu1 }
0x108b   : > { %v3880_v52 = vadd.f32 %v3879_v27, %v8934_v47  ;;  %v3881_v26 = vpop.f32.mrb[86].mxu1 }
0x108c   : > { %v3982_v60 = vmul.f32 0.70710677, %v3878_v12  ;;  %v3882_v37 = vadd.f32 %v3881_v26, %v8930_v40  ;;  %v3883_v56 = vpop.f32.mrb[87].mxu1 }
0x108d   : > { %v3983_v43 = vmul.f32 0.70710677, %v3880_v52  ;;  %v3884_v10 = vadd.f32 %v3883_v56, %v8934_v47 }
0x108e   : > { %6184 = verf.f32 %v3982_v60  ;;  %v3984_v31 = vmul.f32 0.70710677, %v3882_v37 }
0x108f   : > { %6186 = verf.f32 %v3983_v43  ;;  %v3985_v24 = vmul.f32 0.70710677, %v3884_v10  ;;  %v3950_v43 = vmul.f32 0.5, %v3878_v12 }
0x1090   : > { %v6177_v32 = vpop.eup %6176  ;;  %6188 = verf.f32 %v3984_v31  ;;  %v3952_v31 = vmul.f32 0.5, %v3882_v37 }
0x1091   : > { %v6179_v41 = vpop.eup %6178  ;;  %v4042_v57 = vadd.f32 1.0, %v6177_v32  ;;  %6190 = verf.f32 %v3985_v24  ;;  %v3887_v15 = vpop.f32.mrb[88].mxu1 }
0x1092   : > { %v6181_v61 = vpop.eup %6180  ;;  %v4043_v28 = vadd.f32 1.0, %v6179_v41  ;;  %v8945_v7 = vadd.f32 %v3887_v15, %v8930_v40  ;;  %v3889_v38 = vpop.f32.mrb[89].mxu1  ;;  %v3953_v15 = vmul.f32 0.5, %v3884_v10 }
0x1093   : > { %v6183_v23 = vpop.eup %6182  ;;  %v4044_v63 = vadd.f32 1.0, %v6181_v61  ;;  %v8948_v13 = vadd.f32 %v3889_v38, %v8934_v47  ;;  %v3891_v4 = vpop.f32.mrb[90].mxu1  ;;  %v4074_v18 = vmul.f32 %v4042_v57, %v3946_v48  ;;  %v3951_v57 = vmul.f32 0.5, %v3880_v52 }
0x1094   : > { %v4045_v49 = vadd.f32 1.0, %v6183_v23  ;;  %v3986_v33 = vmul.f32 0.70710677, %v8945_v7  ;;  %v3893_v59 = vpop.f32.mrb[91].mxu1  ;;  %v3892_v25 = vadd.f32 %v3891_v4, %v8930_v40  ;;  %v4075_v0 = vmul.f32 %v4043_v28, %v3947_v53 }
0x1095   : > { %v4076_v16 = vmul.f32 %v4044_v63, %v3948_v30  ;;  %v3987_v17 = vmul.f32 0.70710677, %v8948_v13  ;;  %v3894_v6 = vadd.f32 %v3893_v59, %v8934_v47 }
0x1096   : > { %v4077_v14 = vmul.f32 %v4045_v49, %v3949_v55  ;;  %6192 = verf.f32 %v3986_v33  ;;  %v3988_v9 = vmul.f32 0.70710677, %v3892_v25 }
0x1097   : > { %v4106_v42 = vpack.c.bf16 %v4076_v16, %v4074_v18  ;;  %6194 = verf.f32 %v3987_v17  ;;  %v3989_v20 = vmul.f32 0.70710677, %v3894_v6 }
0x1098   : > { %v6185_v62 = vpop.eup %6184  ;;  %v4107_v8 = vpack.c.bf16 %v4077_v14, %v4075_v0  ;;  %6196 = verf.f32 %v3988_v9  ;;  %v3954_v0 = vmul.f32 0.5, %v8945_v7  ;;  %v3956_v14 = vmul.f32 0.5, %v3892_v25 }
0x1099   : > { %v6187_v36 = vpop.eup %6186  ;;  %v4046_v2 = vadd.f32 1.0, %v6185_v62  ;;  %v3897_v21 = vpop.f32.mrb[92].mxu1  ;;  %6198 = verf.f32 %v3989_v20  ;;  %v3955_v9 = vmul.f32 0.5, %v8948_v13  ;;  %v3957_v62 = vmul.f32 0.5, %v3894_v6 }
0x109a   : > { %v6189_v11 = vpop.eup %6188  ;;  %v4047_v27 = vadd.f32 1.0, %v6187_v36  ;;  %v3898_v26 = vadd.f32 %v3897_v21, %v8930_v40  ;;  %v3899_v60 = vpop.f32.mrb[93].mxu1  ;;  %4289 = vmatprep.mubr.bf16.mxu0 %v4107_v8 }
0x109b   : > { %v6191_v56 = vpop.eup %6190  ;;  %v4048_v24 = vadd.f32 1.0, %v6189_v11  ;;  %v3900_v32 = vadd.f32 %v3899_v60, %v8934_v47  ;;  %v3901_v41 = vpop.f32.mrb[94].mxu1  ;;  %4290 = vmatmul.mubr.bf16.vlgmr.msra.gmra.mrb[112].mxu0 %v4106_v42  ;;  %v4078_v23 = vmul.f32 %v4046_v2, %v3950_v43 }
0x109c   : > { %v4049_v61 = vadd.f32 1.0, %v6191_v56  ;;  %v3990_v28 = vmul.f32 0.70710677, %v3898_v26  ;;  %v3903_v38 = vpop.f32.mrb[95].mxu1  ;;  %v3902_v63 = vadd.f32 %v3901_v41, %v8930_v40  ;;  %v4079_v4 = vmul.f32 %v4047_v27, %v3951_v57 }
0x109d   : > { %v4080_v48 = vmul.f32 %v4048_v24, %v3952_v31  ;;  %v3991_v30 = vmul.f32 0.70710677, %v3900_v32  ;;  %v3904_v12 = vadd.f32 %v3903_v38, %v8934_v47  ;;  %v3958_v7 = vmul.f32 0.5, %v3898_v26 }
0x109e   : > { %v4081_v53 = vmul.f32 %v4049_v61, %v3953_v15  ;;  %6200 = verf.f32 %v3990_v28  ;;  %v3992_v37 = vmul.f32 0.70710677, %v3902_v63  ;;  %v3960_v25 = vmul.f32 0.5, %v3902_v63 }
0x109f   : > { %6202 = verf.f32 %v3991_v30  ;;  %v4108_v55 = vpack.c.bf16 %v4080_v48, %v4078_v23  ;;  %v3993_v33 = vmul.f32 0.70710677, %v3904_v12  ;;  %v3959_v13 = vmul.f32 0.5, %v3900_v32 }
0x10a0   : > { %v6193_v49 = vpop.eup %6192  ;;  %v4109_v52 = vpack.c.bf16 %v4081_v53, %v4079_v4  ;;  %6204 = verf.f32 %v3992_v37  ;;  %v3961_v6 = vmul.f32 0.5, %v3904_v12 }
0x10a1   : > { %v6195_v10 = vpop.eup %6194  ;;  %v4050_v59 = vadd.f32 1.0, %v6193_v49  ;;  %6206 = verf.f32 %v3993_v33 }
0x10a2   : > { %4297 = vmatprep.mubr.bf16.mxu0 %v4109_v52  ;;  %v6197_v18 = vpop.eup %6196  ;;  %v4051_v16 = vadd.f32 1.0, %v6195_v10 }
0x10a3   : > { %4298 = vmatmul.mubr.bf16.gmra.mrb[116].mxu0 %v4108_v55  ;;  %v6199_v17 = vpop.eup %6198  ;;  %v4052_v42 = vadd.f32 1.0, %v6197_v18  ;;  %v4082_v8 = vmul.f32 %v4050_v59, %v3954_v0 }
0x10a4   : > { %v4053_v20 = vadd.f32 1.0, %v6199_v17  ;;  %v4083_v2 = vmul.f32 %v4051_v16, %v3955_v9 }
0x10a5   : > { %v4084_v36 = vmul.f32 %v4052_v42, %v3956_v14 }
0x10a6   : > { %v4085_v21 = vmul.f32 %v4053_v20, %v3957_v62 }
0x10a7   : > { %v4110_v27 = vpack.c.bf16 %v4084_v36, %v4082_v8 }
0x10a8   : > { %v6201_v11 = vpop.eup %6200  ;;  %v4111_v56 = vpack.c.bf16 %v4085_v21, %v4083_v2 }
0x10a9   : > { %v6203_v60 = vpop.eup %6202  ;;  %v4054_v43 = vadd.f32 1.0, %v6201_v11 }
0x10aa   : > { %v6205_v31 = vpop.eup %6204  ;;  %v4055_v24 = vadd.f32 1.0, %v6203_v60  ;;  %4305 = vmatprep.mubr.bf16.mxu0 %v4111_v56 }
0x10ab   : > { %v6207_v41 = vpop.eup %6206  ;;  %v4056_v57 = vadd.f32 1.0, %v6205_v31  ;;  %4306 = vmatmul.mubr.bf16.gmra.mrb[120].mxu0 %v4110_v27  ;;  %v4086_v61 = vmul.f32 %v4054_v43, %v3958_v7 }
0x10ac   : > { %v4057_v15 = vadd.f32 1.0, %v6207_v41  ;;  %v4087_v38 = vmul.f32 %v4055_v24, %v3959_v13 }
0x10ad   : > { %v4088_v28 = vmul.f32 %v4056_v57, %v3960_v25 }
0x10ae   : > { %v4089_v23 = vmul.f32 %v4057_v15, %v3961_v6 }
0x10af   : > { %v4112_v48 = vpack.c.bf16 %v4088_v28, %v4086_v61 }
0x10b0   : > { %v4113_v30 = vpack.c.bf16 %v4089_v23, %v4087_v38 }
0x10b2   : > { %4313 = vmatprep.mubr.bf16.mxu0 %v4113_v30 }
0x10b3   : > { %4314 = vmatmul.mubr.bf16.gmra.mrb[124].mxu0 %v4112_v48 }
0x10bd   : > { %v3907_v4 = vpop.f32.mrb[96].mxu1 }
0x10be   : > { %v3908_v53 = vadd.f32 %v3907_v4, %v8930_v40  ;;  %v3909_v37 = vpop.f32.mrb[97].mxu1 }
0x10bf   : > { %v3910_v26 = vadd.f32 %v3909_v37, %v8934_v47  ;;  %v3911_v63 = vpop.f32.mrb[98].mxu1 }
0x10c0   : > { %v3994_v55 = vmul.f32 0.70710677, %v3908_v53  ;;  %v3912_v32 = vadd.f32 %v3911_v63, %v8930_v40  ;;  %v3913_v12 = vpop.f32.mrb[99].mxu1  ;;  %v3962_v43 = vmul.f32 0.5, %v3908_v53 }
0x10c1   : > { %v3995_v49 = vmul.f32 0.70710677, %v3910_v26  ;;  %v3914_v33 = vadd.f32 %v3913_v12, %v8934_v47  ;;  %v3963_v41 = vmul.f32 0.5, %v3910_v26 }
0x10c2   : > { %6208 = verf.f32 %v3994_v55  ;;  %v3996_v52 = vmul.f32 0.70710677, %v3912_v32  ;;  %v3964_v31 = vmul.f32 0.5, %v3912_v32 }
0x10c3   : > { %6210 = verf.f32 %v3995_v49  ;;  %v3997_v10 = vmul.f32 0.70710677, %v3914_v33  ;;  %v3965_v7 = vmul.f32 0.5, %v3914_v33 }
0x10c4   : > { %6212 = verf.f32 %v3996_v52 }
0x10c5   : > { %6214 = verf.f32 %v3997_v10  ;;  %v3917_v59 = vpop.f32.mrb[100].mxu1 }
0x10c6   : > { %v3918_v18 = vadd.f32 %v3917_v59, %v8930_v40  ;;  %v3919_v16 = vpop.f32.mrb[101].mxu1 }
0x10c7   : > { %v3920_v17 = vadd.f32 %v3919_v16, %v8934_v47  ;;  %v3921_v0 = vpop.f32.mrb[102].mxu1 }
0x10c8   : > { %v3998_v14 = vmul.f32 0.70710677, %v3918_v18  ;;  %v3922_v42 = vadd.f32 %v3921_v0, %v8930_v40  ;;  %v3923_v9 = vpop.f32.mrb[103].mxu1  ;;  %v3966_v0 = vmul.f32 0.5, %v3918_v18 }
0x10c9   : > { %v3999_v62 = vmul.f32 0.70710677, %v3920_v17  ;;  %v3924_v20 = vadd.f32 %v3923_v9, %v8934_v47 }
0x10ca   : > { %6216 = verf.f32 %v3998_v14  ;;  %v4000_v8 = vmul.f32 0.70710677, %v3922_v42  ;;  %v3968_v14 = vmul.f32 0.5, %v3922_v42 }
0x10cb   : > { %6218 = verf.f32 %v3999_v62  ;;  %v4001_v36 = vmul.f32 0.70710677, %v3924_v20  ;;  %v3967_v62 = vmul.f32 0.5, %v3920_v17 }
0x10cc   : > { %v6209_v2 = vpop.eup %6208  ;;  %6220 = verf.f32 %v4000_v8  ;;  %v3969_v8 = vmul.f32 0.5, %v3924_v20 }
0x10cd   : > { %v6211_v21 = vpop.eup %6210  ;;  %v4058_v11 = vadd.f32 1.0, %v6209_v2  ;;  %6222 = verf.f32 %v4001_v36 }
0x10ce   : > { %v6213_v27 = vpop.eup %6212  ;;  %v4059_v60 = vadd.f32 1.0, %v6211_v21 }
0x10cf   : > { %v6215_v56 = vpop.eup %6214  ;;  %v4060_v24 = vadd.f32 1.0, %v6213_v27  ;;  %v4090_v13 = vmul.f32 %v4058_v11, %v3962_v43 }
0x10d0   : > { %v4061_v25 = vadd.f32 1.0, %v6215_v56  ;;  %v3927_v57 = vpop.f32.mrb[104].mxu1  ;;  %v4091_v28 = vmul.f32 %v4059_v60, %v3963_v41 }
0x10d1   : > { %v4092_v6 = vmul.f32 %v4060_v24, %v3964_v31  ;;  %v3928_v15 = vadd.f32 %v3927_v57, %v8930_v40  ;;  %v3929_v61 = vpop.f32.mrb[105].mxu1 }
0x10d2   : > { %v4093_v38 = vmul.f32 %v4061_v25, %v3965_v7  ;;  %v3930_v23 = vadd.f32 %v3929_v61, %v8934_v47  ;;  %v3931_v48 = vpop.f32.mrb[106].mxu1 }
0x10d3   : > { %v4002_v30 = vmul.f32 0.70710677, %v3928_v15  ;;  %v3932_v4 = vadd.f32 %v3931_v48, %v8930_v40  ;;  %v3933_v53 = vpop.f32.mrb[107].mxu1  ;;  %v4114_v37 = vpack.c.bf16 %v4092_v6, %v4090_v13 }
0x10d4   : > { %v6217_v63 = vpop.eup %6216  ;;  %v4003_v26 = vmul.f32 0.70710677, %v3930_v23  ;;  %v3934_v55 = vadd.f32 %v3933_v53, %v8934_v47  ;;  %v4115_v32 = vpack.c.bf16 %v4093_v38, %v4091_v28 }
0x10d5   : > { %v6219_v12 = vpop.eup %6218  ;;  %v4062_v49 = vadd.f32 1.0, %v6217_v63  ;;  %6224 = verf.f32 %v4002_v30  ;;  %v4004_v33 = vmul.f32 0.70710677, %v3932_v4  ;;  %v3970_v30 = vmul.f32 0.5, %v3928_v15 }
0x10d6   : > { %v6221_v52 = vpop.eup %6220  ;;  %v4063_v10 = vadd.f32 1.0, %v6219_v12  ;;  %6226 = verf.f32 %v4003_v26  ;;  %v4005_v59 = vmul.f32 0.70710677, %v3934_v55  ;;  %4321 = vmatprep.mubr.bf16.mxu0 %v4115_v32  ;;  %v3972_v53 = vmul.f32 0.5, %v3932_v4 }
0x10d7   : > { %v6223_v16 = vpop.eup %6222  ;;  %v4064_v9 = vadd.f32 1.0, %v6221_v52  ;;  %6228 = verf.f32 %v4004_v33  ;;  %4322 = vmatmul.mubr.bf16.gmra.mrb[128].mxu0 %v4114_v37  ;;  %v4094_v21 = vmul.f32 %v4062_v49, %v3966_v0  ;;  %v3971_v63 = vmul.f32 0.5, %v3930_v23 }
0x10d8   : > { %v4065_v36 = vadd.f32 1.0, %v6223_v16  ;;  %6230 = verf.f32 %v4005_v59  ;;  %v3937_v2 = vpop.f32.mrb[108].mxu1  ;;  %v4095_v56 = vmul.f32 %v4063_v10, %v3967_v62 }
0x10d9   : > { %v4096_v11 = vmul.f32 %v4064_v9, %v3968_v14  ;;  %v3938_v27 = vadd.f32 %v3937_v2, %v8930_v40  ;;  %v3939_v60 = vpop.f32.mrb[109].mxu1 }
0x10da   : > { %v4097_v43 = vmul.f32 %v4065_v36, %v3969_v8  ;;  %v3940_v31 = vadd.f32 %v3939_v60, %v8934_v47  ;;  %v3941_v24 = vpop.f32.mrb[110].mxu1 }
0x10db   : > { %v4006_v18 = vmul.f32 0.70710677, %v3938_v27  ;;  %v3942_v42 = vadd.f32 %v3941_v24, %v8930_v40  ;;  %v3943_v41 = vpop.f32.mrb[111].mxu1  ;;  %v4116_v7 = vpack.c.bf16 %v4096_v11, %v4094_v21  ;;  %v3974_v8 = vmul.f32 0.5, %v3938_v27 }
0x10dc   : > { %v4007_v17 = vmul.f32 0.70710677, %v3940_v31  ;;  %v3944_v20 = vadd.f32 %v3943_v41, %v8934_v47  ;;  %v4117_v25 = vpack.c.bf16 %v4097_v43, %v4095_v56  ;;  %v3973_v47 = vmul.f32 0.5, %v3934_v55 }
0x10dd   : > { %6232 = verf.f32 %v4006_v18  ;;  %v4008_v57 = vmul.f32 0.70710677, %v3942_v42  ;;  %v3976_v15 = vmul.f32 0.5, %v3942_v42  ;;  %v3975_v23 = vmul.f32 0.5, %v3940_v31  ;;  %v8976_v18 = vld [vmem:[#allocation21] ss:$0 sm:$0xff] }
0x10de   : > { %6234 = verf.f32 %v4007_v17  ;;  %v4009_v13 = vmul.f32 0.70710677, %v3944_v20  ;;  %4329 = vmatprep.mubr.bf16.mxu0 %v4117_v25  ;;  %v3977_v55 = vmul.f32 0.5, %v3944_v20 }
0x10df   : > { %v6225_v6 = vpop.eup %6224  ;;  %6236 = verf.f32 %v4008_v57  ;;  %4330 = vmatmul.mubr.bf16.gmra.mrb[132].mxu0 %v4116_v7 }
0x10e0   : > { %v6227_v61 = vpop.eup %6226  ;;  %v4066_v28 = vadd.f32 1.0, %v6225_v6  ;;  %6238 = verf.f32 %v4009_v13 }
0x10e1   : > { %v6229_v38 = vpop.eup %6228  ;;  %v4067_v48 = vadd.f32 1.0, %v6227_v61 }
0x10e2   : > { %v6231_v40 = vpop.eup %6230  ;;  %v4068_v37 = vadd.f32 1.0, %v6229_v38  ;;  %v4098_v32 = vmul.f32 %v4066_v28, %v3970_v30 }
0x10e3   : > { %v4069_v26 = vadd.f32 1.0, %v6231_v40  ;;  %v4099_v49 = vmul.f32 %v4067_v48, %v3971_v63 }
0x10e4   : > { %v4100_v12 = vmul.f32 %v4068_v37, %v3972_v53 }
0x10e5   : > { %v4101_v33 = vmul.f32 %v4069_v26, %v3973_v47 }
0x10e6   : > { %v4118_v52 = vpack.c.bf16 %v4100_v12, %v4098_v32 }
0x10e7   : > { %v6233_v10 = vpop.eup %6232  ;;  %v4119_v59 = vpack.c.bf16 %v4101_v33, %v4099_v49 }
0x10e8   : > { %v6235_v16 = vpop.eup %6234  ;;  %v4070_v0 = vadd.f32 1.0, %v6233_v10 }
0x10e9   : > { %v6237_v14 = vpop.eup %6236  ;;  %v4071_v9 = vadd.f32 1.0, %v6235_v16  ;;  %4337 = vmatprep.mubr.bf16.mxu1 %v4119_v59 }
0x10ea   : > { %v6239_v62 = vpop.eup %6238  ;;  %v4072_v4 = vadd.f32 1.0, %v6237_v14  ;;  %4338 = vmatmul.mubr.bf16.vlgmr.msra.gmra.mrb[112].mxu1 %v4118_v52  ;;  %v4102_v2 = vmul.f32 %v4070_v0, %v3974_v8 }
0x10eb   : > { %v4073_v36 = vadd.f32 1.0, %v6239_v62  ;;  %v4103_v11 = vmul.f32 %v4071_v9, %v3975_v23 }
0x10ec   : > { %v4104_v21 = vmul.f32 %v4072_v4, %v3976_v15 }
0x10ed   : > { %v4105_v60 = vmul.f32 %v4073_v36, %v3977_v55 }
0x10ee   : > { %v4120_v56 = vpack.c.bf16 %v4104_v21, %v4102_v2 }
0x10ef   : > { %v4121_v43 = vpack.c.bf16 %v4105_v60, %v4103_v11 }
0x10f1   : > { %4345 = vmatprep.mubr.bf16.mxu1 %v4121_v43 }
0x10f2   : > { %4346 = vmatmul.mubr.bf16.gmra.mrb[116].mxu1 %v4120_v56 }
0x116e   : > { %v5222_v24 = vpop.f32.mrb[112].mxu0 }
0x116f   : > { %v5223_v41 = vpop.f32.mrb[113].mxu0 }
0x1170   : > { %v5224_v7 = vadd.f32 %v5223_v41, %v5222_v24  ;;  %v5225_v27 = vpop.f32.mrb[114].mxu0 }
0x1171   : > { %v5226_v42 = vpop.f32.mrb[115].mxu0 }
0x1172   : > { %v4292_v17 = vadd.f32 %v5224_v7, %v8976_v18  ;;  %v5227_v31 = vadd.f32 %v5226_v42, %v5225_v27 }
0x1174   : > { %v4295_v20 = vadd.f32 %v5227_v31, %v8976_v18  ;;  %v8981_v25 = vadd.f32 %v4292_v17, %v8830_v5 }
0x1176   : > { %4370 = vadd.xlane.f32.xlu0 %v8981_v25  ;;  %v5228_v57 = vpop.f32.mrb[116].mxu0  ;;  %v8985_v13 = vadd.f32 %v4295_v20, %v8833_v19 }
0x1177   : > { %v5229_v6 = vpop.f32.mrb[117].mxu0 }
0x1178   : > { %v5230_v61 = vadd.f32 %v5229_v6, %v5228_v57  ;;  %4372 = vadd.xlane.f32.xlu1 %v8985_v13  ;;  %v5231_v28 = vpop.f32.mrb[118].mxu0 }
0x1179   : > { %v5232_v38 = vpop.f32.mrb[119].mxu0 }
0x117a   : > { %v4300_v48 = vadd.f32 %v5230_v61, %v8976_v18  ;;  %v5233_v40 = vadd.f32 %v5232_v38, %v5231_v28 }
0x117c   : > { %v4303_v30 = vadd.f32 %v5233_v40, %v8976_v18  ;;  %v8991_v5 = vadd.f32 %v4300_v48, %v8846_v22 }
0x117e   : > { %4374 = vadd.xlane.f32.xlu0 %v8991_v5  ;;  %v8995_v53 = vadd.f32 %v4303_v30, %v8843_v50  ;;  %v5234_v19 = vpop.f32.mrb[120].mxu0 }
0x117f   : > { %v5235_v37 = vpop.f32.mrb[121].mxu0 }
0x1180   : > { %4376 = vadd.xlane.f32.xlu1 %v8995_v53  ;;  %v5236_v63 = vadd.f32 %v5235_v37, %v5234_v19  ;;  %v5237_v47 = vpop.f32.mrb[122].mxu0 }
0x1181   : > { %v5238_v26 = vpop.f32.mrb[123].mxu0 }
0x1182   : > { %v4308_v32 = vadd.f32 %v5236_v63, %v8976_v18  ;;  %v5239_v12 = vadd.f32 %v5238_v26, %v5237_v47 }
0x1184   : > { %v4311_v49 = vadd.f32 %v5239_v12, %v8976_v18  ;;  %v9001_v22 = vadd.f32 %v4308_v32, %v8856_v29 }
0x1186   : > { %4378 = vadd.xlane.f32.xlu0 %v9001_v22  ;;  %v5240_v33 = vpop.f32.mrb[124].mxu0  ;;  %v9005_v50 = vadd.f32 %v4311_v49, %v8859_v44 }
0x1187   : > { %v5241_v52 = vpop.f32.mrb[125].mxu0 }
0x1188   : > { %v5242_v10 = vadd.f32 %v5241_v52, %v5240_v33  ;;  %4380 = vadd.xlane.f32.xlu1 %v9005_v50  ;;  %v5243_v59 = vpop.f32.mrb[126].mxu0 }
0x1189   : > { %v5244_v16 = vpop.f32.mrb[127].mxu0 }
0x118a   : > { %v4316_v0 = vadd.f32 %v5242_v10, %v8976_v18  ;;  %v5245_v14 = vadd.f32 %v5244_v16, %v5243_v59 }
0x118c   : > { %v4319_v9 = vadd.f32 %v5245_v14, %v8976_v18  ;;  %v9011_v29 = vadd.f32 %v4316_v0, %v8872_v39 }
0x118e   : > { %4382 = vadd.xlane.f32.xlu0 %v9011_v29  ;;  %v9015_v62 = vadd.f32 %v4319_v9, %v8869_v1 }
0x1190   : > { %4384 = vadd.xlane.f32.xlu1 %v9015_v62 }
0x11aa   : > { %v5246_v44 = vpop.f32.mrb[128].mxu0 }
0x11ab   : > { %v5247_v8 = vpop.f32.mrb[129].mxu0 }
0x11ac   : > { %v5248_v15 = vadd.f32 %v5247_v8, %v5246_v44  ;;  %v5249_v4 = vpop.f32.mrb[130].mxu0 }
0x11ad   : > { %v5250_v23 = vpop.f32.mrb[131].mxu0 }
0x11ae   : > { %v4324_v55 = vadd.f32 %v5248_v15, %v8976_v18  ;;  %v5251_v36 = vadd.f32 %v5250_v23, %v5249_v4 }
0x11b0   : > { %v4327_v2 = vadd.f32 %v5251_v36, %v8976_v18  ;;  %v9021_v39 = vadd.f32 %v4324_v55, %v8882_v3 }
0x11b2   : > { %4386 = vadd.xlane.f32.xlu0 %v9021_v39  ;;  %v5252_v21 = vpop.f32.mrb[132].mxu0  ;;  %v9025_v1 = vadd.f32 %v4327_v2, %v8886_v58 }
0x11b3   : > { %v5253_v11 = vpop.f32.mrb[133].mxu0 }
0x11b4   : > { %v5254_v60 = vadd.f32 %v5253_v11, %v5252_v21  ;;  %4388 = vadd.xlane.f32.xlu1 %v9025_v1  ;;  %v5255_v56 = vpop.f32.mrb[134].mxu0 }
0x11b5   : > { %v5256_v43 = vpop.f32.mrb[135].mxu0 }
0x11b6   : > { %v4332_v24 = vadd.f32 %v5254_v60, %v8976_v18  ;;  %v5257_v41 = vadd.f32 %v5256_v43, %v5255_v56 }
0x11b8   : > { %v4335_v7 = vadd.f32 %v5257_v41, %v8976_v18  ;;  %v9031_v3 = vadd.f32 %v4332_v24, %v8898_v51 }
0x11ba   : > { %4390 = vadd.xlane.f32.xlu0 %v9031_v3  ;;  %v9035_v27 = vadd.f32 %v4335_v7, %v8895_v34 }
0x11bc   : > { %4392 = vadd.xlane.f32.xlu1 %v9035_v27 }
0x11bd   : > { %v5258_v58 = vpop.f32.mrb[112].mxu1 }
0x11be   : > { %v5259_v42 = vpop.f32.mrb[113].mxu1 }
0x11bf   : > { %v5260_v17 = vadd.f32 %v5259_v42, %v5258_v58  ;;  %v5261_v31 = vpop.f32.mrb[114].mxu1 }
0x11c0   : > { %v5262_v20 = vpop.f32.mrb[115].mxu1 }
0x11c1   : > { %v4340_v57 = vadd.f32 %v5260_v17, %v8976_v18  ;;  %v5263_v6 = vadd.f32 %v5262_v20, %v5261_v31 }
0x11c3   : > { %v4343_v61 = vadd.f32 %v5263_v6, %v8976_v18  ;;  %v9041_v51 = vadd.f32 %v4340_v57, %v8908_v35 }
0x11c5   : > { %4394 = vadd.xlane.f32.xlu0 %v9041_v51  ;;  %v5264_v28 = vpop.f32.mrb[116].mxu1  ;;  %v9045_v34 = vadd.f32 %v4343_v61, %v8911_v45 }
0x11c6   : > { %v5265_v38 = vpop.f32.mrb[117].mxu1 }
0x11c7   : > { %v5266_v48 = vadd.f32 %v5265_v38, %v5264_v28  ;;  %4396 = vadd.xlane.f32.xlu1 %v9045_v34  ;;  %v5267_v40 = vpop.f32.mrb[118].mxu1 }
0x11c8   : > { %v5268_v30 = vpop.f32.mrb[119].mxu1 }
0x11c9   : > { %v4348_v19 = vadd.f32 %v5266_v48, %v8976_v18  ;;  %v5269_v37 = vadd.f32 %v5268_v30, %v5267_v40 }
0x11cb   : > { %v4351_v63 = vadd.f32 %v5269_v37, %v8976_v18  ;;  %v9051_v35 = vadd.f32 %v4348_v19, %v8924_v54 }
0x11cd   : > { %4398 = vadd.xlane.f32.xlu0 %v9051_v35  ;;  %v9055_v47 = vadd.f32 %v4351_v63, %v8921_v46 }
0x11cf   : > { %4400 = vadd.xlane.f32.xlu1 %v9055_v47 }
0x1203   : > { %v4371_v45 = vpop.xlane.xlu0 %4370 }
0x1204   : > { %v4402_v26 = vmul.f32 0.0078125, %v4371_v45 }
0x1205   : > { %v4373_v32 = vpop.xlane.xlu1 %4372 }
0x1206   : > { %v9059_v12 = vsub.f32 %v8981_v25, %v4402_v26  ;;  %v4403_v49 = vmul.f32 0.0078125, %v4373_v32 }
0x1208   : > { %v9062_v33 = vsub.f32 %v8985_v13, %v4403_v49  ;;  %v4434_v54 = vmul.f32 %v9059_v12, %v9059_v12 }
0x120a   : > { %4450 = vadd.xlane.f32.xlu0 %v4434_v54  ;;  %v4435_v46 = vmul.f32 %v9062_v33, %v9062_v33 }
0x120b   : > { %v4375_v18 = vpop.xlane.xlu0 %4374 }
0x120c   : > { %v4404_v52 = vmul.f32 0.0078125, %v4375_v18  ;;  %4452 = vadd.xlane.f32.xlu1 %v4435_v46 }
0x120d   : > { %v4377_v10 = vpop.xlane.xlu1 %4376 }
0x120e   : > { %v9069_v59 = vsub.f32 %v8991_v5, %v4404_v52  ;;  %v4405_v25 = vmul.f32 0.0078125, %v4377_v10 }
0x1210   : > { %v9072_v16 = vsub.f32 %v8995_v53, %v4405_v25  ;;  %v4436_v13 = vmul.f32 %v9069_v59, %v9069_v59 }
0x1212   : > { %4454 = vadd.xlane.f32.xlu0 %v4436_v13  ;;  %v4437_v0 = vmul.f32 %v9072_v16, %v9072_v16 }
0x1213   : > { %v4379_v14 = vpop.xlane.xlu0 %4378 }
0x1214   : > { %4456 = vadd.xlane.f32.xlu1 %v4437_v0  ;;  %v4406_v9 = vmul.f32 0.0078125, %v4379_v14 }
0x1215   : > { %v4381_v44 = vpop.xlane.xlu1 %4380 }
0x1216   : > { %v9079_v8 = vsub.f32 %v9001_v22, %v4406_v9  ;;  %v4407_v5 = vmul.f32 0.0078125, %v4381_v44 }
0x1218   : > { %v9082_v15 = vsub.f32 %v9005_v50, %v4407_v5  ;;  %v4438_v53 = vmul.f32 %v9079_v8, %v9079_v8 }
0x121a   : > { %4458 = vadd.xlane.f32.xlu0 %v4438_v53  ;;  %v4439_v4 = vmul.f32 %v9082_v15, %v9082_v15 }
0x121b   : > { %v4383_v23 = vpop.xlane.xlu0 %4382 }
0x121c   : > { %v4408_v55 = vmul.f32 0.0078125, %v4383_v23  ;;  %4460 = vadd.xlane.f32.xlu1 %v4439_v4 }
0x121d   : > { %v4385_v36 = vpop.xlane.xlu1 %4384 }
0x121e   : > { %v9089_v2 = vsub.f32 %v9011_v29, %v4408_v55  ;;  %v4409_v22 = vmul.f32 0.0078125, %v4385_v36 }
0x1220   : > { %v9092_v21 = vsub.f32 %v9015_v62, %v4409_v22  ;;  %v4440_v50 = vmul.f32 %v9089_v2, %v9089_v2 }
0x1222   : > { %4462 = vadd.xlane.f32.xlu0 %v4440_v50  ;;  %v4441_v11 = vmul.f32 %v9092_v21, %v9092_v21 }
0x1224   : > { %4464 = vadd.xlane.f32.xlu1 %v4441_v11 }
0x123f   : > { %v4387_v60 = vpop.xlane.xlu0 %4386 }
0x1240   : > { %v4410_v56 = vmul.f32 0.0078125, %v4387_v60 }
0x1241   : > { %v4389_v43 = vpop.xlane.xlu1 %4388 }
0x1242   : > { %v9099_v24 = vsub.f32 %v9021_v39, %v4410_v56  ;;  %v4411_v29 = vmul.f32 0.0078125, %v4389_v43 }
0x1244   : > { %v9102_v41 = vsub.f32 %v9025_v1, %v4411_v29  ;;  %v4442_v62 = vmul.f32 %v9099_v24, %v9099_v24 }
0x1246   : > { %4466 = vadd.xlane.f32.xlu0 %v4442_v62  ;;  %v4443_v7 = vmul.f32 %v9102_v41, %v9102_v41 }
0x1247   : > { %v4391_v58 = vpop.xlane.xlu0 %4390 }
0x1248   : > { %v4412_v42 = vmul.f32 0.0078125, %v4391_v58  ;;  %4468 = vadd.xlane.f32.xlu1 %v4443_v7 }
0x1249   : > { %v4393_v17 = vpop.xlane.xlu1 %4392 }
0x124a   : > { %v9109_v31 = vsub.f32 %v9031_v3, %v4412_v42  ;;  %v4413_v39 = vmul.f32 0.0078125, %v4393_v17 }
0x124c   : > { %v9112_v20 = vsub.f32 %v9035_v27, %v4413_v39  ;;  %v4444_v1 = vmul.f32 %v9109_v31, %v9109_v31 }
0x124e   : > { %4470 = vadd.xlane.f32.xlu0 %v4444_v1  ;;  %v4445_v57 = vmul.f32 %v9112_v20, %v9112_v20 }
0x1250   : > { %4472 = vadd.xlane.f32.xlu1 %v4445_v57 }
0x1252   : > { %v4395_v6 = vpop.xlane.xlu0 %4394 }
0x1253   : > { %v4414_v61 = vmul.f32 0.0078125, %v4395_v6 }
0x1254   : > { %v4397_v28 = vpop.xlane.xlu1 %4396 }
0x1255   : > { %v9119_v38 = vsub.f32 %v9041_v51, %v4414_v61  ;;  %v4415_v3 = vmul.f32 0.0078125, %v4397_v28 }
0x1257   : > { %v9122_v48 = vsub.f32 %v9045_v34, %v4415_v3  ;;  %v4446_v27 = vmul.f32 %v9119_v38, %v9119_v38 }
0x1259   : > { %4474 = vadd.xlane.f32.xlu0 %v4446_v27  ;;  %v4447_v40 = vmul.f32 %v9122_v48, %v9122_v48 }
0x125a   : > { %v4399_v30 = vpop.xlane.xlu0 %4398 }
0x125b   : > { %v4416_v19 = vmul.f32 0.0078125, %v4399_v30  ;;  %4476 = vadd.xlane.f32.xlu1 %v4447_v40 }
0x125c   : > { %v4401_v51 = vpop.xlane.xlu1 %4400 }
0x125d   : > { %v9129_v37 = vsub.f32 %v9051_v35, %v4416_v19  ;;  %v4417_v63 = vmul.f32 0.0078125, %v4401_v51 }
0x125f   : > { %v9132_v34 = vsub.f32 %v9055_v47, %v4417_v63  ;;  %v4448_v45 = vmul.f32 %v9129_v37, %v9129_v37 }
0x1261   : > { %4478 = vadd.xlane.f32.xlu0 %v4448_v45  ;;  %v4449_v26 = vmul.f32 %v9132_v34, %v9132_v34 }
0x1263   : > { %4480 = vadd.xlane.f32.xlu1 %v4449_v26 }
0x1264   : > { %6643 = shalt.err (!%p6640_p3)
}
0x1265   : > { %s6644_s20 = scalar_lea.hbm %s9143_s15, 8192  ;;  %s6648_s30 = scalar_lea.hbm %s9496_s2, 16384 }
0x1266   : > { %p6645_p6 = scmp.ne.s32.totalorder %s9143_s15, %s6644_s20  ;;  %p6649_p10 = scmp.lt.u32.totalorder %s9143_s15, %s9496_s2 }
0x1267   : > { %p6650_p5 = scmp.lt.u32.totalorder %s6648_s30, %s6644_s20  ;;  %p6652_p9 = scmp.lt.u32.totalorder %s6644_s20, %s9143_s15 }
0x1268   : > { %p6646_p2 = pnand %p6645_p6, %p9497_p8 }
0x1269   : > { %p6651_p7 = por %p6650_p5, %p6649_p10 }
0x126a   : > { %p6647_p4 = pneg %p6646_p2 }
0x126b   : > { %p6653_p11 = por %p6652_p9, %p6651_p7 }
0x126d   : > { %p6654_p0 = pnand %p6653_p11, %p6647_p4 }
0x126f   : > { %6657 = shalt.err (!%p6654_p0)
}
0x1270   : > { %s6782_s8 = smov 128   ;;  %s6783_s5 = smov 8   ;;  %v9175_v53 = vld [vmem:[#allocation14] ss:$0 sm:$0xff]  ;;  %v9179_v22 = vld [vmem:[#allocation15] ss:$0 sm:$0xff] }
0x1271   : > { %5683 = dma.vmem_to_hbm [thread:$0]  (%p9497_p8), %s9145_s29, 8192, %s9143_s15, %s4600_s7, %s6782_s8, %s6782_s8, %s6783_s5  }
0x1272   : > { %s9184_s29 = scalar_lea.vmem [#allocation23], %s7254_s0  ;;  %s5044_s0 = sshll.u32 %s6876_s14, 11 }
0x1273   : > { %s4613_s15 = sshll.u32 %s9184_s29, 4  ;;  %s9498_s18 = sld [smem:[#allocation79_spill]]  ;;  %s9251_s15 = int_to_ptr.vmem [resolvable:$true] %s4613_s15 }
0x1274   : > { %s4595_s14 = scalar_lea.sflag [#allocation5], %s7251_s19  ;;  %s6658_s20 = scalar_lea.vmem %s9251_s15, 2048 }
0x1275   : > { %p6659_p12 = scmp.ne.s32.totalorder %s9251_s15, %s6658_s20  ;;  %s6784_s3 = smov [#allocation23]  }
0x1276   : > { %s6662_s24 = sshll.u32 %s6784_s3, 4  ;;  %s6663_s24 = int_to_ptr.vmem [resolvable:$false] %s6662_s24 }
0x1277   : > { %p6660_p13 = pnand %p6659_p12, %p9497_p8  ;;  %s6664_s30 = scalar_lea.vmem %s6663_s24, 4096 }
0x1278   : > { %p6665_p3 = scmp.lt.s32.totalorder %s9251_s15, %s6663_s24  ;;  %p6666_p6 = scmp.lt.s32.totalorder %s6664_s30, %s6658_s20 }
0x1279   : > { %s9249_s13 = scalar_lea.hbm %s9498_s18, %s5044_s0  ;;  %p6661_p1 = pneg %p6660_p13 }
0x127a   : > { %p6667_p2 = por %p6666_p6, %p6665_p3 }
0x127c   : > { %p6668_p4 = pnand %p6667_p2, %p6661_p1 }
0x1297   : > { %v4451_v35 = vpop.xlane.xlu0 %4450 }
0x1298   : > { %v4482_v47 = vmul.f32 0.0078125, %v4451_v35 }
0x1299   : > { %v4453_v32 = vpop.xlane.xlu1 %4452 }
0x129a   : > { %v4498_v49 = vadd.f32 1e-05, %v4482_v47  ;;  %v4483_v54 = vmul.f32 0.0078125, %v4453_v32 }
0x129c   : > { %6240 = vrsqrt.f32 %v4498_v49  ;;  %v4499_v46 = vadd.f32 1e-05, %v4483_v54 }
0x129e   : > { %6242 = vrsqrt.f32 %v4499_v46 }
0x129f   : > { %v4455_v18 = vpop.xlane.xlu0 %4454 }
0x12a0   : > { %v4484_v52 = vmul.f32 0.0078125, %v4455_v18 }
0x12a1   : > { %v4457_v10 = vpop.xlane.xlu1 %4456 }
0x12a2   : > { %v4500_v25 = vadd.f32 1e-05, %v4484_v52  ;;  %v4485_v13 = vmul.f32 0.0078125, %v4457_v10 }
0x12a4   : > { %6244 = vrsqrt.f32 %v4500_v25  ;;  %v4501_v0 = vadd.f32 1e-05, %v4485_v13 }
0x12a6   : > { %v6241_v14 = vpop.eup %6240  ;;  %6246 = vrsqrt.f32 %v4501_v0 }
0x12a7   : > { %v4530_v9 = vmul.f32 %v6241_v14, %v9059_v12  ;;  %v4459_v5 = vpop.xlane.xlu0 %4458 }
0x12a8   : > { %v6243_v44 = vpop.eup %6242  ;;  %v4486_v55 = vmul.f32 0.0078125, %v4459_v5 }
0x12a9   : > { %v4546_v4 = vmul.f32 %v9175_v53, %v4530_v9  ;;  %v4531_v23 = vmul.f32 %v6243_v44, %v9062_v33  ;;  %v4461_v36 = vpop.xlane.xlu1 %4460 }
0x12aa   : > { %v4502_v60 = vadd.f32 1e-05, %v4486_v55  ;;  %v4487_v56 = vmul.f32 0.0078125, %v4461_v36 }
0x12ab   : > { %v4562_v50 = vadd.f32 %v9179_v22, %v4546_v4  ;;  %v4547_v11 = vmul.f32 %v9175_v53, %v4531_v23 }
0x12ac   : > { %6248 = vrsqrt.f32 %v4502_v60  ;;  %v4503_v33 = vadd.f32 1e-05, %v4487_v56 }
0x12ad   : > { %4578 = vst [vmem:[%s9184_s29] sm:$0xff] %v4562_v50  ;;  %v4563_v12 = vadd.f32 %v9179_v22, %v4547_v11 }
0x12ae   : > { %v6245_v43 = vpop.eup %6244  ;;  %6250 = vrsqrt.f32 %v4503_v33 }
0x12af   : > { %4579 = vst [vmem:[%s9184_s29 + $0x8] sm:$0xff] %v4563_v12  ;;  %v4532_v29 = vmul.f32 %v6245_v43, %v9069_v59  ;;  %v4463_v7 = vpop.xlane.xlu0 %4462 }
0x12b0   : > { %v6247_v62 = vpop.eup %6246  ;;  %v4488_v17 = vmul.f32 0.0078125, %v4463_v7 }
0x12b1   : > { %v4548_v58 = vmul.f32 %v9175_v53, %v4532_v29  ;;  %v4533_v42 = vmul.f32 %v6247_v62, %v9072_v16  ;;  %v4465_v39 = vpop.xlane.xlu1 %4464 }
0x12b2   : > { %v4504_v6 = vadd.f32 1e-05, %v4488_v17  ;;  %v4489_v61 = vmul.f32 0.0078125, %v4465_v39 }
0x12b3   : > { %v4564_v1 = vadd.f32 %v9179_v22, %v4548_v58  ;;  %v4549_v57 = vmul.f32 %v9175_v53, %v4533_v42 }
0x12b4   : > { %6252 = vrsqrt.f32 %v4504_v6  ;;  %v4505_v28 = vadd.f32 1e-05, %v4489_v61 }
0x12b5   : > { %4580 = vst [vmem:[%s9184_s29 + $0x10] sm:$0xff] %v4564_v1  ;;  %v4565_v59 = vadd.f32 %v9179_v22, %v4549_v57 }
0x12b6   : > { %v6249_v3 = vpop.eup %6248  ;;  %6254 = vrsqrt.f32 %v4505_v28 }
0x12b7   : > { %4581 = vst [vmem:[%s9184_s29 + $0x18] sm:$0xff] %v4565_v59  ;;  %v4534_v16 = vmul.f32 %v6249_v3, %v9079_v8 }
0x12b8   : > { %v6251_v27 = vpop.eup %6250 }
0x12b9   : > { %v4550_v40 = vmul.f32 %v9175_v53, %v4534_v16  ;;  %v4535_v30 = vmul.f32 %v6251_v27, %v9082_v15 }
0x12bb   : > { %v4566_v19 = vadd.f32 %v9179_v22, %v4550_v40  ;;  %v4551_v51 = vmul.f32 %v9175_v53, %v4535_v30 }
0x12bd   : > { %4582 = vst [vmem:[%s9184_s29 + $0x20] sm:$0xff] %v4566_v19  ;;  %v4567_v63 = vadd.f32 %v9179_v22, %v4551_v51 }
0x12be   : > { %v6253_v45 = vpop.eup %6252 }
0x12bf   : > { %4583 = vst [vmem:[%s9184_s29 + $0x28] sm:$0xff] %v4567_v63  ;;  %v4536_v26 = vmul.f32 %v6253_v45, %v9089_v2 }
0x12c0   : > { %v6255_v35 = vpop.eup %6254 }
0x12c1   : > { %v4552_v8 = vmul.f32 %v9175_v53, %v4536_v26  ;;  %v4537_v47 = vmul.f32 %v6255_v35, %v9092_v21 }
0x12c3   : > { %v4568_v32 = vadd.f32 %v9179_v22, %v4552_v8  ;;  %v4553_v15 = vmul.f32 %v9175_v53, %v4537_v47 }
0x12c5   : > { %4584 = vst [vmem:[%s9184_s29 + $0x30] sm:$0xff] %v4568_v32  ;;  %v4569_v49 = vadd.f32 %v9179_v22, %v4553_v15 }
0x12c7   : > { %4585 = vst [vmem:[%s9184_s29 + $0x38] sm:$0xff] %v4569_v49 }
0x12d3   : > { %v4467_v54 = vpop.xlane.xlu0 %4466 }
0x12d4   : > { %v4490_v46 = vmul.f32 0.0078125, %v4467_v54 }
0x12d5   : > { %v4469_v18 = vpop.xlane.xlu1 %4468 }
0x12d6   : > { %v4506_v52 = vadd.f32 1e-05, %v4490_v46  ;;  %v4491_v10 = vmul.f32 0.0078125, %v4469_v18 }
0x12d8   : > { %6256 = vrsqrt.f32 %v4506_v52  ;;  %v4507_v2 = vadd.f32 1e-05, %v4491_v10 }
0x12da   : > { %6258 = vrsqrt.f32 %v4507_v2 }
0x12db   : > { %v4471_v25 = vpop.xlane.xlu0 %4470 }
0x12dc   : > { %v4492_v13 = vmul.f32 0.0078125, %v4471_v25 }
0x12dd   : > { %v4473_v0 = vpop.xlane.xlu1 %4472 }
0x12de   : > { %v4508_v21 = vadd.f32 1e-05, %v4492_v13  ;;  %v4493_v14 = vmul.f32 0.0078125, %v4473_v0 }
0x12e0   : > { %6260 = vrsqrt.f32 %v4508_v21  ;;  %v4509_v9 = vadd.f32 1e-05, %v4493_v14 }
0x12e2   : > { %v6257_v44 = vpop.eup %6256  ;;  %6262 = vrsqrt.f32 %v4509_v9 }
0x12e3   : > { %v4538_v5 = vmul.f32 %v6257_v44, %v9099_v24 }
0x12e4   : > { %v6259_v4 = vpop.eup %6258 }
0x12e5   : > { %v4554_v23 = vmul.f32 %v9175_v53, %v4538_v5  ;;  %v4539_v55 = vmul.f32 %v6259_v4, %v9102_v41 }
0x12e6   : > { %v4475_v36 = vpop.xlane.xlu0 %4474 }
0x12e7   : > { %v4570_v50 = vadd.f32 %v9179_v22, %v4554_v23  ;;  %v4555_v11 = vmul.f32 %v9175_v53, %v4539_v55  ;;  %v4494_v60 = vmul.f32 0.0078125, %v4475_v36 }
0x12e8   : > { %v4477_v56 = vpop.xlane.xlu1 %4476 }
0x12e9   : > { %4586 = vst [vmem:[%s9184_s29 + $0x40] sm:$0xff] %v4570_v50  ;;  %v4571_v12 = vadd.f32 %v9179_v22, %v4555_v11  ;;  %v4510_v33 = vadd.f32 1e-05, %v4494_v60  ;;  %v4495_v43 = vmul.f32 0.0078125, %v4477_v56 }
0x12ea   : > { %v6261_v29 = vpop.eup %6260 }
0x12eb   : > { %4587 = vst [vmem:[%s9184_s29 + $0x48] sm:$0xff] %v4571_v12  ;;  %v4540_v24 = vmul.f32 %v6261_v29, %v9109_v31  ;;  %6264 = vrsqrt.f32 %v4510_v33  ;;  %v4511_v41 = vadd.f32 1e-05, %v4495_v43 }
0x12ec   : > { %v6263_v62 = vpop.eup %6262 }
0x12ed   : > { %v4556_v7 = vmul.f32 %v9175_v53, %v4540_v24  ;;  %v4541_v58 = vmul.f32 %v6263_v62, %v9112_v20  ;;  %6266 = vrsqrt.f32 %v4511_v41 }
0x12ee   : > { %v4479_v42 = vpop.xlane.xlu0 %4478 }
0x12ef   : > { %v4572_v17 = vadd.f32 %v9179_v22, %v4556_v7  ;;  %v4557_v39 = vmul.f32 %v9175_v53, %v4541_v58  ;;  %v4496_v1 = vmul.f32 0.0078125, %v4479_v42 }
0x12f0   : > { %v4481_v57 = vpop.xlane.xlu1 %4480 }
0x12f1   : > { %4588 = vst [vmem:[%s9184_s29 + $0x50] sm:$0xff] %v4572_v17  ;;  %v4573_v31 = vadd.f32 %v9179_v22, %v4557_v39  ;;  %v4512_v6 = vadd.f32 1e-05, %v4496_v1  ;;  %v4497_v61 = vmul.f32 0.0078125, %v4481_v57 }
0x12f3   : > { %4589 = vst [vmem:[%s9184_s29 + $0x58] sm:$0xff] %v4573_v31  ;;  %6268 = vrsqrt.f32 %v4512_v6  ;;  %v4513_v59 = vadd.f32 1e-05, %v4497_v61 }
0x12f5   : > { %v6265_v28 = vpop.eup %6264  ;;  %6270 = vrsqrt.f32 %v4513_v59 }
0x12f6   : > { %v4542_v20 = vmul.f32 %v6265_v28, %v9119_v38 }
0x12f7   : > { %v6267_v3 = vpop.eup %6266 }
0x12f8   : > { %v4558_v16 = vmul.f32 %v9175_v53, %v4542_v20  ;;  %v4543_v27 = vmul.f32 %v6267_v3, %v9122_v48 }
0x12fa   : > { %v4574_v40 = vadd.f32 %v9179_v22, %v4558_v16  ;;  %v4559_v30 = vmul.f32 %v9175_v53, %v4543_v27 }
0x12fc   : > { %4590 = vst [vmem:[%s9184_s29 + $0x60] sm:$0xff] %v4574_v40  ;;  %v4575_v19 = vadd.f32 %v9179_v22, %v4559_v30 }
0x12fd   : > { %v6269_v51 = vpop.eup %6268 }
0x12fe   : > { %4591 = vst [vmem:[%s9184_s29 + $0x68] sm:$0xff] %v4575_v19  ;;  %v4544_v63 = vmul.f32 %v6269_v51, %v9129_v37 }
0x12ff   : > { %v6271_v38 = vpop.eup %6270 }
0x1300   : > { %v4560_v45 = vmul.f32 %v9175_v53, %v4544_v63  ;;  %v4545_v26 = vmul.f32 %v6271_v38, %v9132_v34 }
0x1302   : > { %v4576_v48 = vadd.f32 %v9179_v22, %v4560_v45  ;;  %v4561_v35 = vmul.f32 %v9175_v53, %v4545_v26 }
0x1304   : > { %4592 = vst [vmem:[%s9184_s29 + $0x70] sm:$0xff] %v4576_v48  ;;  %v4577_v8 = vadd.f32 %v9179_v22, %v4561_v35 }
0x1306   : > { %4593 = vst [vmem:[%s9184_s29 + $0x78] sm:$0xff] %v4577_v8 }
0x1307   : > { %6671 = shalt.err (!%p6668_p4)
}
0x1308   : > { %s6672_s6 = scalar_lea.hbm %s9249_s13, 2048  ;;  %s6676_s0 = scalar_lea.hbm %s9498_s18, 4096 }
0x1309   : > { %p6673_p10 = scmp.ne.s32.totalorder %s9249_s13, %s6672_s6  ;;  %p6677_p9 = scmp.lt.u32.totalorder %s9249_s13, %s9498_s18 }
0x130a   : > { %p6678_p11 = scmp.lt.u32.totalorder %s6676_s0, %s6672_s6  ;;  %p6680_p12 = scmp.lt.u32.totalorder %s6672_s6, %s9249_s13 }
0x130b   : > { %p6674_p5 = pnand %p6673_p10, %p9497_p8 }
0x130c   : > { %p6679_p0 = por %p6678_p11, %p6677_p9 }
0x130d   : > { %p6675_p7 = pneg %p6674_p5 }
0x130e   : > { %p6681_p13 = por %p6680_p12, %p6679_p0 }
0x1310   : > { %p6682_p1 = pnand %p6681_p13, %p6675_p7 }
0x1312   : > { %6685 = shalt.err (!%p6682_p1)
}
0x1313   : > { %5682 = dma.vmem_to_hbm [thread:$0]  (%p9497_p8), %s9251_s15, 2048, %s9249_s13, %s4595_s14, %s6782_s8, %s6782_s8, %s6783_s5  }
0x1314 PF: > { %s4644_s20 = sand.u32 1, %s6744_s25   ;;  %p9499_p3 = scmp.ne.s32.totalorder %s9391_s12, 0 }
0x1315   : > { %p9500_p6 = scmp.ge.s32.totalorder %s6756_s28, 2  ;;  %s4645_s3 = scalar_lea.sflag [#allocation5], %s4644_s20 }
0x1317   : > { %p5725_p2 = pnand %p9500_p6, %p9499_p3 }
0x1319   : > { %6735 = dma.done.wait (!%p5725_p2), %s4645_s3, 2048  }
0x131a   : > { %6737 = vsyncadd (!%p5725_p2), %s4645_s3, 4294965248  ;;  %s4654_s23 = scalar_lea.sflag [#allocation25], %s4644_s20 }
0x131b   : > { %6739 = dma.done.wait (!%p5725_p2), %s4654_s23, 8192  }
0x131c   : > { %6741 = vsyncadd (!%p5725_p2), %s4654_s23, 4294959104  ;;  %p38_p8 = scmp.ge.s32.totalorder %s7129_s16, 4   ;;  %s9501_s25 = smov %s6748_s26 }
0x131d   : > { %s9502_s26 = smov %s6752_s27  ;;  %s9503_s27 = smov %s7140_s1 }
0x131e   : > { %s9504_s28 = smov %s7129_s16  ;;  %40 = sbr.rel (!%p38_p8) target bundleno = 26 (0x1a), region = 186 }
0x1325   :  { %4659 = vsyncpa [#allocation4], 1 }
0x1326   :  { %4661 = vsyncpa [#allocation4 + $0x1], 1 }
0x1327   :  { %4662 = vsyncpa [#allocation7], 1 }
0x1328   :  { %4664 = vsyncpa [#allocation7 + $0x1], 1 }
0x1329   :  { %4665 = vsyncpa [#allocation10], 1 }
0x132a   :  { %4666 = vsyncpa [#allocation13], 1 }
0x132b   :  { %4667 = vsyncpa [#allocation16], 1 }
0x132c   :  { %4668 = vsyncpa [#allocation19], 1 }
0x132d   :  { %4669 = vsyncpa [#allocation22], 1 }
0x132e   :  { %4670 = vsyncpa [#allocation5], 1 }
0x132f   :  { %4672 = vsyncpa [#allocation5 + $0x1], 1 }
0x1330   :  { %4673 = vsyncpa [#allocation25], 1 }
0x1331   :  { %4675 = vsyncpa [#allocation25 + $0x1], 1 }

</bundles_post_ra>
